<compile_context>
chip_gen: v7x
topology: tpu7x:2x2x1
jax: 0.10.0
libtpu: 0.0.40
codegen_flags: <defaults>
</compile_context>

<pallas_src>
import functools

import jax
import jax.numpy as jnp
from jax.experimental import pallas as pl
from jax.experimental.pallas import tpu as pltpu


# ------------------------------ Pallas kernel ------------------------------


def _network_kernel(
    p1_ref,      # (N*24*24, 25)  conv1 im2col patches
    w1p_ref,     # (25, 8)        conv1 weights, out-ch padded 6 -> 8
    b1p_ref,     # (1, 8)
    w2p_ref,     # (25, 8, 16)    conv2 weights  [tap, in-ch(8), out-ch(16)]
    b2p_ref,     # (1, 16)
    w1fc_ref,    # (16, 16, 128)  fc1 weights    [h*4+w, in-ch(16), out(128)]
    b1fc_ref,    # (1, 128)
    w2fc_ref,    # (128, 64)
    b2fc_ref,    # (1, 64)
    w3fc_ref,    # (64, 10)
    b3fc_ref,    # (1, 10)
    o_ref,       # (N, 10)
    s1,          # VMEM (N*24, 24, 8)   conv1 activations (for strided pool read)
    p1s,         # VMEM (N, 12, 12, 8)  pooled conv1 output (conv2 input)
    s3,          # VMEM (N*8, 8, 16)    conv2 activations
    s5,          # VMEM (N, 4, 4, 16)   pooled conv2 output (fc input)
    *, n,
):
    f32 = jnp.float32

    # ---- conv1: one MXU matmul on im2col patches + bias + ReLU -------------
    y1 = jnp.dot(p1_ref[...], w1p_ref[...], preferred_element_type=f32)
    y1 = jnp.maximum(y1 + b1p_ref[...], 0.0)                 # (N*576, 8)

    # ---- maxpool 2x2 #1 (channels stay on lanes) ----------------------------
    # rows of y1 are ordered (n, i, j); write as (n*i, j, c) and pool:
    #   W via sublane stride-2 reads, H via a leading-dim reshape + index.
    s1[...] = y1.reshape(n * 24, 24, 8)
    wmax = jnp.maximum(s1[:, pl.ds(0, 12, stride=2), :],     # even j
                       s1[:, pl.ds(1, 12, stride=2), :])     # odd  j
    r = wmax.reshape(n, 12, 2, 12, 8)                        # (n, i//2, i%2, j//2, c)
    p1s[...] = jnp.maximum(r[:, :, 0], r[:, :, 1])           # (N, 12, 12, 8)

    # ---- conv2: in-kernel im2col as 25 tap slices accumulated on the MXU ---
    m2 = n * 8 * 8
    acc2 = jnp.zeros((m2, 16), f32)
    for ky in range(5):
        for kx in range(5):
            xs = p1s[:, ky:ky + 8, kx:kx + 8, :]             # (N, 8, 8, 8)
            acc2 = acc2 + jnp.dot(xs.reshape(m2, 8),
                                  w2p_ref[ky * 5 + kx],
                                  preferred_element_type=f32)
    y2 = jnp.maximum(acc2 + b2p_ref[...], 0.0)               # (N*64, 16)

    # ---- maxpool 2x2 #2 -----------------------------------------------------
    s3[...] = y2.reshape(n * 8, 8, 16)                       # (n*h, w, c)
    wmax2 = jnp.maximum(s3[:, pl.ds(0, 4, stride=2), :],
                        s3[:, pl.ds(1, 4, stride=2), :])
    r2 = wmax2.reshape(n, 4, 2, 4, 16)
    s5[...] = jnp.maximum(r2[:, :, 0], r2[:, :, 1])          # (N, 4, 4, 16)

    # ---- fused FC stack: fc1 + ReLU -> fc2 + ReLU -> out --------------------
    # PyTorch's (C,H,W) flatten order is folded into w1fc at init, so fc1 is a
    # sum of 16 per-pixel matmuls over the channel (lane) axis; the (N,128)
    # and (N,64) intermediates never leave vregs/VMEM.
    z1 = jnp.zeros((n, 128), f32)
    for h in range(4):
        for w in range(4):
            z1 = z1 + jnp.dot(s5[:, h, w, :], w1fc_ref[h * 4 + w],
                              preferred_element_type=f32)
    z1 = jnp.maximum(z1 + b1fc_ref[...], 0.0)                # (N, 128)
    z2 = jnp.maximum(jnp.dot(z1, w2fc_ref[...],
                             preferred_element_type=f32) + b2fc_ref[...], 0.0)
    z3 = jnp.dot(z2, w3fc_ref[...],
                 preferred_element_type=f32) + b3fc_ref[...]
    o_ref[...] = z3                                          # (N, 10)


# ------------------------------ wrapper / glue ------------------------------


def _full_spec(shape):
    nd = len(shape)
    return pl.BlockSpec(shape, lambda i, _nd=nd: (0,) * _nd)


def network_forward(prepped, x_nchw):
    """Pallas forward pass.  x_nchw: (N, 1, 28, 28) like the PyTorch module."""
    n = x_nchw.shape[0]
    x = x_nchw.reshape(n, 28, 28).astype(jnp.float32)

    # conv1 im2col: 25 shifted views -> (N*24*24, 25).  This is the only
    # non-Pallas glue; XLA fuses it into a single producer of the kernel input.
    cols = [x[:, ky:ky + 24, kx:kx + 24] for ky in range(5) for kx in range(5)]
    patches = jnp.stack(cols, axis=-1).reshape(n * 24 * 24, 25)

    operands = (
        patches,
        prepped["w1p"], prepped["b1p"],
        prepped["w2p"], prepped["b2p"],
        prepped["w1fc"], prepped["b1fc"],
        prepped["w2fc"], prepped["b2fc"],
        prepped["w3fc"], prepped["b3fc"],
    )
    return pl.pallas_call(
        functools.partial(_network_kernel, n=n),
        out_shape=jax.ShapeDtypeStruct((n, 10), jnp.float32),
        grid=(1,),
        in_specs=[_full_spec(op.shape) for op in operands],
        out_specs=_full_spec((n, 10)),
        scratch_shapes=[
            pltpu.VMEM((n * 24, 24, 8), jnp.float32),
            pltpu.VMEM((n, 12, 12, 8), jnp.float32),
            pltpu.VMEM((n * 8, 8, 16), jnp.float32),
            pltpu.VMEM((n, 4, 4, 16), jnp.float32),
        ],
        compiler_params=pltpu.CompilerParams(
            dimension_semantics=("arbitrary",)),
    )(*operands)


def prepare_params(params):
    """Pad / transpose / permute weights ONCE so the kernel sees lane-friendly
    matmul operands and never needs per-call weight glue."""
    f32 = jnp.float32
    # conv1: (6,1,5,5) -> (25, 8)  [tap = ky*5+kx, out-ch padded to 8]
    w1 = params["conv1_w"].astype(f32).reshape(6, 25).T
    w1p = jnp.zeros((25, 8), f32).at[:, :6].set(w1)
    b1p = jnp.zeros((1, 8), f32).at[0, :6].set(params["conv1_b"].astype(f32))
    # conv2: (12,6,5,5) -> (25, 8, 16)  [tap, in-ch padded, out-ch padded]
    w2 = jnp.transpose(params["conv2_w"].astype(f32), (2, 3, 1, 0)).reshape(25, 6, 12)
    w2p = jnp.zeros((25, 8, 16), f32).at[:, :6, :12].set(w2)
    b2p = jnp.zeros((1, 16), f32).at[0, :12].set(params["conv2_b"].astype(f32))
    # fc1: (120, 192) with PyTorch feature index f = c*16 + h*4 + w
    #   -> (16, 16, 128) indexed [h*4+w, in-ch(16 padded), out(128 padded)]
    w1f = params["fc1_w"].astype(f32).T.reshape(12, 4, 4, 120)       # [c,h,w,u]
    w1f = jnp.transpose(w1f, (1, 2, 0, 3)).reshape(16, 12, 120)      # [(h,w),c,u]
    w1fc = jnp.zeros((16, 16, 128), f32).at[:, :12, :120].set(w1f)
    b1fc = jnp.zeros((1, 128), f32).at[0, :120].set(params["fc1_b"].astype(f32))
    # fc2: (60, 120) -> (128, 64)
    w2fc = jnp.zeros((128, 64), f32).at[:120, :60].set(params["fc2_w"].astype(f32).T)
    b2fc = jnp.zeros((1, 64), f32).at[0, :60].set(params["fc2_b"].astype(f32))
    # out: (10, 60) -> (64, 10)
    w3fc = jnp.zeros((64, 10), f32).at[:60, :].set(params["out_w"].astype(f32).T)
    b3fc = params["out_b"].astype(f32).reshape(1, 10)
    return dict(w1p=w1p, b1p=b1p, w2p=w2p, b2p=b2p, w1fc=w1fc, b1fc=b1fc,
                w2fc=w2fc, b2fc=b2fc, w3fc=w3fc, b3fc=b3fc)


def init_params(key):
    """Deterministic PyTorch-shaped parameters (uniform(-1/sqrt(fan_in), ...))."""
    ks = jax.random.split(key, 10)

    def u(k, shape, fan_in):
        bound = 1.0 / float(fan_in) ** 0.5
        return jax.random.uniform(k, shape, jnp.float32, -bound, bound)

    return {
        "conv1_w": u(ks[0], (6, 1, 5, 5), 1 * 5 * 5),
        "conv1_b": u(ks[1], (6,), 1 * 5 * 5),
        "conv2_w": u(ks[2], (12, 6, 5, 5), 6 * 5 * 5),
        "conv2_b": u(ks[3], (12,), 6 * 5 * 5),
        "fc1_w": u(ks[4], (120, 192), 192),
        "fc1_b": u(ks[5], (120,), 192),
        "fc2_w": u(ks[6], (60, 120), 120),
        "fc2_b": u(ks[7], (60,), 120),
        "out_w": u(ks[8], (10, 60), 60),
        "out_b": u(ks[9], (10,), 60),
    }


def reference_forward(params, x_nchw):
    """Pure-JAX reference for validation."""
    x = jnp.transpose(x_nchw, (0, 2, 3, 1)).astype(jnp.float32)

    def conv(x, w, b):
        y = jax.lax.conv_general_dilated(
            x, jnp.transpose(w, (2, 3, 1, 0)), (1, 1), "VALID",
            dimension_numbers=("NHWC", "HWIO", "NHWC"))
        return jax.nn.relu(y + b)

    def pool(x):
        n, h, w, c = x.shape
        return x.reshape(n, h // 2, 2, w // 2, 2, c).max(axis=(2, 4))

    t = pool(conv(x, params["conv1_w"], params["conv1_b"]))
    t = pool(conv(t, params["conv2_w"], params["conv2_b"]))
    t = jnp.transpose(t, (0, 3, 1, 2)).reshape(t.shape[0], -1)
    t = jax.nn.relu(t @ params["fc1_w"].T + params["fc1_b"])
    t = jax.nn.relu(t @ params["fc2_w"].T + params["fc2_b"])
    return t @ params["out_w"].T + params["out_b"]


if __name__ == "__main__":
    key = jax.random.PRNGKey(0)
    k_param, k_x = jax.random.split(key)
    params = init_params(k_param)
    # Network.forward implies 28x28 single-channel input (12*4*4 flatten).
    x = jax.random.normal(k_x, (2, 1, 28, 28), dtype=jnp.float32)

    prepped = prepare_params(params)          # one-time weight packing
    out = jax.block_until_ready(jax.jit(network_forward)(prepped, x))
    assert out.shape == (2, 10), out.shape

    ref = jax.block_until_ready(reference_forward(params, x))
    assert jnp.allclose(out, ref, rtol=2e-3, atol=2e-3), (
        "mismatch vs reference", float(jnp.max(jnp.abs(out - ref))))

    print("KERNEL_OK")
</pallas_src>

<mosaic_0001>
module attributes {stable_mosaic.version = 11 : i64} {
  func.func @_network_kernel(%arg0: i32, %arg1: memref<1152x25xf32, #tpu.memory_space<vmem>>, %arg2: memref<25x8xf32, #tpu.memory_space<vmem>>, %arg3: memref<1x8xf32, #tpu.memory_space<vmem>>, %arg4: memref<25x8x16xf32, #tpu.memory_space<vmem>>, %arg5: memref<1x16xf32, #tpu.memory_space<vmem>>, %arg6: memref<16x16x128xf32, #tpu.memory_space<vmem>>, %arg7: memref<1x128xf32, #tpu.memory_space<vmem>>, %arg8: memref<128x64xf32, #tpu.memory_space<vmem>>, %arg9: memref<1x64xf32, #tpu.memory_space<vmem>>, %arg10: memref<64x10xf32, #tpu.memory_space<vmem>>, %arg11: memref<1x10xf32, #tpu.memory_space<vmem>>, %arg12: memref<2x10xf32, #tpu.memory_space<vmem>>, %arg13: memref<48x24x8xf32, #tpu.memory_space<vmem>>, %arg14: memref<2x12x12x8xf32, #tpu.memory_space<vmem>>, %arg15: memref<16x8x16xf32, #tpu.memory_space<vmem>>, %arg16: memref<2x4x4x16xf32, #tpu.memory_space<vmem>>) attributes {dimension_semantics = [#tpu.dimension_semantics<arbitrary>], iteration_bounds = array<i64: 1>, scalar_prefetch = 0 : i64, scratch_operands = 4 : i64, tpu.core_type = #tpu.core_type<tc>, window_params = [{pipeline_mode = #tpu.pipeline_mode<synchronous>, transform_indices = @transform_0, window_bounds = array<i64: 1152, 25>}, {pipeline_mode = #tpu.pipeline_mode<synchronous>, transform_indices = @transform_1, window_bounds = array<i64: 25, 8>}, {pipeline_mode = #tpu.pipeline_mode<synchronous>, transform_indices = @transform_2, window_bounds = array<i64: 1, 8>}, {pipeline_mode = #tpu.pipeline_mode<synchronous>, transform_indices = @transform_3, window_bounds = array<i64: 25, 8, 16>}, {pipeline_mode = #tpu.pipeline_mode<synchronous>, transform_indices = @transform_4, window_bounds = array<i64: 1, 16>}, {pipeline_mode = #tpu.pipeline_mode<synchronous>, transform_indices = @transform_5, window_bounds = array<i64: 16, 16, 128>}, {pipeline_mode = #tpu.pipeline_mode<synchronous>, transform_indices = @transform_6, window_bounds = array<i64: 1, 128>}, {pipeline_mode = #tpu.pipeline_mode<synchronous>, transform_indices = @transform_7, window_bounds = array<i64: 128, 64>}, {pipeline_mode = #tpu.pipeline_mode<synchronous>, transform_indices = @transform_8, window_bounds = array<i64: 1, 64>}, {pipeline_mode = #tpu.pipeline_mode<synchronous>, transform_indices = @transform_9, window_bounds = array<i64: 64, 10>}, {pipeline_mode = #tpu.pipeline_mode<synchronous>, transform_indices = @transform_10, window_bounds = array<i64: 1, 10>}, {pipeline_mode = #tpu.pipeline_mode<synchronous>, transform_indices = @transform_11, window_bounds = array<i64: 2, 10>}]} {
    %c0 = arith.constant 0 : index
    %c0_0 = arith.constant 0 : index
    %0 = vector.load %arg1[%c0, %c0_0] : memref<1152x25xf32, #tpu.memory_space<vmem>>, vector<1152x25xf32>
    %c0_1 = arith.constant 0 : index
    %c0_2 = arith.constant 0 : index
    %1 = vector.load %arg2[%c0_1, %c0_2] : memref<25x8xf32, #tpu.memory_space<vmem>>, vector<25x8xf32>
    %cst = arith.constant dense<0.000000e+00> : vector<1152x8xf32>
    %2 = tpu.matmul %0, %1, %cst {dimension_numbers = #tpu.dot_dimension_numbers<[1], [0], [0], [1], [0, 0, 1, 1], [], []>} : vector<1152x25xf32>, vector<25x8xf32>, vector<1152x8xf32> -> vector<1152x8xf32>
    %c0_3 = arith.constant 0 : index
    %c0_4 = arith.constant 0 : index
    %3 = vector.load %arg3[%c0_3, %c0_4] : memref<1x8xf32, #tpu.memory_space<vmem>>, vector<1x8xf32>
    %4 = vector.broadcast %3 : vector<1x8xf32> to vector<1152x8xf32>
    %5 = arith.addf %2, %4 : vector<1152x8xf32>
    %cst_5 = arith.constant 0.000000e+00 : f32
    %6 = vector.broadcast %cst_5 : f32 to vector<1152x8xf32>
    %7 = arith.maximumf %5, %6 : vector<1152x8xf32>
    %8 = vector.shape_cast %7 : vector<1152x8xf32> to vector<48x24x8xf32>
    %c0_6 = arith.constant 0 : index
    %c0_7 = arith.constant 0 : index
    %c0_8 = arith.constant 0 : index
    %9 = vector.load %arg13[%c0_6, %c0_7, %c0_8] : memref<48x24x8xf32, #tpu.memory_space<vmem>>, vector<48x24x8xf32>
    tpu.vector_store %arg13[%c0_6, %c0_7, %c0_8], %8 {strides = array<i32>} : memref<48x24x8xf32, #tpu.memory_space<vmem>>, vector<48x24x8xf32>,
    %c0_9 = arith.constant 0 : index
    %c0_10 = arith.constant 0 : index
    %c0_11 = arith.constant 0 : index
    %10 = tpu.strided_load %arg13[%c0_9, %c0_10, %c0_11] {strides = array<i32: 1, 2, 1>} : memref<48x24x8xf32, #tpu.memory_space<vmem>>, vector<48x12x8xf32>
    %c0_12 = arith.constant 0 : index
    %c1 = arith.constant 1 : index
    %c0_13 = arith.constant 0 : index
    %11 = tpu.strided_load %arg13[%c0_12, %c1, %c0_13] {strides = array<i32: 1, 2, 1>} : memref<48x24x8xf32, #tpu.memory_space<vmem>>, vector<48x12x8xf32>
    %12 = arith.maximumf %10, %11 : vector<48x12x8xf32>
    %13 = vector.shape_cast %12 : vector<48x12x8xf32> to vector<2x12x2x12x8xf32>
    %14 = vector.extract_strided_slice %13 {offsets = [0, 0, 0, 0, 0], sizes = [2, 12, 1, 12, 8], strides = [1, 1, 1, 1, 1]} : vector<2x12x2x12x8xf32> to vector<2x12x1x12x8xf32>
    %15 = vector.shape_cast %14 : vector<2x12x1x12x8xf32> to vector<2x12x12x8xf32>
    %16 = vector.extract_strided_slice %13 {offsets = [0, 0, 1, 0, 0], sizes = [2, 12, 1, 12, 8], strides = [1, 1, 1, 1, 1]} : vector<2x12x2x12x8xf32> to vector<2x12x1x12x8xf32>
    %17 = vector.shape_cast %16 : vector<2x12x1x12x8xf32> to vector<2x12x12x8xf32>
    %18 = arith.maximumf %15, %17 : vector<2x12x12x8xf32>
    %c0_14 = arith.constant 0 : index
    %c0_15 = arith.constant 0 : index
    %c0_16 = arith.constant 0 : index
    %c0_17 = arith.constant 0 : index
    %19 = vector.load %arg14[%c0_14, %c0_15, %c0_16, %c0_17] : memref<2x12x12x8xf32, #tpu.memory_space<vmem>>, vector<2x12x12x8xf32>
    tpu.vector_store %arg14[%c0_14, %c0_15, %c0_16, %c0_17], %18 {strides = array<i32>} : memref<2x12x12x8xf32, #tpu.memory_space<vmem>>, vector<2x12x12x8xf32>,
    %cst_18 = arith.constant 0.000000e+00 : f32
    %20 = vector.broadcast %cst_18 : f32 to vector<128x16xf32>
    %c0_19 = arith.constant 0 : index
    %c0_20 = arith.constant 0 : index
    %c0_21 = arith.constant 0 : index
    %c0_22 = arith.constant 0 : index
    %21 = vector.load %arg14[%c0_19, %c0_20, %c0_21, %c0_22] : memref<2x12x12x8xf32, #tpu.memory_space<vmem>>, vector<2x8x8x8xf32>
    %22 = vector.shape_cast %21 : vector<2x8x8x8xf32> to vector<128x8xf32>
    %c0_23 = arith.constant 0 : index
    %c0_24 = arith.constant 0 : index
    %c0_25 = arith.constant 0 : index
    %23 = vector.load %arg4[%c0_23, %c0_24, %c0_25] : memref<25x8x16xf32, #tpu.memory_space<vmem>>, vector<1x8x16xf32>
    %24 = vector.shape_cast %23 : vector<1x8x16xf32> to vector<8x16xf32>
    %cst_26 = arith.constant dense<0.000000e+00> : vector<128x16xf32>
    %25 = tpu.matmul %22, %24, %cst_26 {dimension_numbers = #tpu.dot_dimension_numbers<[1], [0], [0], [1], [0, 0, 1, 1], [], []>} : vector<128x8xf32>, vector<8x16xf32>, vector<128x16xf32> -> vector<128x16xf32>
    %26 = arith.addf %20, %25 : vector<128x16xf32>
    %c0_27 = arith.constant 0 : index
    %c0_28 = arith.constant 0 : index
    %c1_29 = arith.constant 1 : index
    %c0_30 = arith.constant 0 : index
    %27 = vector.load %arg14[%c0_27, %c0_28, %c1_29, %c0_30] : memref<2x12x12x8xf32, #tpu.memory_space<vmem>>, vector<2x8x8x8xf32>
    %28 = vector.shape_cast %27 : vector<2x8x8x8xf32> to vector<128x8xf32>
    %c1_31 = arith.constant 1 : index
    %c0_32 = arith.constant 0 : index
    %c0_33 = arith.constant 0 : index
    %29 = vector.load %arg4[%c1_31, %c0_32, %c0_33] : memref<25x8x16xf32, #tpu.memory_space<vmem>>, vector<1x8x16xf32>
    %30 = vector.shape_cast %29 : vector<1x8x16xf32> to vector<8x16xf32>
    %cst_34 = arith.constant dense<0.000000e+00> : vector<128x16xf32>
    %31 = tpu.matmul %28, %30, %cst_34 {dimension_numbers = #tpu.dot_dimension_numbers<[1], [0], [0], [1], [0, 0, 1, 1], [], []>} : vector<128x8xf32>, vector<8x16xf32>, vector<128x16xf32> -> vector<128x16xf32>
    %32 = arith.addf %26, %31 : vector<128x16xf32>
    %c0_35 = arith.constant 0 : index
    %c0_36 = arith.constant 0 : index
    %c2 = arith.constant 2 : index
    %c0_37 = arith.constant 0 : index
    %33 = vector.load %arg14[%c0_35, %c0_36, %c2, %c0_37] : memref<2x12x12x8xf32, #tpu.memory_space<vmem>>, vector<2x8x8x8xf32>
    %34 = vector.shape_cast %33 : vector<2x8x8x8xf32> to vector<128x8xf32>
    %c2_38 = arith.constant 2 : index
    %c0_39 = arith.constant 0 : index
    %c0_40 = arith.constant 0 : index
    %35 = vector.load %arg4[%c2_38, %c0_39, %c0_40] : memref<25x8x16xf32, #tpu.memory_space<vmem>>, vector<1x8x16xf32>
    %36 = vector.shape_cast %35 : vector<1x8x16xf32> to vector<8x16xf32>
    %cst_41 = arith.constant dense<0.000000e+00> : vector<128x16xf32>
    %37 = tpu.matmul %34, %36, %cst_41 {dimension_numbers = #tpu.dot_dimension_numbers<[1], [0], [0], [1], [0, 0, 1, 1], [], []>} : vector<128x8xf32>, vector<8x16xf32>, vector<128x16xf32> -> vector<128x16xf32>
    %38 = arith.addf %32, %37 : vector<128x16xf32>
    %c0_42 = arith.constant 0 : index
    %c0_43 = arith.constant 0 : index
    %c3 = arith.constant 3 : index
    %c0_44 = arith.constant 0 : index
    %39 = vector.load %arg14[%c0_42, %c0_43, %c3, %c0_44] : memref<2x12x12x8xf32, #tpu.memory_space<vmem>>, vector<2x8x8x8xf32>
    %40 = vector.shape_cast %39 : vector<2x8x8x8xf32> to vector<128x8xf32>
    %c3_45 = arith.constant 3 : index
    %c0_46 = arith.constant 0 : index
    %c0_47 = arith.constant 0 : index
    %41 = vector.load %arg4[%c3_45, %c0_46, %c0_47] : memref<25x8x16xf32, #tpu.memory_space<vmem>>, vector<1x8x16xf32>
    %42 = vector.shape_cast %41 : vector<1x8x16xf32> to vector<8x16xf32>
    %cst_48 = arith.constant dense<0.000000e+00> : vector<128x16xf32>
    %43 = tpu.matmul %40, %42, %cst_48 {dimension_numbers = #tpu.dot_dimension_numbers<[1], [0], [0], [1], [0, 0, 1, 1], [], []>} : vector<128x8xf32>, vector<8x16xf32>, vector<128x16xf32> -> vector<128x16xf32>
    %44 = arith.addf %38, %43 : vector<128x16xf32>
    %c0_49 = arith.constant 0 : index
    %c0_50 = arith.constant 0 : index
    %c4 = arith.constant 4 : index
    %c0_51 = arith.constant 0 : index
    %45 = vector.load %arg14[%c0_49, %c0_50, %c4, %c0_51] : memref<2x12x12x8xf32, #tpu.memory_space<vmem>>, vector<2x8x8x8xf32>
    %46 = vector.shape_cast %45 : vector<2x8x8x8xf32> to vector<128x8xf32>
    %c4_52 = arith.constant 4 : index
    %c0_53 = arith.constant 0 : index
    %c0_54 = arith.constant 0 : index
    %47 = vector.load %arg4[%c4_52, %c0_53, %c0_54] : memref<25x8x16xf32, #tpu.memory_space<vmem>>, vector<1x8x16xf32>
    %48 = vector.shape_cast %47 : vector<1x8x16xf32> to vector<8x16xf32>
    %cst_55 = arith.constant dense<0.000000e+00> : vector<128x16xf32>
    %49 = tpu.matmul %46, %48, %cst_55 {dimension_numbers = #tpu.dot_dimension_numbers<[1], [0], [0], [1], [0, 0, 1, 1], [], []>} : vector<128x8xf32>, vector<8x16xf32>, vector<128x16xf32> -> vector<128x16xf32>
    %50 = arith.addf %44, %49 : vector<128x16xf32>
    %c0_56 = arith.constant 0 : index
    %c1_57 = arith.constant 1 : index
    %c0_58 = arith.constant 0 : index
    %c0_59 = arith.constant 0 : index
    %51 = vector.load %arg14[%c0_56, %c1_57, %c0_58, %c0_59] : memref<2x12x12x8xf32, #tpu.memory_space<vmem>>, vector<2x8x8x8xf32>
    %52 = vector.shape_cast %51 : vector<2x8x8x8xf32> to vector<128x8xf32>
    %c5 = arith.constant 5 : index
    %c0_60 = arith.constant 0 : index
    %c0_61 = arith.constant 0 : index
    %53 = vector.load %arg4[%c5, %c0_60, %c0_61] : memref<25x8x16xf32, #tpu.memory_space<vmem>>, vector<1x8x16xf32>
    %54 = vector.shape_cast %53 : vector<1x8x16xf32> to vector<8x16xf32>
    %cst_62 = arith.constant dense<0.000000e+00> : vector<128x16xf32>
    %55 = tpu.matmul %52, %54, %cst_62 {dimension_numbers = #tpu.dot_dimension_numbers<[1], [0], [0], [1], [0, 0, 1, 1], [], []>} : vector<128x8xf32>, vector<8x16xf32>, vector<128x16xf32> -> vector<128x16xf32>
    %56 = arith.addf %50, %55 : vector<128x16xf32>
    %c0_63 = arith.constant 0 : index
    %c1_64 = arith.constant 1 : index
    %c1_65 = arith.constant 1 : index
    %c0_66 = arith.constant 0 : index
    %57 = vector.load %arg14[%c0_63, %c1_64, %c1_65, %c0_66] : memref<2x12x12x8xf32, #tpu.memory_space<vmem>>, vector<2x8x8x8xf32>
    %58 = vector.shape_cast %57 : vector<2x8x8x8xf32> to vector<128x8xf32>
    %c6 = arith.constant 6 : index
    %c0_67 = arith.constant 0 : index
    %c0_68 = arith.constant 0 : index
    %59 = vector.load %arg4[%c6, %c0_67, %c0_68] : memref<25x8x16xf32, #tpu.memory_space<vmem>>, vector<1x8x16xf32>
    %60 = vector.shape_cast %59 : vector<1x8x16xf32> to vector<8x16xf32>
    %cst_69 = arith.constant dense<0.000000e+00> : vector<128x16xf32>
    %61 = tpu.matmul %58, %60, %cst_69 {dimension_numbers = #tpu.dot_dimension_numbers<[1], [0], [0], [1], [0, 0, 1, 1], [], []>} : vector<128x8xf32>, vector<8x16xf32>, vector<128x16xf32> -> vector<128x16xf32>
    %62 = arith.addf %56, %61 : vector<128x16xf32>
    %c0_70 = arith.constant 0 : index
    %c1_71 = arith.constant 1 : index
    %c2_72 = arith.constant 2 : index
    %c0_73 = arith.constant 0 : index
    %63 = vector.load %arg14[%c0_70, %c1_71, %c2_72, %c0_73] : memref<2x12x12x8xf32, #tpu.memory_space<vmem>>, vector<2x8x8x8xf32>
    %64 = vector.shape_cast %63 : vector<2x8x8x8xf32> to vector<128x8xf32>
    %c7 = arith.constant 7 : index
    %c0_74 = arith.constant 0 : index
    %c0_75 = arith.constant 0 : index
    %65 = vector.load %arg4[%c7, %c0_74, %c0_75] : memref<25x8x16xf32, #tpu.memory_space<vmem>>, vector<1x8x16xf32>
    %66 = vector.shape_cast %65 : vector<1x8x16xf32> to vector<8x16xf32>
    %cst_76 = arith.constant dense<0.000000e+00> : vector<128x16xf32>
    %67 = tpu.matmul %64, %66, %cst_76 {dimension_numbers = #tpu.dot_dimension_numbers<[1], [0], [0], [1], [0, 0, 1, 1], [], []>} : vector<128x8xf32>, vector<8x16xf32>, vector<128x16xf32> -> vector<128x16xf32>
    %68 = arith.addf %62, %67 : vector<128x16xf32>
    %c0_77 = arith.constant 0 : index
    %c1_78 = arith.constant 1 : index
    %c3_79 = arith.constant 3 : index
    %c0_80 = arith.constant 0 : index
    %69 = vector.load %arg14[%c0_77, %c1_78, %c3_79, %c0_80] : memref<2x12x12x8xf32, #tpu.memory_space<vmem>>, vector<2x8x8x8xf32>
    %70 = vector.shape_cast %69 : vector<2x8x8x8xf32> to vector<128x8xf32>
    %c8 = arith.constant 8 : index
    %c0_81 = arith.constant 0 : index
    %c0_82 = arith.constant 0 : index
    %71 = vector.load %arg4[%c8, %c0_81, %c0_82] : memref<25x8x16xf32, #tpu.memory_space<vmem>>, vector<1x8x16xf32>
    %72 = vector.shape_cast %71 : vector<1x8x16xf32> to vector<8x16xf32>
    %cst_83 = arith.constant dense<0.000000e+00> : vector<128x16xf32>
    %73 = tpu.matmul %70, %72, %cst_83 {dimension_numbers = #tpu.dot_dimension_numbers<[1], [0], [0], [1], [0, 0, 1, 1], [], []>} : vector<128x8xf32>, vector<8x16xf32>, vector<128x16xf32> -> vector<128x16xf32>
    %74 = arith.addf %68, %73 : vector<128x16xf32>
    %c0_84 = arith.constant 0 : index
    %c1_85 = arith.constant 1 : index
    %c4_86 = arith.constant 4 : index
    %c0_87 = arith.constant 0 : index
    %75 = vector.load %arg14[%c0_84, %c1_85, %c4_86, %c0_87] : memref<2x12x12x8xf32, #tpu.memory_space<vmem>>, vector<2x8x8x8xf32>
    %76 = vector.shape_cast %75 : vector<2x8x8x8xf32> to vector<128x8xf32>
    %c9 = arith.constant 9 : index
    %c0_88 = arith.constant 0 : index
    %c0_89 = arith.constant 0 : index
    %77 = vector.load %arg4[%c9, %c0_88, %c0_89] : memref<25x8x16xf32, #tpu.memory_space<vmem>>, vector<1x8x16xf32>
    %78 = vector.shape_cast %77 : vector<1x8x16xf32> to vector<8x16xf32>
    %cst_90 = arith.constant dense<0.000000e+00> : vector<128x16xf32>
    %79 = tpu.matmul %76, %78, %cst_90 {dimension_numbers = #tpu.dot_dimension_numbers<[1], [0], [0], [1], [0, 0, 1, 1], [], []>} : vector<128x8xf32>, vector<8x16xf32>, vector<128x16xf32> -> vector<128x16xf32>
    %80 = arith.addf %74, %79 : vector<128x16xf32>
    %c0_91 = arith.constant 0 : index
    %c2_92 = arith.constant 2 : index
    %c0_93 = arith.constant 0 : index
    %c0_94 = arith.constant 0 : index
    %81 = vector.load %arg14[%c0_91, %c2_92, %c0_93, %c0_94] : memref<2x12x12x8xf32, #tpu.memory_space<vmem>>, vector<2x8x8x8xf32>
    %82 = vector.shape_cast %81 : vector<2x8x8x8xf32> to vector<128x8xf32>
    %c10 = arith.constant 10 : index
    %c0_95 = arith.constant 0 : index
    %c0_96 = arith.constant 0 : index
    %83 = vector.load %arg4[%c10, %c0_95, %c0_96] : memref<25x8x16xf32, #tpu.memory_space<vmem>>, vector<1x8x16xf32>
    %84 = vector.shape_cast %83 : vector<1x8x16xf32> to vector<8x16xf32>
    %cst_97 = arith.constant dense<0.000000e+00> : vector<128x16xf32>
    %85 = tpu.matmul %82, %84, %cst_97 {dimension_numbers = #tpu.dot_dimension_numbers<[1], [0], [0], [1], [0, 0, 1, 1], [], []>} : vector<128x8xf32>, vector<8x16xf32>, vector<128x16xf32> -> vector<128x16xf32>
    %86 = arith.addf %80, %85 : vector<128x16xf32>
    %c0_98 = arith.constant 0 : index
    %c2_99 = arith.constant 2 : index
    %c1_100 = arith.constant 1 : index
    %c0_101 = arith.constant 0 : index
    %87 = vector.load %arg14[%c0_98, %c2_99, %c1_100, %c0_101] : memref<2x12x12x8xf32, #tpu.memory_space<vmem>>, vector<2x8x8x8xf32>
    %88 = vector.shape_cast %87 : vector<2x8x8x8xf32> to vector<128x8xf32>
    %c11 = arith.constant 11 : index
    %c0_102 = arith.constant 0 : index
    %c0_103 = arith.constant 0 : index
    %89 = vector.load %arg4[%c11, %c0_102, %c0_103] : memref<25x8x16xf32, #tpu.memory_space<vmem>>, vector<1x8x16xf32>
    %90 = vector.shape_cast %89 : vector<1x8x16xf32> to vector<8x16xf32>
    %cst_104 = arith.constant dense<0.000000e+00> : vector<128x16xf32>
    %91 = tpu.matmul %88, %90, %cst_104 {dimension_numbers = #tpu.dot_dimension_numbers<[1], [0], [0], [1], [0, 0, 1, 1], [], []>} : vector<128x8xf32>, vector<8x16xf32>, vector<128x16xf32> -> vector<128x16xf32>
    %92 = arith.addf %86, %91 : vector<128x16xf32>
    %c0_105 = arith.constant 0 : index
    %c2_106 = arith.constant 2 : index
    %c2_107 = arith.constant 2 : index
    %c0_108 = arith.constant 0 : index
    %93 = vector.load %arg14[%c0_105, %c2_106, %c2_107, %c0_108] : memref<2x12x12x8xf32, #tpu.memory_space<vmem>>, vector<2x8x8x8xf32>
    %94 = vector.shape_cast %93 : vector<2x8x8x8xf32> to vector<128x8xf32>
    %c12 = arith.constant 12 : index
    %c0_109 = arith.constant 0 : index
    %c0_110 = arith.constant 0 : index
    %95 = vector.load %arg4[%c12, %c0_109, %c0_110] : memref<25x8x16xf32, #tpu.memory_space<vmem>>, vector<1x8x16xf32>
    %96 = vector.shape_cast %95 : vector<1x8x16xf32> to vector<8x16xf32>
    %cst_111 = arith.constant dense<0.000000e+00> : vector<128x16xf32>
    %97 = tpu.matmul %94, %96, %cst_111 {dimension_numbers = #tpu.dot_dimension_numbers<[1], [0], [0], [1], [0, 0, 1, 1], [], []>} : vector<128x8xf32>, vector<8x16xf32>, vector<128x16xf32> -> vector<128x16xf32>
    %98 = arith.addf %92, %97 : vector<128x16xf32>
    %c0_112 = arith.constant 0 : index
    %c2_113 = arith.constant 2 : index
    %c3_114 = arith.constant 3 : index
    %c0_115 = arith.constant 0 : index
    %99 = vector.load %arg14[%c0_112, %c2_113, %c3_114, %c0_115] : memref<2x12x12x8xf32, #tpu.memory_space<vmem>>, vector<2x8x8x8xf32>
    %100 = vector.shape_cast %99 : vector<2x8x8x8xf32> to vector<128x8xf32>
    %c13 = arith.constant 13 : index
    %c0_116 = arith.constant 0 : index
    %c0_117 = arith.constant 0 : index
    %101 = vector.load %arg4[%c13, %c0_116, %c0_117] : memref<25x8x16xf32, #tpu.memory_space<vmem>>, vector<1x8x16xf32>
    %102 = vector.shape_cast %101 : vector<1x8x16xf32> to vector<8x16xf32>
    %cst_118 = arith.constant dense<0.000000e+00> : vector<128x16xf32>
    %103 = tpu.matmul %100, %102, %cst_118 {dimension_numbers = #tpu.dot_dimension_numbers<[1], [0], [0], [1], [0, 0, 1, 1], [], []>} : vector<128x8xf32>, vector<8x16xf32>, vector<128x16xf32> -> vector<128x16xf32>
    %104 = arith.addf %98, %103 : vector<128x16xf32>
    %c0_119 = arith.constant 0 : index
    %c2_120 = arith.constant 2 : index
    %c4_121 = arith.constant 4 : index
    %c0_122 = arith.constant 0 : index
    %105 = vector.load %arg14[%c0_119, %c2_120, %c4_121, %c0_122] : memref<2x12x12x8xf32, #tpu.memory_space<vmem>>, vector<2x8x8x8xf32>
    %106 = vector.shape_cast %105 : vector<2x8x8x8xf32> to vector<128x8xf32>
    %c14 = arith.constant 14 : index
    %c0_123 = arith.constant 0 : index
    %c0_124 = arith.constant 0 : index
    %107 = vector.load %arg4[%c14, %c0_123, %c0_124] : memref<25x8x16xf32, #tpu.memory_space<vmem>>, vector<1x8x16xf32>
    %108 = vector.shape_cast %107 : vector<1x8x16xf32> to vector<8x16xf32>
    %cst_125 = arith.constant dense<0.000000e+00> : vector<128x16xf32>
    %109 = tpu.matmul %106, %108, %cst_125 {dimension_numbers = #tpu.dot_dimension_numbers<[1], [0], [0], [1], [0, 0, 1, 1], [], []>} : vector<128x8xf32>, vector<8x16xf32>, vector<128x16xf32> -> vector<128x16xf32>
    %110 = arith.addf %104, %109 : vector<128x16xf32>
    %c0_126 = arith.constant 0 : index
    %c3_127 = arith.constant 3 : index
    %c0_128 = arith.constant 0 : index
    %c0_129 = arith.constant 0 : index
    %111 = vector.load %arg14[%c0_126, %c3_127, %c0_128, %c0_129] : memref<2x12x12x8xf32, #tpu.memory_space<vmem>>, vector<2x8x8x8xf32>
    %112 = vector.shape_cast %111 : vector<2x8x8x8xf32> to vector<128x8xf32>
    %c15 = arith.constant 15 : index
    %c0_130 = arith.constant 0 : index
    %c0_131 = arith.constant 0 : index
    %113 = vector.load %arg4[%c15, %c0_130, %c0_131] : memref<25x8x16xf32, #tpu.memory_space<vmem>>, vector<1x8x16xf32>
    %114 = vector.shape_cast %113 : vector<1x8x16xf32> to vector<8x16xf32>
    %cst_132 = arith.constant dense<0.000000e+00> : vector<128x16xf32>
    %115 = tpu.matmul %112, %114, %cst_132 {dimension_numbers = #tpu.dot_dimension_numbers<[1], [0], [0], [1], [0, 0, 1, 1], [], []>} : vector<128x8xf32>, vector<8x16xf32>, vector<128x16xf32> -> vector<128x16xf32>
    %116 = arith.addf %110, %115 : vector<128x16xf32>
    %c0_133 = arith.constant 0 : index
    %c3_134 = arith.constant 3 : index
    %c1_135 = arith.constant 1 : index
    %c0_136 = arith.constant 0 : index
    %117 = vector.load %arg14[%c0_133, %c3_134, %c1_135, %c0_136] : memref<2x12x12x8xf32, #tpu.memory_space<vmem>>, vector<2x8x8x8xf32>
    %118 = vector.shape_cast %117 : vector<2x8x8x8xf32> to vector<128x8xf32>
    %c16 = arith.constant 16 : index
    %c0_137 = arith.constant 0 : index
    %c0_138 = arith.constant 0 : index
    %119 = vector.load %arg4[%c16, %c0_137, %c0_138] : memref<25x8x16xf32, #tpu.memory_space<vmem>>, vector<1x8x16xf32>
    %120 = vector.shape_cast %119 : vector<1x8x16xf32> to vector<8x16xf32>
    %cst_139 = arith.constant dense<0.000000e+00> : vector<128x16xf32>
    %121 = tpu.matmul %118, %120, %cst_139 {dimension_numbers = #tpu.dot_dimension_numbers<[1], [0], [0], [1], [0, 0, 1, 1], [], []>} : vector<128x8xf32>, vector<8x16xf32>, vector<128x16xf32> -> vector<128x16xf32>
    %122 = arith.addf %116, %121 : vector<128x16xf32>
    %c0_140 = arith.constant 0 : index
    %c3_141 = arith.constant 3 : index
    %c2_142 = arith.constant 2 : index
    %c0_143 = arith.constant 0 : index
    %123 = vector.load %arg14[%c0_140, %c3_141, %c2_142, %c0_143] : memref<2x12x12x8xf32, #tpu.memory_space<vmem>>, vector<2x8x8x8xf32>
    %124 = vector.shape_cast %123 : vector<2x8x8x8xf32> to vector<128x8xf32>
    %c17 = arith.constant 17 : index
    %c0_144 = arith.constant 0 : index
    %c0_145 = arith.constant 0 : index
    %125 = vector.load %arg4[%c17, %c0_144, %c0_145] : memref<25x8x16xf32, #tpu.memory_space<vmem>>, vector<1x8x16xf32>
    %126 = vector.shape_cast %125 : vector<1x8x16xf32> to vector<8x16xf32>
    %cst_146 = arith.constant dense<0.000000e+00> : vector<128x16xf32>
    %127 = tpu.matmul %124, %126, %cst_146 {dimension_numbers = #tpu.dot_dimension_numbers<[1], [0], [0], [1], [0, 0, 1, 1], [], []>} : vector<128x8xf32>, vector<8x16xf32>, vector<128x16xf32> -> vector<128x16xf32>
    %128 = arith.addf %122, %127 : vector<128x16xf32>
    %c0_147 = arith.constant 0 : index
    %c3_148 = arith.constant 3 : index
    %c3_149 = arith.constant 3 : index
    %c0_150 = arith.constant 0 : index
    %129 = vector.load %arg14[%c0_147, %c3_148, %c3_149, %c0_150] : memref<2x12x12x8xf32, #tpu.memory_space<vmem>>, vector<2x8x8x8xf32>
    %130 = vector.shape_cast %129 : vector<2x8x8x8xf32> to vector<128x8xf32>
    %c18 = arith.constant 18 : index
    %c0_151 = arith.constant 0 : index
    %c0_152 = arith.constant 0 : index
    %131 = vector.load %arg4[%c18, %c0_151, %c0_152] : memref<25x8x16xf32, #tpu.memory_space<vmem>>, vector<1x8x16xf32>
    %132 = vector.shape_cast %131 : vector<1x8x16xf32> to vector<8x16xf32>
    %cst_153 = arith.constant dense<0.000000e+00> : vector<128x16xf32>
    %133 = tpu.matmul %130, %132, %cst_153 {dimension_numbers = #tpu.dot_dimension_numbers<[1], [0], [0], [1], [0, 0, 1, 1], [], []>} : vector<128x8xf32>, vector<8x16xf32>, vector<128x16xf32> -> vector<128x16xf32>
    %134 = arith.addf %128, %133 : vector<128x16xf32>
    %c0_154 = arith.constant 0 : index
    %c3_155 = arith.constant 3 : index
    %c4_156 = arith.constant 4 : index
    %c0_157 = arith.constant 0 : index
    %135 = vector.load %arg14[%c0_154, %c3_155, %c4_156, %c0_157] : memref<2x12x12x8xf32, #tpu.memory_space<vmem>>, vector<2x8x8x8xf32>
    %136 = vector.shape_cast %135 : vector<2x8x8x8xf32> to vector<128x8xf32>
    %c19 = arith.constant 19 : index
    %c0_158 = arith.constant 0 : index
    %c0_159 = arith.constant 0 : index
    %137 = vector.load %arg4[%c19, %c0_158, %c0_159] : memref<25x8x16xf32, #tpu.memory_space<vmem>>, vector<1x8x16xf32>
    %138 = vector.shape_cast %137 : vector<1x8x16xf32> to vector<8x16xf32>
    %cst_160 = arith.constant dense<0.000000e+00> : vector<128x16xf32>
    %139 = tpu.matmul %136, %138, %cst_160 {dimension_numbers = #tpu.dot_dimension_numbers<[1], [0], [0], [1], [0, 0, 1, 1], [], []>} : vector<128x8xf32>, vector<8x16xf32>, vector<128x16xf32> -> vector<128x16xf32>
    %140 = arith.addf %134, %139 : vector<128x16xf32>
    %c0_161 = arith.constant 0 : index
    %c4_162 = arith.constant 4 : index
    %c0_163 = arith.constant 0 : index
    %c0_164 = arith.constant 0 : index
    %141 = vector.load %arg14[%c0_161, %c4_162, %c0_163, %c0_164] : memref<2x12x12x8xf32, #tpu.memory_space<vmem>>, vector<2x8x8x8xf32>
    %142 = vector.shape_cast %141 : vector<2x8x8x8xf32> to vector<128x8xf32>
    %c20 = arith.constant 20 : index
    %c0_165 = arith.constant 0 : index
    %c0_166 = arith.constant 0 : index
    %143 = vector.load %arg4[%c20, %c0_165, %c0_166] : memref<25x8x16xf32, #tpu.memory_space<vmem>>, vector<1x8x16xf32>
    %144 = vector.shape_cast %143 : vector<1x8x16xf32> to vector<8x16xf32>
    %cst_167 = arith.constant dense<0.000000e+00> : vector<128x16xf32>
    %145 = tpu.matmul %142, %144, %cst_167 {dimension_numbers = #tpu.dot_dimension_numbers<[1], [0], [0], [1], [0, 0, 1, 1], [], []>} : vector<128x8xf32>, vector<8x16xf32>, vector<128x16xf32> -> vector<128x16xf32>
    %146 = arith.addf %140, %145 : vector<128x16xf32>
    %c0_168 = arith.constant 0 : index
    %c4_169 = arith.constant 4 : index
    %c1_170 = arith.constant 1 : index
    %c0_171 = arith.constant 0 : index
    %147 = vector.load %arg14[%c0_168, %c4_169, %c1_170, %c0_171] : memref<2x12x12x8xf32, #tpu.memory_space<vmem>>, vector<2x8x8x8xf32>
    %148 = vector.shape_cast %147 : vector<2x8x8x8xf32> to vector<128x8xf32>
    %c21 = arith.constant 21 : index
    %c0_172 = arith.constant 0 : index
    %c0_173 = arith.constant 0 : index
    %149 = vector.load %arg4[%c21, %c0_172, %c0_173] : memref<25x8x16xf32, #tpu.memory_space<vmem>>, vector<1x8x16xf32>
    %150 = vector.shape_cast %149 : vector<1x8x16xf32> to vector<8x16xf32>
    %cst_174 = arith.constant dense<0.000000e+00> : vector<128x16xf32>
    %151 = tpu.matmul %148, %150, %cst_174 {dimension_numbers = #tpu.dot_dimension_numbers<[1], [0], [0], [1], [0, 0, 1, 1], [], []>} : vector<128x8xf32>, vector<8x16xf32>, vector<128x16xf32> -> vector<128x16xf32>
    %152 = arith.addf %146, %151 : vector<128x16xf32>
    %c0_175 = arith.constant 0 : index
    %c4_176 = arith.constant 4 : index
    %c2_177 = arith.constant 2 : index
    %c0_178 = arith.constant 0 : index
    %153 = vector.load %arg14[%c0_175, %c4_176, %c2_177, %c0_178] : memref<2x12x12x8xf32, #tpu.memory_space<vmem>>, vector<2x8x8x8xf32>
    %154 = vector.shape_cast %153 : vector<2x8x8x8xf32> to vector<128x8xf32>
    %c22 = arith.constant 22 : index
    %c0_179 = arith.constant 0 : index
    %c0_180 = arith.constant 0 : index
    %155 = vector.load %arg4[%c22, %c0_179, %c0_180] : memref<25x8x16xf32, #tpu.memory_space<vmem>>, vector<1x8x16xf32>
    %156 = vector.shape_cast %155 : vector<1x8x16xf32> to vector<8x16xf32>
    %cst_181 = arith.constant dense<0.000000e+00> : vector<128x16xf32>
    %157 = tpu.matmul %154, %156, %cst_181 {dimension_numbers = #tpu.dot_dimension_numbers<[1], [0], [0], [1], [0, 0, 1, 1], [], []>} : vector<128x8xf32>, vector<8x16xf32>, vector<128x16xf32> -> vector<128x16xf32>
    %158 = arith.addf %152, %157 : vector<128x16xf32>
    %c0_182 = arith.constant 0 : index
    %c4_183 = arith.constant 4 : index
    %c3_184 = arith.constant 3 : index
    %c0_185 = arith.constant 0 : index
    %159 = vector.load %arg14[%c0_182, %c4_183, %c3_184, %c0_185] : memref<2x12x12x8xf32, #tpu.memory_space<vmem>>, vector<2x8x8x8xf32>
    %160 = vector.shape_cast %159 : vector<2x8x8x8xf32> to vector<128x8xf32>
    %c23 = arith.constant 23 : index
    %c0_186 = arith.constant 0 : index
    %c0_187 = arith.constant 0 : index
    %161 = vector.load %arg4[%c23, %c0_186, %c0_187] : memref<25x8x16xf32, #tpu.memory_space<vmem>>, vector<1x8x16xf32>
    %162 = vector.shape_cast %161 : vector<1x8x16xf32> to vector<8x16xf32>
    %cst_188 = arith.constant dense<0.000000e+00> : vector<128x16xf32>
    %163 = tpu.matmul %160, %162, %cst_188 {dimension_numbers = #tpu.dot_dimension_numbers<[1], [0], [0], [1], [0, 0, 1, 1], [], []>} : vector<128x8xf32>, vector<8x16xf32>, vector<128x16xf32> -> vector<128x16xf32>
    %164 = arith.addf %158, %163 : vector<128x16xf32>
    %c0_189 = arith.constant 0 : index
    %c4_190 = arith.constant 4 : index
    %c4_191 = arith.constant 4 : index
    %c0_192 = arith.constant 0 : index
    %165 = vector.load %arg14[%c0_189, %c4_190, %c4_191, %c0_192] : memref<2x12x12x8xf32, #tpu.memory_space<vmem>>, vector<2x8x8x8xf32>
    %166 = vector.shape_cast %165 : vector<2x8x8x8xf32> to vector<128x8xf32>
    %c24 = arith.constant 24 : index
    %c0_193 = arith.constant 0 : index
    %c0_194 = arith.constant 0 : index
    %167 = vector.load %arg4[%c24, %c0_193, %c0_194] : memref<25x8x16xf32, #tpu.memory_space<vmem>>, vector<1x8x16xf32>
    %168 = vector.shape_cast %167 : vector<1x8x16xf32> to vector<8x16xf32>
    %cst_195 = arith.constant dense<0.000000e+00> : vector<128x16xf32>
    %169 = tpu.matmul %166, %168, %cst_195 {dimension_numbers = #tpu.dot_dimension_numbers<[1], [0], [0], [1], [0, 0, 1, 1], [], []>} : vector<128x8xf32>, vector<8x16xf32>, vector<128x16xf32> -> vector<128x16xf32>
    %170 = arith.addf %164, %169 : vector<128x16xf32>
    %c0_196 = arith.constant 0 : index
    %c0_197 = arith.constant 0 : index
    %171 = vector.load %arg5[%c0_196, %c0_197] : memref<1x16xf32, #tpu.memory_space<vmem>>, vector<1x16xf32>
    %172 = vector.broadcast %171 : vector<1x16xf32> to vector<128x16xf32>
    %173 = arith.addf %170, %172 : vector<128x16xf32>
    %cst_198 = arith.constant 0.000000e+00 : f32
    %174 = vector.broadcast %cst_198 : f32 to vector<128x16xf32>
    %175 = arith.maximumf %173, %174 : vector<128x16xf32>
    %176 = vector.shape_cast %175 : vector<128x16xf32> to vector<16x8x16xf32>
    %c0_199 = arith.constant 0 : index
    %c0_200 = arith.constant 0 : index
    %c0_201 = arith.constant 0 : index
    %177 = vector.load %arg15[%c0_199, %c0_200, %c0_201] : memref<16x8x16xf32, #tpu.memory_space<vmem>>, vector<16x8x16xf32>
    tpu.vector_store %arg15[%c0_199, %c0_200, %c0_201], %176 {strides = array<i32>} : memref<16x8x16xf32, #tpu.memory_space<vmem>>, vector<16x8x16xf32>,
    %c0_202 = arith.constant 0 : index
    %c0_203 = arith.constant 0 : index
    %c0_204 = arith.constant 0 : index
    %178 = tpu.strided_load %arg15[%c0_202, %c0_203, %c0_204] {strides = array<i32: 1, 2, 1>} : memref<16x8x16xf32, #tpu.memory_space<vmem>>, vector<16x4x16xf32>
    %c0_205 = arith.constant 0 : index
    %c1_206 = arith.constant 1 : index
    %c0_207 = arith.constant 0 : index
    %179 = tpu.strided_load %arg15[%c0_205, %c1_206, %c0_207] {strides = array<i32: 1, 2, 1>} : memref<16x8x16xf32, #tpu.memory_space<vmem>>, vector<16x4x16xf32>
    %180 = arith.maximumf %178, %179 : vector<16x4x16xf32>
    %181 = vector.shape_cast %180 : vector<16x4x16xf32> to vector<2x4x2x4x16xf32>
    %182 = vector.extract_strided_slice %181 {offsets = [0, 0, 0, 0, 0], sizes = [2, 4, 1, 4, 16], strides = [1, 1, 1, 1, 1]} : vector<2x4x2x4x16xf32> to vector<2x4x1x4x16xf32>
    %183 = vector.shape_cast %182 : vector<2x4x1x4x16xf32> to vector<2x4x4x16xf32>
    %184 = vector.extract_strided_slice %181 {offsets = [0, 0, 1, 0, 0], sizes = [2, 4, 1, 4, 16], strides = [1, 1, 1, 1, 1]} : vector<2x4x2x4x16xf32> to vector<2x4x1x4x16xf32>
    %185 = vector.shape_cast %184 : vector<2x4x1x4x16xf32> to vector<2x4x4x16xf32>
    %186 = arith.maximumf %183, %185 : vector<2x4x4x16xf32>
    %c0_208 = arith.constant 0 : index
    %c0_209 = arith.constant 0 : index
    %c0_210 = arith.constant 0 : index
    %c0_211 = arith.constant 0 : index
    %187 = vector.load %arg16[%c0_208, %c0_209, %c0_210, %c0_211] : memref<2x4x4x16xf32, #tpu.memory_space<vmem>>, vector<2x4x4x16xf32>
    tpu.vector_store %arg16[%c0_208, %c0_209, %c0_210, %c0_211], %186 {strides = array<i32>} : memref<2x4x4x16xf32, #tpu.memory_space<vmem>>, vector<2x4x4x16xf32>,
    %cst_212 = arith.constant 0.000000e+00 : f32
    %188 = vector.broadcast %cst_212 : f32 to vector<2x128xf32>
    %c0_213 = arith.constant 0 : index
    %c0_214 = arith.constant 0 : index
    %c0_215 = arith.constant 0 : index
    %c0_216 = arith.constant 0 : index
    %189 = vector.load %arg16[%c0_213, %c0_214, %c0_215, %c0_216] : memref<2x4x4x16xf32, #tpu.memory_space<vmem>>, vector<2x1x1x16xf32>
    %190 = vector.shape_cast %189 : vector<2x1x1x16xf32> to vector<2x16xf32>
    %c0_217 = arith.constant 0 : index
    %c0_218 = arith.constant 0 : index
    %c0_219 = arith.constant 0 : index
    %191 = vector.load %arg6[%c0_217, %c0_218, %c0_219] : memref<16x16x128xf32, #tpu.memory_space<vmem>>, vector<1x16x128xf32>
    %192 = vector.shape_cast %191 : vector<1x16x128xf32> to vector<16x128xf32>
    %cst_220 = arith.constant dense<0.000000e+00> : vector<2x128xf32>
    %193 = tpu.matmul %190, %192, %cst_220 {dimension_numbers = #tpu.dot_dimension_numbers<[1], [0], [0], [1], [0, 0, 1, 1], [], []>} : vector<2x16xf32>, vector<16x128xf32>, vector<2x128xf32> -> vector<2x128xf32>
    %194 = arith.addf %188, %193 : vector<2x128xf32>
    %c0_221 = arith.constant 0 : index
    %c0_222 = arith.constant 0 : index
    %c1_223 = arith.constant 1 : index
    %c0_224 = arith.constant 0 : index
    %195 = vector.load %arg16[%c0_221, %c0_222, %c1_223, %c0_224] : memref<2x4x4x16xf32, #tpu.memory_space<vmem>>, vector<2x1x1x16xf32>
    %196 = vector.shape_cast %195 : vector<2x1x1x16xf32> to vector<2x16xf32>
    %c1_225 = arith.constant 1 : index
    %c0_226 = arith.constant 0 : index
    %c0_227 = arith.constant 0 : index
    %197 = vector.load %arg6[%c1_225, %c0_226, %c0_227] : memref<16x16x128xf32, #tpu.memory_space<vmem>>, vector<1x16x128xf32>
    %198 = vector.shape_cast %197 : vector<1x16x128xf32> to vector<16x128xf32>
    %cst_228 = arith.constant dense<0.000000e+00> : vector<2x128xf32>
    %199 = tpu.matmul %196, %198, %cst_228 {dimension_numbers = #tpu.dot_dimension_numbers<[1], [0], [0], [1], [0, 0, 1, 1], [], []>} : vector<2x16xf32>, vector<16x128xf32>, vector<2x128xf32> -> vector<2x128xf32>
    %200 = arith.addf %194, %199 : vector<2x128xf32>
    %c0_229 = arith.constant 0 : index
    %c0_230 = arith.constant 0 : index
    %c2_231 = arith.constant 2 : index
    %c0_232 = arith.constant 0 : index
    %201 = vector.load %arg16[%c0_229, %c0_230, %c2_231, %c0_232] : memref<2x4x4x16xf32, #tpu.memory_space<vmem>>, vector<2x1x1x16xf32>
    %202 = vector.shape_cast %201 : vector<2x1x1x16xf32> to vector<2x16xf32>
    %c2_233 = arith.constant 2 : index
    %c0_234 = arith.constant 0 : index
    %c0_235 = arith.constant 0 : index
    %203 = vector.load %arg6[%c2_233, %c0_234, %c0_235] : memref<16x16x128xf32, #tpu.memory_space<vmem>>, vector<1x16x128xf32>
    %204 = vector.shape_cast %203 : vector<1x16x128xf32> to vector<16x128xf32>
    %cst_236 = arith.constant dense<0.000000e+00> : vector<2x128xf32>
    %205 = tpu.matmul %202, %204, %cst_236 {dimension_numbers = #tpu.dot_dimension_numbers<[1], [0], [0], [1], [0, 0, 1, 1], [], []>} : vector<2x16xf32>, vector<16x128xf32>, vector<2x128xf32> -> vector<2x128xf32>
    %206 = arith.addf %200, %205 : vector<2x128xf32>
    %c0_237 = arith.constant 0 : index
    %c0_238 = arith.constant 0 : index
    %c3_239 = arith.constant 3 : index
    %c0_240 = arith.constant 0 : index
    %207 = vector.load %arg16[%c0_237, %c0_238, %c3_239, %c0_240] : memref<2x4x4x16xf32, #tpu.memory_space<vmem>>, vector<2x1x1x16xf32>
    %208 = vector.shape_cast %207 : vector<2x1x1x16xf32> to vector<2x16xf32>
    %c3_241 = arith.constant 3 : index
    %c0_242 = arith.constant 0 : index
    %c0_243 = arith.constant 0 : index
    %209 = vector.load %arg6[%c3_241, %c0_242, %c0_243] : memref<16x16x128xf32, #tpu.memory_space<vmem>>, vector<1x16x128xf32>
    %210 = vector.shape_cast %209 : vector<1x16x128xf32> to vector<16x128xf32>
    %cst_244 = arith.constant dense<0.000000e+00> : vector<2x128xf32>
    %211 = tpu.matmul %208, %210, %cst_244 {dimension_numbers = #tpu.dot_dimension_numbers<[1], [0], [0], [1], [0, 0, 1, 1], [], []>} : vector<2x16xf32>, vector<16x128xf32>, vector<2x128xf32> -> vector<2x128xf32>
    %212 = arith.addf %206, %211 : vector<2x128xf32>
    %c0_245 = arith.constant 0 : index
    %c1_246 = arith.constant 1 : index
    %c0_247 = arith.constant 0 : index
    %c0_248 = arith.constant 0 : index
    %213 = vector.load %arg16[%c0_245, %c1_246, %c0_247, %c0_248] : memref<2x4x4x16xf32, #tpu.memory_space<vmem>>, vector<2x1x1x16xf32>
    %214 = vector.shape_cast %213 : vector<2x1x1x16xf32> to vector<2x16xf32>
    %c4_249 = arith.constant 4 : index
    %c0_250 = arith.constant 0 : index
    %c0_251 = arith.constant 0 : index
    %215 = vector.load %arg6[%c4_249, %c0_250, %c0_251] : memref<16x16x128xf32, #tpu.memory_space<vmem>>, vector<1x16x128xf32>
    %216 = vector.shape_cast %215 : vector<1x16x128xf32> to vector<16x128xf32>
    %cst_252 = arith.constant dense<0.000000e+00> : vector<2x128xf32>
    %217 = tpu.matmul %214, %216, %cst_252 {dimension_numbers = #tpu.dot_dimension_numbers<[1], [0], [0], [1], [0, 0, 1, 1], [], []>} : vector<2x16xf32>, vector<16x128xf32>, vector<2x128xf32> -> vector<2x128xf32>
    %218 = arith.addf %212, %217 : vector<2x128xf32>
    %c0_253 = arith.constant 0 : index
    %c1_254 = arith.constant 1 : index
    %c1_255 = arith.constant 1 : index
    %c0_256 = arith.constant 0 : index
    %219 = vector.load %arg16[%c0_253, %c1_254, %c1_255, %c0_256] : memref<2x4x4x16xf32, #tpu.memory_space<vmem>>, vector<2x1x1x16xf32>
    %220 = vector.shape_cast %219 : vector<2x1x1x16xf32> to vector<2x16xf32>
    %c5_257 = arith.constant 5 : index
    %c0_258 = arith.constant 0 : index
    %c0_259 = arith.constant 0 : index
    %221 = vector.load %arg6[%c5_257, %c0_258, %c0_259] : memref<16x16x128xf32, #tpu.memory_space<vmem>>, vector<1x16x128xf32>
    %222 = vector.shape_cast %221 : vector<1x16x128xf32> to vector<16x128xf32>
    %cst_260 = arith.constant dense<0.000000e+00> : vector<2x128xf32>
    %223 = tpu.matmul %220, %222, %cst_260 {dimension_numbers = #tpu.dot_dimension_numbers<[1], [0], [0], [1], [0, 0, 1, 1], [], []>} : vector<2x16xf32>, vector<16x128xf32>, vector<2x128xf32> -> vector<2x128xf32>
    %224 = arith.addf %218, %223 : vector<2x128xf32>
    %c0_261 = arith.constant 0 : index
    %c1_262 = arith.constant 1 : index
    %c2_263 = arith.constant 2 : index
    %c0_264 = arith.constant 0 : index
    %225 = vector.load %arg16[%c0_261, %c1_262, %c2_263, %c0_264] : memref<2x4x4x16xf32, #tpu.memory_space<vmem>>, vector<2x1x1x16xf32>
    %226 = vector.shape_cast %225 : vector<2x1x1x16xf32> to vector<2x16xf32>
    %c6_265 = arith.constant 6 : index
    %c0_266 = arith.constant 0 : index
    %c0_267 = arith.constant 0 : index
    %227 = vector.load %arg6[%c6_265, %c0_266, %c0_267] : memref<16x16x128xf32, #tpu.memory_space<vmem>>, vector<1x16x128xf32>
    %228 = vector.shape_cast %227 : vector<1x16x128xf32> to vector<16x128xf32>
    %cst_268 = arith.constant dense<0.000000e+00> : vector<2x128xf32>
    %229 = tpu.matmul %226, %228, %cst_268 {dimension_numbers = #tpu.dot_dimension_numbers<[1], [0], [0], [1], [0, 0, 1, 1], [], []>} : vector<2x16xf32>, vector<16x128xf32>, vector<2x128xf32> -> vector<2x128xf32>
    %230 = arith.addf %224, %229 : vector<2x128xf32>
    %c0_269 = arith.constant 0 : index
    %c1_270 = arith.constant 1 : index
    %c3_271 = arith.constant 3 : index
    %c0_272 = arith.constant 0 : index
    %231 = vector.load %arg16[%c0_269, %c1_270, %c3_271, %c0_272] : memref<2x4x4x16xf32, #tpu.memory_space<vmem>>, vector<2x1x1x16xf32>
    %232 = vector.shape_cast %231 : vector<2x1x1x16xf32> to vector<2x16xf32>
    %c7_273 = arith.constant 7 : index
    %c0_274 = arith.constant 0 : index
    %c0_275 = arith.constant 0 : index
    %233 = vector.load %arg6[%c7_273, %c0_274, %c0_275] : memref<16x16x128xf32, #tpu.memory_space<vmem>>, vector<1x16x128xf32>
    %234 = vector.shape_cast %233 : vector<1x16x128xf32> to vector<16x128xf32>
    %cst_276 = arith.constant dense<0.000000e+00> : vector<2x128xf32>
    %235 = tpu.matmul %232, %234, %cst_276 {dimension_numbers = #tpu.dot_dimension_numbers<[1], [0], [0], [1], [0, 0, 1, 1], [], []>} : vector<2x16xf32>, vector<16x128xf32>, vector<2x128xf32> -> vector<2x128xf32>
    %236 = arith.addf %230, %235 : vector<2x128xf32>
    %c0_277 = arith.constant 0 : index
    %c2_278 = arith.constant 2 : index
    %c0_279 = arith.constant 0 : index
    %c0_280 = arith.constant 0 : index
    %237 = vector.load %arg16[%c0_277, %c2_278, %c0_279, %c0_280] : memref<2x4x4x16xf32, #tpu.memory_space<vmem>>, vector<2x1x1x16xf32>
    %238 = vector.shape_cast %237 : vector<2x1x1x16xf32> to vector<2x16xf32>
    %c8_281 = arith.constant 8 : index
    %c0_282 = arith.constant 0 : index
    %c0_283 = arith.constant 0 : index
    %239 = vector.load %arg6[%c8_281, %c0_282, %c0_283] : memref<16x16x128xf32, #tpu.memory_space<vmem>>, vector<1x16x128xf32>
    %240 = vector.shape_cast %239 : vector<1x16x128xf32> to vector<16x128xf32>
    %cst_284 = arith.constant dense<0.000000e+00> : vector<2x128xf32>
    %241 = tpu.matmul %238, %240, %cst_284 {dimension_numbers = #tpu.dot_dimension_numbers<[1], [0], [0], [1], [0, 0, 1, 1], [], []>} : vector<2x16xf32>, vector<16x128xf32>, vector<2x128xf32> -> vector<2x128xf32>
    %242 = arith.addf %236, %241 : vector<2x128xf32>
    %c0_285 = arith.constant 0 : index
    %c2_286 = arith.constant 2 : index
    %c1_287 = arith.constant 1 : index
    %c0_288 = arith.constant 0 : index
    %243 = vector.load %arg16[%c0_285, %c2_286, %c1_287, %c0_288] : memref<2x4x4x16xf32, #tpu.memory_space<vmem>>, vector<2x1x1x16xf32>
    %244 = vector.shape_cast %243 : vector<2x1x1x16xf32> to vector<2x16xf32>
    %c9_289 = arith.constant 9 : index
    %c0_290 = arith.constant 0 : index
    %c0_291 = arith.constant 0 : index
    %245 = vector.load %arg6[%c9_289, %c0_290, %c0_291] : memref<16x16x128xf32, #tpu.memory_space<vmem>>, vector<1x16x128xf32>
    %246 = vector.shape_cast %245 : vector<1x16x128xf32> to vector<16x128xf32>
    %cst_292 = arith.constant dense<0.000000e+00> : vector<2x128xf32>
    %247 = tpu.matmul %244, %246, %cst_292 {dimension_numbers = #tpu.dot_dimension_numbers<[1], [0], [0], [1], [0, 0, 1, 1], [], []>} : vector<2x16xf32>, vector<16x128xf32>, vector<2x128xf32> -> vector<2x128xf32>
    %248 = arith.addf %242, %247 : vector<2x128xf32>
    %c0_293 = arith.constant 0 : index
    %c2_294 = arith.constant 2 : index
    %c2_295 = arith.constant 2 : index
    %c0_296 = arith.constant 0 : index
    %249 = vector.load %arg16[%c0_293, %c2_294, %c2_295, %c0_296] : memref<2x4x4x16xf32, #tpu.memory_space<vmem>>, vector<2x1x1x16xf32>
    %250 = vector.shape_cast %249 : vector<2x1x1x16xf32> to vector<2x16xf32>
    %c10_297 = arith.constant 10 : index
    %c0_298 = arith.constant 0 : index
    %c0_299 = arith.constant 0 : index
    %251 = vector.load %arg6[%c10_297, %c0_298, %c0_299] : memref<16x16x128xf32, #tpu.memory_space<vmem>>, vector<1x16x128xf32>
    %252 = vector.shape_cast %251 : vector<1x16x128xf32> to vector<16x128xf32>
    %cst_300 = arith.constant dense<0.000000e+00> : vector<2x128xf32>
    %253 = tpu.matmul %250, %252, %cst_300 {dimension_numbers = #tpu.dot_dimension_numbers<[1], [0], [0], [1], [0, 0, 1, 1], [], []>} : vector<2x16xf32>, vector<16x128xf32>, vector<2x128xf32> -> vector<2x128xf32>
    %254 = arith.addf %248, %253 : vector<2x128xf32>
    %c0_301 = arith.constant 0 : index
    %c2_302 = arith.constant 2 : index
    %c3_303 = arith.constant 3 : index
    %c0_304 = arith.constant 0 : index
    %255 = vector.load %arg16[%c0_301, %c2_302, %c3_303, %c0_304] : memref<2x4x4x16xf32, #tpu.memory_space<vmem>>, vector<2x1x1x16xf32>
    %256 = vector.shape_cast %255 : vector<2x1x1x16xf32> to vector<2x16xf32>
    %c11_305 = arith.constant 11 : index
    %c0_306 = arith.constant 0 : index
    %c0_307 = arith.constant 0 : index
    %257 = vector.load %arg6[%c11_305, %c0_306, %c0_307] : memref<16x16x128xf32, #tpu.memory_space<vmem>>, vector<1x16x128xf32>
    %258 = vector.shape_cast %257 : vector<1x16x128xf32> to vector<16x128xf32>
    %cst_308 = arith.constant dense<0.000000e+00> : vector<2x128xf32>
    %259 = tpu.matmul %256, %258, %cst_308 {dimension_numbers = #tpu.dot_dimension_numbers<[1], [0], [0], [1], [0, 0, 1, 1], [], []>} : vector<2x16xf32>, vector<16x128xf32>, vector<2x128xf32> -> vector<2x128xf32>
    %260 = arith.addf %254, %259 : vector<2x128xf32>
    %c0_309 = arith.constant 0 : index
    %c3_310 = arith.constant 3 : index
    %c0_311 = arith.constant 0 : index
    %c0_312 = arith.constant 0 : index
    %261 = vector.load %arg16[%c0_309, %c3_310, %c0_311, %c0_312] : memref<2x4x4x16xf32, #tpu.memory_space<vmem>>, vector<2x1x1x16xf32>
    %262 = vector.shape_cast %261 : vector<2x1x1x16xf32> to vector<2x16xf32>
    %c12_313 = arith.constant 12 : index
    %c0_314 = arith.constant 0 : index
    %c0_315 = arith.constant 0 : index
    %263 = vector.load %arg6[%c12_313, %c0_314, %c0_315] : memref<16x16x128xf32, #tpu.memory_space<vmem>>, vector<1x16x128xf32>
    %264 = vector.shape_cast %263 : vector<1x16x128xf32> to vector<16x128xf32>
    %cst_316 = arith.constant dense<0.000000e+00> : vector<2x128xf32>
    %265 = tpu.matmul %262, %264, %cst_316 {dimension_numbers = #tpu.dot_dimension_numbers<[1], [0], [0], [1], [0, 0, 1, 1], [], []>} : vector<2x16xf32>, vector<16x128xf32>, vector<2x128xf32> -> vector<2x128xf32>
    %266 = arith.addf %260, %265 : vector<2x128xf32>
    %c0_317 = arith.constant 0 : index
    %c3_318 = arith.constant 3 : index
    %c1_319 = arith.constant 1 : index
    %c0_320 = arith.constant 0 : index
    %267 = vector.load %arg16[%c0_317, %c3_318, %c1_319, %c0_320] : memref<2x4x4x16xf32, #tpu.memory_space<vmem>>, vector<2x1x1x16xf32>
    %268 = vector.shape_cast %267 : vector<2x1x1x16xf32> to vector<2x16xf32>
    %c13_321 = arith.constant 13 : index
    %c0_322 = arith.constant 0 : index
    %c0_323 = arith.constant 0 : index
    %269 = vector.load %arg6[%c13_321, %c0_322, %c0_323] : memref<16x16x128xf32, #tpu.memory_space<vmem>>, vector<1x16x128xf32>
    %270 = vector.shape_cast %269 : vector<1x16x128xf32> to vector<16x128xf32>
    %cst_324 = arith.constant dense<0.000000e+00> : vector<2x128xf32>
    %271 = tpu.matmul %268, %270, %cst_324 {dimension_numbers = #tpu.dot_dimension_numbers<[1], [0], [0], [1], [0, 0, 1, 1], [], []>} : vector<2x16xf32>, vector<16x128xf32>, vector<2x128xf32> -> vector<2x128xf32>
    %272 = arith.addf %266, %271 : vector<2x128xf32>
    %c0_325 = arith.constant 0 : index
    %c3_326 = arith.constant 3 : index
    %c2_327 = arith.constant 2 : index
    %c0_328 = arith.constant 0 : index
    %273 = vector.load %arg16[%c0_325, %c3_326, %c2_327, %c0_328] : memref<2x4x4x16xf32, #tpu.memory_space<vmem>>, vector<2x1x1x16xf32>
    %274 = vector.shape_cast %273 : vector<2x1x1x16xf32> to vector<2x16xf32>
    %c14_329 = arith.constant 14 : index
    %c0_330 = arith.constant 0 : index
    %c0_331 = arith.constant 0 : index
    %275 = vector.load %arg6[%c14_329, %c0_330, %c0_331] : memref<16x16x128xf32, #tpu.memory_space<vmem>>, vector<1x16x128xf32>
    %276 = vector.shape_cast %275 : vector<1x16x128xf32> to vector<16x128xf32>
    %cst_332 = arith.constant dense<0.000000e+00> : vector<2x128xf32>
    %277 = tpu.matmul %274, %276, %cst_332 {dimension_numbers = #tpu.dot_dimension_numbers<[1], [0], [0], [1], [0, 0, 1, 1], [], []>} : vector<2x16xf32>, vector<16x128xf32>, vector<2x128xf32> -> vector<2x128xf32>
    %278 = arith.addf %272, %277 : vector<2x128xf32>
    %c0_333 = arith.constant 0 : index
    %c3_334 = arith.constant 3 : index
    %c3_335 = arith.constant 3 : index
    %c0_336 = arith.constant 0 : index
    %279 = vector.load %arg16[%c0_333, %c3_334, %c3_335, %c0_336] : memref<2x4x4x16xf32, #tpu.memory_space<vmem>>, vector<2x1x1x16xf32>
    %280 = vector.shape_cast %279 : vector<2x1x1x16xf32> to vector<2x16xf32>
    %c15_337 = arith.constant 15 : index
    %c0_338 = arith.constant 0 : index
    %c0_339 = arith.constant 0 : index
    %281 = vector.load %arg6[%c15_337, %c0_338, %c0_339] : memref<16x16x128xf32, #tpu.memory_space<vmem>>, vector<1x16x128xf32>
    %282 = vector.shape_cast %281 : vector<1x16x128xf32> to vector<16x128xf32>
    %cst_340 = arith.constant dense<0.000000e+00> : vector<2x128xf32>
    %283 = tpu.matmul %280, %282, %cst_340 {dimension_numbers = #tpu.dot_dimension_numbers<[1], [0], [0], [1], [0, 0, 1, 1], [], []>} : vector<2x16xf32>, vector<16x128xf32>, vector<2x128xf32> -> vector<2x128xf32>
    %284 = arith.addf %278, %283 : vector<2x128xf32>
    %c0_341 = arith.constant 0 : index
    %c0_342 = arith.constant 0 : index
    %285 = vector.load %arg7[%c0_341, %c0_342] : memref<1x128xf32, #tpu.memory_space<vmem>>, vector<1x128xf32>
    %286 = vector.broadcast %285 : vector<1x128xf32> to vector<2x128xf32>
    %287 = arith.addf %284, %286 : vector<2x128xf32>
    %cst_343 = arith.constant 0.000000e+00 : f32
    %288 = vector.broadcast %cst_343 : f32 to vector<2x128xf32>
    %289 = arith.maximumf %287, %288 : vector<2x128xf32>
    %c0_344 = arith.constant 0 : index
    %c0_345 = arith.constant 0 : index
    %290 = vector.load %arg8[%c0_344, %c0_345] : memref<128x64xf32, #tpu.memory_space<vmem>>, vector<128x64xf32>
    %cst_346 = arith.constant dense<0.000000e+00> : vector<2x64xf32>
    %291 = tpu.matmul %289, %290, %cst_346 {dimension_numbers = #tpu.dot_dimension_numbers<[1], [0], [0], [1], [0, 0, 1, 1], [], []>} : vector<2x128xf32>, vector<128x64xf32>, vector<2x64xf32> -> vector<2x64xf32>
    %c0_347 = arith.constant 0 : index
    %c0_348 = arith.constant 0 : index
    %292 = vector.load %arg9[%c0_347, %c0_348] : memref<1x64xf32, #tpu.memory_space<vmem>>, vector<1x64xf32>
    %293 = vector.broadcast %292 : vector<1x64xf32> to vector<2x64xf32>
    %294 = arith.addf %291, %293 : vector<2x64xf32>
    %cst_349 = arith.constant 0.000000e+00 : f32
    %295 = vector.broadcast %cst_349 : f32 to vector<2x64xf32>
    %296 = arith.maximumf %294, %295 : vector<2x64xf32>
    %c0_350 = arith.constant 0 : index
    %c0_351 = arith.constant 0 : index
    %297 = vector.load %arg10[%c0_350, %c0_351] : memref<64x10xf32, #tpu.memory_space<vmem>>, vector<64x10xf32>
    %cst_352 = arith.constant dense<0.000000e+00> : vector<2x10xf32>
    %298 = tpu.matmul %296, %297, %cst_352 {dimension_numbers = #tpu.dot_dimension_numbers<[1], [0], [0], [1], [0, 0, 1, 1], [], []>} : vector<2x64xf32>, vector<64x10xf32>, vector<2x10xf32> -> vector<2x10xf32>
    %c0_353 = arith.constant 0 : index
    %c0_354 = arith.constant 0 : index
    %299 = vector.load %arg11[%c0_353, %c0_354] : memref<1x10xf32, #tpu.memory_space<vmem>>, vector<1x10xf32>
    %300 = vector.broadcast %299 : vector<1x10xf32> to vector<2x10xf32>
    %301 = arith.addf %298, %300 : vector<2x10xf32>
    %c0_355 = arith.constant 0 : index
    %c0_356 = arith.constant 0 : index
    %302 = vector.load %arg12[%c0_355, %c0_356] : memref<2x10xf32, #tpu.memory_space<vmem>>, vector<2x10xf32>
    tpu.vector_store %arg12[%c0_355, %c0_356], %301 {strides = array<i32>} : memref<2x10xf32, #tpu.memory_space<vmem>>, vector<2x10xf32>,
    return
  }
  func.func @transform_0(%arg0: i32) -> (i32, i32) {
    %c0_i32 = arith.constant 0 : i32
    %c0_i32_0 = arith.constant 0 : i32
    %c0_i32_1 = arith.constant 0 : i32
    return %c0_i32, %c0_i32_0 : i32, i32
  }
  func.func @transform_1(%arg0: i32) -> (i32, i32) {
    %c0_i32 = arith.constant 0 : i32
    %c0_i32_0 = arith.constant 0 : i32
    %c0_i32_1 = arith.constant 0 : i32
    return %c0_i32, %c0_i32_0 : i32, i32
  }
  func.func @transform_2(%arg0: i32) -> (i32, i32) {
    %c0_i32 = arith.constant 0 : i32
    %c0_i32_0 = arith.constant 0 : i32
    %c0_i32_1 = arith.constant 0 : i32
    return %c0_i32, %c0_i32_0 : i32, i32
  }
  func.func @transform_3(%arg0: i32) -> (i32, i32, i32) {
    %c0_i32 = arith.constant 0 : i32
    %c0_i32_0 = arith.constant 0 : i32
    %c0_i32_1 = arith.constant 0 : i32
    %c0_i32_2 = arith.constant 0 : i32
    return %c0_i32, %c0_i32_0, %c0_i32_1 : i32, i32, i32
  }
  func.func @transform_4(%arg0: i32) -> (i32, i32) {
    %c0_i32 = arith.constant 0 : i32
    %c0_i32_0 = arith.constant 0 : i32
    %c0_i32_1 = arith.constant 0 : i32
    return %c0_i32, %c0_i32_0 : i32, i32
  }
  func.func @transform_5(%arg0: i32) -> (i32, i32, i32) {
    %c0_i32 = arith.constant 0 : i32
    %c0_i32_0 = arith.constant 0 : i32
    %c0_i32_1 = arith.constant 0 : i32
    %c0_i32_2 = arith.constant 0 : i32
    return %c0_i32, %c0_i32_0, %c0_i32_1 : i32, i32, i32
  }
  func.func @transform_6(%arg0: i32) -> (i32, i32) {
    %c0_i32 = arith.constant 0 : i32
    %c0_i32_0 = arith.constant 0 : i32
    %c0_i32_1 = arith.constant 0 : i32
    return %c0_i32, %c0_i32_0 : i32, i32
  }
  func.func @transform_7(%arg0: i32) -> (i32, i32) {
    %c0_i32 = arith.constant 0 : i32
    %c0_i32_0 = arith.constant 0 : i32
    %c0_i32_1 = arith.constant 0 : i32
    return %c0_i32, %c0_i32_0 : i32, i32
  }
  func.func @transform_8(%arg0: i32) -> (i32, i32) {
    %c0_i32 = arith.constant 0 : i32
    %c0_i32_0 = arith.constant 0 : i32
    %c0_i32_1 = arith.constant 0 : i32
    return %c0_i32, %c0_i32_0 : i32, i32
  }
  func.func @transform_9(%arg0: i32) -> (i32, i32) {
    %c0_i32 = arith.constant 0 : i32
    %c0_i32_0 = arith.constant 0 : i32
    %c0_i32_1 = arith.constant 0 : i32
    return %c0_i32, %c0_i32_0 : i32, i32
  }
  func.func @transform_10(%arg0: i32) -> (i32, i32) {
    %c0_i32 = arith.constant 0 : i32
    %c0_i32_0 = arith.constant 0 : i32
    %c0_i32_1 = arith.constant 0 : i32
    return %c0_i32, %c0_i32_0 : i32, i32
  }
  func.func @transform_11(%arg0: i32) -> (i32, i32) {
    %c0_i32 = arith.constant 0 : i32
    %c0_i32_0 = arith.constant 0 : i32
    %c0_i32_1 = arith.constant 0 : i32
    return %c0_i32, %c0_i32_0 : i32, i32
  }
}

</mosaic_0001>

<bundles_post_ra>
// kernel: network_forward.1
= control target key start
LH: loop header
LB: loop body
LE: loop exit
PB: predicated region body
PF: predicated region fallthrough
CT: control target
= control target key end

     0   :  { %vm627_vm0 = vcmask 1040384   ;;  %vm194_vm1 = vcmask 203776   ;;  %vm12420_vm2 = vmmov 1   ;;  %s14900_s0 = inlined_call_operand.vmem [shape: f32[1152,25], index: 0, kind: input, shape index: {}]   ;;  %s14901_s1 = inlined_call_operand.vmem [shape: f32[25,8], index: 1, kind: input, shape index: {}]   ;;  %s14902_s2 = inlined_call_operand.vmem [shape: f32[1,8], index: 2, kind: input, shape index: {}]   ;;  %s14903_s3 = inlined_call_operand.vmem [shape: f32[25,8,16], index: 3, kind: input, shape index: {}]   ;;  %s14904_s4 = inlined_call_operand.vmem [shape: f32[1,16], index: 4, kind: input, shape index: {}]   ;;  %s14905_s5 = inlined_call_operand.vmem [shape: f32[16,16,128], index: 5, kind: input, shape index: {}]   ;;  %s14906_s6 = inlined_call_operand.vmem [shape: f32[1,128], index: 6, kind: input, shape index: {}]   ;;  %s14907_s7 = inlined_call_operand.vmem [shape: f32[128,64], index: 7, kind: input, shape index: {}]   ;;  %s14908_s8 = inlined_call_operand.vmem [shape: f32[1,64], index: 8, kind: input, shape index: {}]   ;;  %s14909_s9 = inlined_call_operand.vmem [shape: f32[64,10], index: 9, kind: input, shape index: {}]   ;;  %s14910_s10 = inlined_call_operand.vmem [shape: f32[1,10], index: 10, kind: input, shape index: {}]   ;;  %s14911_s11 = inlined_call_operand.hbm [shape: f32[2,10], index: 11, kind: output, shape index: {}]  }
   0x1   :  { %v183_v0 = vld [vmem:[%s14901_s1] sm:$0xff]  ;;  %v184_v1 = vld [vmem:[%s14901_s1 + $0x8] sm:$0xff]  ;;  %v185_v2 = vld [vmem:[%s14901_s1 + $0x10] sm:$0xff] }
   0x2   :  { %v11908_v3 = vpack.c.bf16 %v184_v1, %v183_v0  ;;  %v186_v4 = vld [vmem:[%s14901_s1 + $0x18] sm:$0x1]  ;;  %v39_v5 = vld [vmem:[%s14900_s0] sm:$0xff]  ;;  %vm11913_vm3 = vmpackc.low %vm627_vm0, %vm12420_vm2 }
   0x3   :  { %v11912_v6 = vpack.c.bf16 %v186_v4, %v185_v2  ;;  %10876 = vmatprep.mubr.msk.f32.mxu0 %vm194_vm1, %v39_v5  ;;  %v40_v7 = vld [vmem:[%s14900_s0 + $0x8] sm:$0xff]  ;;  %v41_v8 = vld [vmem:[%s14900_s0 + $0x10] sm:$0xff]  ;;  %v42_v9 = vld [vmem:[%s14900_s0 + $0x18] sm:$0xff] }
   0x4   :  { %11909 = vmatprep.subr.bf16.mxu0 %v11908_v3  ;;  %v43_v10 = vld [vmem:[%s14900_s0 + $0x20] sm:$0xff]  ;;  %v44_v11 = vld [vmem:[%s14900_s0 + $0x28] sm:$0xff]  ;;  %v45_v12 = vld [vmem:[%s14900_s0 + $0x30] sm:$0xff] }
   0x5   :  { %11911 = vmatpush3.bf16.msra.mxu0 %v11908_v3  ;;  %v46_v13 = vld [vmem:[%s14900_s0 + $0x38] sm:$0xff]  ;;  %v47_v14 = vld [vmem:[%s14900_s0 + $0x40] sm:$0xff]  ;;  %v48_v15 = vld [vmem:[%s14900_s0 + $0x48] sm:$0xff] }
   0x6   :  { %11914 = vmatprep.subr.msk.bf16.mxu0 %vm11913_vm3, %v11912_v6  ;;  %v49_v16 = vld [vmem:[%s14900_s0 + $0x50] sm:$0xff] }
   0x9   :  { %11917 = vmatpush3.bf16.msk.msra.mxu0 %vm11913_vm3, %v11912_v6 }
   0xc   :  { %10877 = vmatmul.mubr.msk.f32.vlgmr.msra.gmra.mrb[0].mxu0 %vm194_vm1, %v40_v7 }
   0xd   :  { %10879 = vmatprep.mubr.msk.f32.mxu0 %vm194_vm1, %v41_v8 }
  0x10   :  { %10880 = vmatmul.mubr.msk.f32.gmra.mrb[2].mxu0 %vm194_vm1, %v42_v9 }
  0x11   :  { %10882 = vmatprep.mubr.msk.f32.mxu0 %vm194_vm1, %v43_v10 }
  0x14   :  { %10883 = vmatmul.mubr.msk.f32.gmra.mrb[4].mxu0 %vm194_vm1, %v44_v11 }
  0x15   :  { %10885 = vmatprep.mubr.msk.f32.mxu0 %vm194_vm1, %v45_v12 }
  0x18   :  { %10886 = vmatmul.mubr.msk.f32.gmra.mrb[6].mxu0 %vm194_vm1, %v46_v13 }
  0x19   :  { %10888 = vmatprep.mubr.msk.f32.mxu0 %vm194_vm1, %v47_v14 }
  0x1a   :  { %16 = vsyncpa [#allocation7], 0  ;;  %v50_v17 = vld [vmem:[%s14900_s0 + $0x58] sm:$0xff]  ;;  %v51_v18 = vld [vmem:[%s14900_s0 + $0x60] sm:$0xff]  ;;  %vm1560_vm4 = vcmask 64512   ;;  %vm2233_vm5 = vcmask 60416  }
  0x1b   :  { %v52_v19 = vld [vmem:[%s14900_s0 + $0x68] sm:$0xff]  ;;  %v53_v20 = vld [vmem:[%s14900_s0 + $0x70] sm:$0xff]  ;;  %v54_v21 = vld [vmem:[%s14900_s0 + $0x78] sm:$0xff]  ;;  %vm12422_vm6 = vmmov 0   ;;  %vm7966_vm7 = vcmask 130048   ;;  %vm8070_vm8 = vcmask 125952  }
  0x1c   :  { %10889 = vmatmul.mubr.msk.f32.gmra.mrb[8].mxu0 %vm194_vm1, %v48_v15  ;;  %v55_v22 = vld [vmem:[%s14900_s0 + $0x80] sm:$0xff]  ;;  %v56_v23 = vld [vmem:[%s14900_s0 + $0x88] sm:$0xff]  ;;  %v57_v24 = vld [vmem:[%s14900_s0 + $0x90] sm:$0xff]  ;;  %vm8091_vm9 = vcmask 1041409   ;;  %vm9510_vm10 = vcmask 523264   ;;  %s12424_s22 = smov [#allocation6]  }
  0x1d   :  { %10891 = vmatprep.mubr.msk.f32.mxu0 %vm194_vm1, %v49_v16  ;;  %v58_v25 = vld [vmem:[%s14900_s0 + $0x98] sm:$0xff]  ;;  %v59_v26 = vld [vmem:[%s14900_s0 + $0xa0] sm:$0xff]  ;;  %v60_v27 = vld [vmem:[%s14900_s0 + $0xa8] sm:$0xff]  ;;  %s9592_s23 = sshll.u32 %s12424_s22, 4  ;;  %vm9584_vm11 = vcmask 74752   ;;  %s9593_s23 = int_to_ptr.vmem [resolvable:$true] %s9592_s23 }
  0x1e   :  { %v61_v28 = vld [vmem:[%s14900_s0 + $0xb0] sm:$0xff]  ;;  %v62_v29 = vld [vmem:[%s14900_s0 + $0xb8] sm:$0xff]  ;;  %v63_v30 = vld [vmem:[%s14900_s0 + $0xc0] sm:$0xff]  ;;  %p12401_p1 = scmp.lt.s32.totalorder %s9593_s23, %s9593_s23 }
  0x1f   :  { %v64_v31 = vld [vmem:[%s14900_s0 + $0xc8] sm:$0xff]  ;;  %v65_v32 = vld [vmem:[%s14900_s0 + $0xd0] sm:$0xff]  ;;  %v66_v33 = vld [vmem:[%s14900_s0 + $0xd8] sm:$0xff] }
  0x20   :  { %10892 = vmatmul.mubr.msk.f32.gmra.mrb[10].mxu0 %vm194_vm1, %v50_v17  ;;  %v67_v34 = vld [vmem:[%s14900_s0 + $0xe0] sm:$0xff]  ;;  %v68_v35 = vld [vmem:[%s14900_s0 + $0xe8] sm:$0xff]  ;;  %v69_v36 = vld [vmem:[%s14900_s0 + $0xf0] sm:$0xff] }
  0x21   :  { %10894 = vmatprep.mubr.msk.f32.mxu0 %vm194_vm1, %v51_v18  ;;  %v70_v37 = vld [vmem:[%s14900_s0 + $0xf8] sm:$0xff]  ;;  %v71_v38 = vld [vmem:[%s14900_s0 + $0x100] sm:$0xff]  ;;  %v72_v39 = vld [vmem:[%s14900_s0 + $0x108] sm:$0xff] }
  0x22   :  { %v73_v40 = vld [vmem:[%s14900_s0 + $0x110] sm:$0xff]  ;;  %v74_v41 = vld [vmem:[%s14900_s0 + $0x118] sm:$0xff]  ;;  %v75_v42 = vld [vmem:[%s14900_s0 + $0x120] sm:$0xff] }
  0x23   :  { %v76_v43 = vld [vmem:[%s14900_s0 + $0x128] sm:$0xff]  ;;  %v77_v44 = vld [vmem:[%s14900_s0 + $0x130] sm:$0xff]  ;;  %v78_v45 = vld [vmem:[%s14900_s0 + $0x138] sm:$0xff] }
  0x24   :  { %10895 = vmatmul.mubr.msk.f32.gmra.mrb[12].mxu0 %vm194_vm1, %v52_v19  ;;  %v79_v46 = vld [vmem:[%s14900_s0 + $0x140] sm:$0xff]  ;;  %v80_v47 = vld [vmem:[%s14900_s0 + $0x148] sm:$0xff]  ;;  %v81_v48 = vld [vmem:[%s14900_s0 + $0x150] sm:$0xff] }
  0x25   :  { %10897 = vmatprep.mubr.msk.f32.mxu0 %vm194_vm1, %v53_v20  ;;  %v82_v49 = vld [vmem:[%s14900_s0 + $0x158] sm:$0xff]  ;;  %v83_v50 = vld [vmem:[%s14900_s0 + $0x160] sm:$0xff]  ;;  %v84_v51 = vld [vmem:[%s14900_s0 + $0x168] sm:$0xff] }
  0x26   :  { %v85_v52 = vld [vmem:[%s14900_s0 + $0x170] sm:$0xff]  ;;  %v86_v53 = vld [vmem:[%s14900_s0 + $0x178] sm:$0xff]  ;;  %v87_v54 = vld [vmem:[%s14900_s0 + $0x180] sm:$0xff] }
  0x27   :  { %v88_v55 = vld [vmem:[%s14900_s0 + $0x188] sm:$0xff]  ;;  %v89_v56 = vld [vmem:[%s14900_s0 + $0x190] sm:$0xff]  ;;  %v90_v57 = vld [vmem:[%s14900_s0 + $0x198] sm:$0xff] }
  0x28   :  { %10898 = vmatmul.mubr.msk.f32.gmra.mrb[14].mxu0 %vm194_vm1, %v54_v21  ;;  %v91_v58 = vld [vmem:[%s14900_s0 + $0x1a0] sm:$0xff]  ;;  %v92_v59 = vld [vmem:[%s14900_s0 + $0x1a8] sm:$0xff]  ;;  %v93_v60 = vld [vmem:[%s14900_s0 + $0x1b0] sm:$0xff] }
  0x29   :  { %10900 = vmatprep.mubr.msk.f32.mxu0 %vm194_vm1, %v55_v22  ;;  %v94_v61 = vld [vmem:[%s14900_s0 + $0x1b8] sm:$0xff]  ;;  %v95_v62 = vld [vmem:[%s14900_s0 + $0x1c0] sm:$0xff]  ;;  %v96_v63 = vld [vmem:[%s14900_s0 + $0x1c8] sm:$0xff] }
  0x2a   :  { %v97_v0 = vld [vmem:[%s14900_s0 + $0x1d0] sm:$0xff]  ;;  %v98_v1 = vld [vmem:[%s14900_s0 + $0x1d8] sm:$0xff]  ;;  %v99_v2 = vld [vmem:[%s14900_s0 + $0x1e0] sm:$0xff] }
  0x2b   :  { %v100_v3 = vld [vmem:[%s14900_s0 + $0x1e8] sm:$0xff]  ;;  %v101_v4 = vld [vmem:[%s14900_s0 + $0x1f0] sm:$0xff]  ;;  %v102_v5 = vld [vmem:[%s14900_s0 + $0x1f8] sm:$0xff] }
  0x2c   :  { %10901 = vmatmul.mubr.msk.f32.gmra.mrb[16].mxu0 %vm194_vm1, %v56_v23  ;;  %v103_v6 = vld [vmem:[%s14900_s0 + $0x200] sm:$0xff]  ;;  %v104_v7 = vld [vmem:[%s14900_s0 + $0x208] sm:$0xff]  ;;  %v105_v8 = vld [vmem:[%s14900_s0 + $0x210] sm:$0xff] }
  0x2d   :  { %10903 = vmatprep.mubr.msk.f32.mxu0 %vm194_vm1, %v57_v24  ;;  %v106_v9 = vld [vmem:[%s14900_s0 + $0x218] sm:$0xff]  ;;  %v107_v10 = vld [vmem:[%s14900_s0 + $0x220] sm:$0xff]  ;;  %v108_v11 = vld [vmem:[%s14900_s0 + $0x228] sm:$0xff] }
  0x2e   :  { %v109_v12 = vld [vmem:[%s14900_s0 + $0x230] sm:$0xff]  ;;  %v110_v13 = vld [vmem:[%s14900_s0 + $0x238] sm:$0xff]  ;;  %v111_v14 = vld [vmem:[%s14900_s0 + $0x240] sm:$0xff] }
  0x2f   :  { %v112_v15 = vld [vmem:[%s14900_s0 + $0x248] sm:$0xff]  ;;  %v113_v16 = vld [vmem:[%s14900_s0 + $0x250] sm:$0xff]  ;;  %v114_v17 = vld [vmem:[%s14900_s0 + $0x258] sm:$0xff] }
  0x30   :  { %10904 = vmatmul.mubr.msk.f32.gmra.mrb[18].mxu0 %vm194_vm1, %v58_v25  ;;  %v115_v18 = vld [vmem:[%s14900_s0 + $0x260] sm:$0xff]  ;;  %v116_v19 = vld [vmem:[%s14900_s0 + $0x268] sm:$0xff]  ;;  %v117_v20 = vld [vmem:[%s14900_s0 + $0x270] sm:$0xff] }
  0x31   :  { %10906 = vmatprep.mubr.msk.f32.mxu0 %vm194_vm1, %v59_v26  ;;  %v118_v21 = vld [vmem:[%s14900_s0 + $0x278] sm:$0xff]  ;;  %v119_v22 = vld [vmem:[%s14900_s0 + $0x280] sm:$0xff]  ;;  %v120_v23 = vld [vmem:[%s14900_s0 + $0x288] sm:$0xff] }
  0x32   :  { %v121_v24 = vld [vmem:[%s14900_s0 + $0x290] sm:$0xff]  ;;  %v9746_v25 = vld [vmem:[%s14903_s3 + $0x8] sm:$0xff]  ;;  %v122_v26 = vld [vmem:[%s14900_s0 + $0x298] sm:$0xff] }
  0x33   :  { %11092 = vmatprep.subr.mxu0 %v9746_v25 }
  0x34   :  { %10907 = vmatmul.mubr.msk.f32.gmra.mrb[20].mxu0 %vm194_vm1, %v60_v27  ;;  %v123_v27 = vld [vmem:[%s14900_s0 + $0x2a0] sm:$0xff] }
  0x35   :  { %10909 = vmatprep.mubr.msk.f32.mxu0 %vm194_vm1, %v61_v28  ;;  %11093 = vmatpush3.msra.mxu0 %v9746_v25  ;;  %v9847_v28 = vld [vmem:[%s14903_s3 + $0x30] sm:$0xff] }
  0x36   :  { %12002 = vmatprep.subr.mxu1 %v9847_v28 }
  0x37   :  { %12003 = vmatpush3.msra.mxu1 %v9847_v28 }
  0x38   :  { %10910 = vmatmul.mubr.msk.f32.gmra.mrb[22].mxu0 %vm194_vm1, %v62_v29  ;;  %v124_v29 = vld [vmem:[%s14900_s0 + $0x2a8] sm:$0xff] }
  0x39   :  { %10912 = vmatprep.mubr.msk.f32.mxu0 %vm194_vm1, %v63_v30  ;;  %v125_v30 = vld [vmem:[%s14900_s0 + $0x2b0] sm:$0xff] }
  0x3c   :  { %10913 = vmatmul.mubr.msk.f32.gmra.mrb[24].mxu0 %vm194_vm1, %v64_v31  ;;  %v126_v31 = vld [vmem:[%s14900_s0 + $0x2b8] sm:$0xff] }
  0x3d   :  { %10915 = vmatprep.mubr.msk.f32.mxu0 %vm194_vm1, %v65_v32  ;;  %v127_v32 = vld [vmem:[%s14900_s0 + $0x2c0] sm:$0xff] }
  0x40   :  { %10916 = vmatmul.mubr.msk.f32.gmra.mrb[26].mxu0 %vm194_vm1, %v66_v33  ;;  %v128_v33 = vld [vmem:[%s14900_s0 + $0x2c8] sm:$0xff] }
  0x41   :  { %10918 = vmatprep.mubr.msk.f32.mxu0 %vm194_vm1, %v67_v34  ;;  %v129_v34 = vld [vmem:[%s14900_s0 + $0x2d0] sm:$0xff] }
  0x44   :  { %10919 = vmatmul.mubr.msk.f32.gmra.mrb[28].mxu0 %vm194_vm1, %v68_v35  ;;  %v130_v35 = vld [vmem:[%s14900_s0 + $0x2d8] sm:$0xff] }
  0x45   :  { %10921 = vmatprep.mubr.msk.f32.mxu0 %vm194_vm1, %v69_v36  ;;  %v131_v36 = vld [vmem:[%s14900_s0 + $0x2e0] sm:$0xff] }
  0x48   :  { %10922 = vmatmul.mubr.msk.f32.gmra.mrb[30].mxu0 %vm194_vm1, %v70_v37  ;;  %v132_v37 = vld [vmem:[%s14900_s0 + $0x2e8] sm:$0xff] }
  0x49   :  { %10924 = vmatprep.mubr.msk.f32.mxu0 %vm194_vm1, %v71_v38  ;;  %v133_v38 = vld [vmem:[%s14900_s0 + $0x2f0] sm:$0xff] }
  0x4c   :  { %10925 = vmatmul.mubr.msk.f32.gmra.mrb[32].mxu0 %vm194_vm1, %v72_v39  ;;  %v134_v39 = vld [vmem:[%s14900_s0 + $0x2f8] sm:$0xff] }
  0x4d   :  { %10927 = vmatprep.mubr.msk.f32.mxu0 %vm194_vm1, %v73_v40  ;;  %v135_v40 = vld [vmem:[%s14900_s0 + $0x300] sm:$0xff] }
  0x50   :  { %10928 = vmatmul.mubr.msk.f32.gmra.mrb[34].mxu0 %vm194_vm1, %v74_v41  ;;  %v136_v41 = vld [vmem:[%s14900_s0 + $0x308] sm:$0xff] }
  0x51   :  { %10930 = vmatprep.mubr.msk.f32.mxu0 %vm194_vm1, %v75_v42  ;;  %v137_v42 = vld [vmem:[%s14900_s0 + $0x310] sm:$0xff] }
  0x54   :  { %10931 = vmatmul.mubr.msk.f32.gmra.mrb[36].mxu0 %vm194_vm1, %v76_v43  ;;  %v138_v43 = vld [vmem:[%s14900_s0 + $0x318] sm:$0xff] }
  0x55   :  { %10933 = vmatprep.mubr.msk.f32.mxu0 %vm194_vm1, %v77_v44  ;;  %v139_v44 = vld [vmem:[%s14900_s0 + $0x320] sm:$0xff] }
  0x58   :  { %10934 = vmatmul.mubr.msk.f32.gmra.mrb[38].mxu0 %vm194_vm1, %v78_v45  ;;  %v140_v45 = vld [vmem:[%s14900_s0 + $0x328] sm:$0xff] }
  0x59   :  { %10936 = vmatprep.mubr.msk.f32.mxu0 %vm194_vm1, %v79_v46  ;;  %v141_v46 = vld [vmem:[%s14900_s0 + $0x330] sm:$0xff] }
  0x5c   :  { %10937 = vmatmul.mubr.msk.f32.gmra.mrb[40].mxu0 %vm194_vm1, %v80_v47  ;;  %v142_v47 = vld [vmem:[%s14900_s0 + $0x338] sm:$0xff] }
  0x5d   :  { %10939 = vmatprep.mubr.msk.f32.mxu0 %vm194_vm1, %v81_v48  ;;  %v143_v48 = vld [vmem:[%s14900_s0 + $0x340] sm:$0xff] }
  0x60   :  { %10940 = vmatmul.mubr.msk.f32.gmra.mrb[42].mxu0 %vm194_vm1, %v82_v49  ;;  %v144_v49 = vld [vmem:[%s14900_s0 + $0x348] sm:$0xff] }
  0x61   :  { %10942 = vmatprep.mubr.msk.f32.mxu0 %vm194_vm1, %v83_v50  ;;  %v145_v50 = vld [vmem:[%s14900_s0 + $0x350] sm:$0xff] }
  0x64   :  { %10943 = vmatmul.mubr.msk.f32.gmra.mrb[44].mxu0 %vm194_vm1, %v84_v51  ;;  %v12933_v51 = vld [vmem:[%s14902_s2] ss:$0 sm:$0xff] }
  0x65   :  { %10945 = vmatprep.mubr.msk.f32.mxu0 %vm194_vm1, %v85_v52  ;;  %v146_v52 = vld [vmem:[%s14900_s0 + $0x358] sm:$0xff] }
  0x68   :  { %10946 = vmatmul.mubr.msk.f32.gmra.mrb[46].mxu0 %vm194_vm1, %v86_v53  ;;  %v147_v53 = vld [vmem:[%s14900_s0 + $0x360] sm:$0xff] }
  0x69   :  { %10948 = vmatprep.mubr.msk.f32.mxu0 %vm194_vm1, %v87_v54 }
  0x6c   :  { %10949 = vmatmul.mubr.msk.f32.gmra.mrb[48].mxu0 %vm194_vm1, %v88_v55 }
  0x6d   :  { %10951 = vmatprep.mubr.msk.f32.mxu0 %vm194_vm1, %v89_v56 }
  0x70   :  { %10952 = vmatmul.mubr.msk.f32.gmra.mrb[50].mxu0 %vm194_vm1, %v90_v57 }
  0x71   :  { %10954 = vmatprep.mubr.msk.f32.mxu0 %vm194_vm1, %v91_v58  ;;  %v148_v58 = vld [vmem:[%s14900_s0 + $0x368] sm:$0xff] }
  0x74   :  { %10955 = vmatmul.mubr.msk.f32.gmra.mrb[52].mxu0 %vm194_vm1, %v92_v59 }
  0x75   :  { %10957 = vmatprep.mubr.msk.f32.mxu0 %vm194_vm1, %v93_v60  ;;  %v149_v60 = vld [vmem:[%s14900_s0 + $0x370] sm:$0xff] }
  0x78   :  { %10958 = vmatmul.mubr.msk.f32.gmra.mrb[54].mxu0 %vm194_vm1, %v94_v61 }
  0x79   :  { %10960 = vmatprep.mubr.msk.f32.mxu0 %vm194_vm1, %v95_v62 }
  0x7c   :  { %10961 = vmatmul.mubr.msk.f32.gmra.mrb[56].mxu0 %vm194_vm1, %v96_v63 }
  0x7d   :  { %10963 = vmatprep.mubr.msk.f32.mxu0 %vm194_vm1, %v97_v0 }
  0x80   :  { %10964 = vmatmul.mubr.msk.f32.gmra.mrb[58].mxu0 %vm194_vm1, %v98_v1 }
  0x81   :  { %10966 = vmatprep.mubr.msk.f32.mxu0 %vm194_vm1, %v99_v2  ;;  %v150_v2 = vld [vmem:[%s14900_s0 + $0x378] sm:$0xff] }
  0x84   :  { %10967 = vmatmul.mubr.msk.f32.gmra.mrb[60].mxu0 %vm194_vm1, %v100_v3 }
  0x85   :  { %10969 = vmatprep.mubr.msk.f32.mxu0 %vm194_vm1, %v101_v4  ;;  %v151_v4 = vld [vmem:[%s14900_s0 + $0x380] sm:$0xff] }
  0x88   :  { %10970 = vmatmul.mubr.msk.f32.gmra.mrb[62].mxu0 %vm194_vm1, %v102_v5 }
  0x89   :  { %10972 = vmatprep.mubr.msk.f32.mxu0 %vm194_vm1, %v103_v6 }
  0x8c   :  { %10973 = vmatmul.mubr.msk.f32.gmra.mrb[64].mxu0 %vm194_vm1, %v104_v7 }
  0x8d   :  { %10975 = vmatprep.mubr.msk.f32.mxu0 %vm194_vm1, %v105_v8 }
  0x90   :  { %10976 = vmatmul.mubr.msk.f32.gmra.mrb[66].mxu0 %vm194_vm1, %v106_v9 }
  0x91   :  { %10978 = vmatprep.mubr.msk.f32.mxu0 %vm194_vm1, %v107_v10  ;;  %v152_v10 = vld [vmem:[%s14900_s0 + $0x388] sm:$0xff] }
  0x94   :  { %10979 = vmatmul.mubr.msk.f32.gmra.mrb[68].mxu0 %vm194_vm1, %v108_v11 }
  0x95   :  { %10981 = vmatprep.mubr.msk.f32.mxu0 %vm194_vm1, %v109_v12  ;;  %v153_v12 = vld [vmem:[%s14900_s0 + $0x390] sm:$0xff] }
  0x98   :  { %10982 = vmatmul.mubr.msk.f32.gmra.mrb[70].mxu0 %vm194_vm1, %v110_v13 }
  0x99   :  { %10984 = vmatprep.mubr.msk.f32.mxu0 %vm194_vm1, %v111_v14 }
  0x9c   :  { %10985 = vmatmul.mubr.msk.f32.gmra.mrb[72].mxu0 %vm194_vm1, %v112_v15 }
  0x9d   :  { %10987 = vmatprep.mubr.msk.f32.mxu0 %vm194_vm1, %v113_v16 }
  0xa0   :  { %10988 = vmatmul.mubr.msk.f32.gmra.mrb[74].mxu0 %vm194_vm1, %v114_v17 }
  0xa1   :  { %10990 = vmatprep.mubr.msk.f32.mxu0 %vm194_vm1, %v115_v18  ;;  %v154_v18 = vld [vmem:[%s14900_s0 + $0x398] sm:$0xff] }
  0xa4   :  { %10991 = vmatmul.mubr.msk.f32.gmra.mrb[76].mxu0 %vm194_vm1, %v116_v19 }
  0xa5   :  { %10993 = vmatprep.mubr.msk.f32.mxu0 %vm194_vm1, %v117_v20  ;;  %v155_v20 = vld [vmem:[%s14900_s0 + $0x3a0] sm:$0xff] }
  0xa8   :  { %10994 = vmatmul.mubr.msk.f32.gmra.mrb[78].mxu0 %vm194_vm1, %v118_v21 }
  0xa9   :  { %10996 = vmatprep.mubr.msk.f32.mxu0 %vm194_vm1, %v119_v22 }
  0xac   :  { %10997 = vmatmul.mubr.msk.f32.gmra.mrb[80].mxu0 %vm194_vm1, %v120_v23 }
  0xad   :  { %10999 = vmatprep.mubr.msk.f32.mxu0 %vm194_vm1, %v121_v24 }
  0xb0   :  { %11000 = vmatmul.mubr.msk.f32.gmra.mrb[82].mxu0 %vm194_vm1, %v122_v26 }
  0xb1   :  { %11002 = vmatprep.mubr.msk.f32.mxu0 %vm194_vm1, %v123_v27  ;;  %v156_v27 = vld [vmem:[%s14900_s0 + $0x3a8] sm:$0xff] }
  0xb4   :  { %11003 = vmatmul.mubr.msk.f32.gmra.mrb[84].mxu0 %vm194_vm1, %v124_v29 }
  0xb5   :  { %11005 = vmatprep.mubr.msk.f32.mxu0 %vm194_vm1, %v125_v30 }
  0xb8   :  { %11006 = vmatmul.mubr.msk.f32.gmra.mrb[86].mxu0 %vm194_vm1, %v126_v31 }
  0xb9   :  { %11008 = vmatprep.mubr.msk.f32.mxu0 %vm194_vm1, %v127_v32  ;;  %v157_v32 = vld [vmem:[%s14900_s0 + $0x3b0] sm:$0xff] }
  0xbc   :  { %11009 = vmatmul.mubr.msk.f32.gmra.mrb[88].mxu0 %vm194_vm1, %v128_v33 }
  0xbd   :  { %11011 = vmatprep.mubr.msk.f32.mxu0 %vm194_vm1, %v129_v34 }
  0xc0   :  { %11012 = vmatmul.mubr.msk.f32.gmra.mrb[90].mxu0 %vm194_vm1, %v130_v35 }
  0xc1   :  { %11014 = vmatprep.mubr.msk.f32.mxu0 %vm194_vm1, %v131_v36 }
  0xc4   :  { %11015 = vmatmul.mubr.msk.f32.gmra.mrb[92].mxu0 %vm194_vm1, %v132_v37 }
  0xc5   :  { %11017 = vmatprep.mubr.msk.f32.mxu0 %vm194_vm1, %v133_v38 }
  0xc8   :  { %11018 = vmatmul.mubr.msk.f32.gmra.mrb[94].mxu0 %vm194_vm1, %v134_v39 }
  0xc9   :  { %11020 = vmatprep.mubr.msk.f32.mxu0 %vm194_vm1, %v135_v40 }
  0xcc   :  { %11021 = vmatmul.mubr.msk.f32.gmra.mrb[96].mxu0 %vm194_vm1, %v136_v41 }
  0xcd   :  { %11023 = vmatprep.mubr.msk.f32.mxu0 %vm194_vm1, %v137_v42 }
  0xd0   :  { %11024 = vmatmul.mubr.msk.f32.gmra.mrb[98].mxu0 %vm194_vm1, %v138_v43 }
  0xd1   :  { %11026 = vmatprep.mubr.msk.f32.mxu0 %vm194_vm1, %v139_v44 }
  0xd4   :  { %11027 = vmatmul.mubr.msk.f32.gmra.mrb[100].mxu0 %vm194_vm1, %v140_v45  ;;  %v158_v45 = vld [vmem:[%s14900_s0 + $0x3b8] sm:$0xff] }
  0xd5   :  { %11029 = vmatprep.mubr.msk.f32.mxu0 %vm194_vm1, %v141_v46 }
  0xd8   :  { %11030 = vmatmul.mubr.msk.f32.gmra.mrb[102].mxu0 %vm194_vm1, %v142_v47  ;;  %v159_v47 = vld [vmem:[%s14900_s0 + $0x3c0] sm:$0xff] }
  0xd9   :  { %11032 = vmatprep.mubr.msk.f32.mxu0 %vm194_vm1, %v143_v48 }
  0xdc   :  { %11033 = vmatmul.mubr.msk.f32.gmra.mrb[104].mxu0 %vm194_vm1, %v144_v49 }
  0xdd   :  { %11035 = vmatprep.mubr.msk.f32.mxu0 %vm194_vm1, %v145_v50 }
  0xdf   :  { %v10878_v54 = vpop.f32.mrb[0].mxu0 }
  0xe0   :  { %v703_v55 = vadd.f32 %v10878_v54, %v12933_v51  ;;  %v697_v56 = vpop.f32.mrb[1].mxu0  ;;  %11036 = vmatmul.mubr.msk.f32.gmra.mrb[106].mxu0 %vm194_vm1, %v146_v52 }
  0xe1   :  { %v698_v57 = vadd.f32 %v12933_v51, %v697_v56  ;;  %11038 = vmatprep.mubr.msk.f32.mxu0 %vm194_vm1, %v147_v53 }
  0xe2   :  { %v1417_v59 = vmax.f32 %v703_v55, 0.0 }
  0xe3   :  { %v1416_v61 = vmax.f32 %v698_v57, 0.0  ;;  %v10881_v62 = vpop.f32.mrb[2].mxu0  ;;  %v160_v57 = vld [vmem:[%s14900_s0 + $0x3c8] sm:$0xff] }
  0xe4   :  { %1562 = vst.msk [vmem:[#allocation2 + $0x8] sm:$0xff] %vm1560_vm4, %v1417_v59  ;;  %v713_v63 = vadd.f32 %v10881_v62, %v12933_v51  ;;  %v707_v0 = vpop.f32.mrb[3].mxu0  ;;  %11039 = vmatmul.mubr.msk.f32.gmra.mrb[108].mxu0 %vm194_vm1, %v148_v58  ;;  %v161_v59 = vld [vmem:[%s14900_s0 + $0x3d0] sm:$0xff] }
  0xe5   :  { %1561 = vst.msk [vmem:[#allocation2] sm:$0xff] %vm1560_vm4, %v1416_v61  ;;  %v708_v1 = vadd.f32 %v12933_v51, %v707_v0  ;;  %11041 = vmatprep.mubr.msk.f32.mxu0 %vm194_vm1, %v149_v60 }
  0xe6   :  { %v1419_v3 = vmax.f32 %v713_v63, 0.0 }
  0xe7   :  { %v1418_v5 = vmax.f32 %v708_v1, 0.0  ;;  %v10884_v6 = vpop.f32.mrb[4].mxu0 }
  0xe8   :  { %1564 = vst.msk [vmem:[#allocation2 + $0x18] sm:$0xff] %vm1560_vm4, %v1419_v3  ;;  %v723_v7 = vadd.f32 %v10884_v6, %v12933_v51  ;;  %v717_v8 = vpop.f32.mrb[5].mxu0  ;;  %11042 = vmatmul.mubr.msk.f32.gmra.mrb[110].mxu0 %vm194_vm1, %v150_v2  ;;  %v162_v2 = vld [vmem:[%s14900_s0 + $0x3d8] sm:$0xff] }
  0xe9   :  { %1563 = vst.msk [vmem:[#allocation2 + $0x10] sm:$0xff] %vm1560_vm4, %v1418_v5  ;;  %v718_v9 = vadd.f32 %v12933_v51, %v717_v8  ;;  %11044 = vmatprep.mubr.msk.f32.mxu0 %vm194_vm1, %v151_v4  ;;  %v163_v5 = vld [vmem:[%s14900_s0 + $0x3e0] sm:$0xff] }
  0xea   :  { %v1421_v11 = vmax.f32 %v723_v7, 0.0 }
  0xeb   :  { %v1420_v13 = vmax.f32 %v718_v9, 0.0  ;;  %v10887_v14 = vpop.f32.mrb[6].mxu0 }
  0xec   :  { %1566 = vst.msk [vmem:[#allocation2 + $0x28] sm:$0xff] %vm1560_vm4, %v1421_v11  ;;  %v733_v15 = vadd.f32 %v10887_v14, %v12933_v51  ;;  %v727_v16 = vpop.f32.mrb[7].mxu0  ;;  %11045 = vmatmul.mubr.msk.f32.gmra.mrb[112].mxu0 %vm194_vm1, %v152_v10  ;;  %v1705_v28 = vld [vmem:[#allocation2] ss:$2 sm:$0xff]  ;;  %v1897_v29 = vld [vmem:[#allocation2 + $0x1] ss:$2 sm:$0xff] }
  0xed   :  { %1565 = vst.msk [vmem:[#allocation2 + $0x20] sm:$0xff] %vm1560_vm4, %v1420_v13  ;;  %v728_v17 = vadd.f32 %v12933_v51, %v727_v16  ;;  %11047 = vmatprep.mubr.msk.f32.mxu0 %vm194_vm1, %v153_v12  ;;  %v2088_v41 = vmax.f32 %v1705_v28, %v1897_v29 }
  0xee   :  { %v1423_v19 = vmax.f32 %v733_v15, 0.0 }
  0xef   :  { %v1422_v21 = vmax.f32 %v728_v17, 0.0  ;;  %v10890_v22 = vpop.f32.mrb[8].mxu0 }
  0xf0   :  { %v1707_v23 = vld [vmem:[#allocation2 + $0x10] ss:$2 sm:$0xf]  ;;  %1568 = vst.msk [vmem:[#allocation2 + $0x38] sm:$0xff] %vm1560_vm4, %v1423_v19  ;;  %v743_v24 = vadd.f32 %v10890_v22, %v12933_v51  ;;  %11048 = vmatmul.mubr.msk.f32.gmra.mrb[114].mxu0 %vm194_vm1, %v154_v18  ;;  %v737_v26 = vpop.f32.mrb[9].mxu0  ;;  %v164_v18 = vld [vmem:[%s14900_s0 + $0x3e8] sm:$0xff] }
  0xf1   :  { %v1899_v25 = vld [vmem:[#allocation2 + $0x11] ss:$2 sm:$0xf]  ;;  %1567 = vst.msk [vmem:[#allocation2 + $0x30] sm:$0xff] %vm1560_vm4, %v1422_v21  ;;  %11050 = vmatprep.mubr.msk.f32.mxu0 %vm194_vm1, %v155_v20  ;;  %v738_v31 = vadd.f32 %v12933_v51, %v737_v26 }
  0xf2   :  { %v1425_v30 = vmax.f32 %v743_v24, 0.0  ;;  %v2089_v35 = vmax.f32 %v1707_v23, %v1899_v25  ;;  %v165_v23 = vld [vmem:[%s14900_s0 + $0x3f0] sm:$0xff] }
  0xf3   :  { %v1711_v33 = vld [vmem:[#allocation2 + $0x28] ss:$2 sm:$0xf]  ;;  %v1903_v34 = vld [vmem:[#allocation2 + $0x29] ss:$2 sm:$0xf] }
  0xf4   :  { %v2091_v36 = vmax.f32 %v1711_v33, %v1903_v34  ;;  %v1709_v37 = vld [vmem:[#allocation2 + $0x18] ss:$2 sm:$0xff]  ;;  %v1901_v38 = vld [vmem:[#allocation2 + $0x19] ss:$2 sm:$0xff]  ;;  %1570 = vst.msk [vmem:[#allocation2 + $0x48] sm:$0xff] %vm1560_vm4, %v1425_v30  ;;  %v1424_v39 = vmax.f32 %v738_v31, 0.0  ;;  %11051 = vmatmul.mubr.msk.f32.gmra.mrb[116].mxu0 %vm194_vm1, %v156_v27 }
  0xf5   :  { %v10893_v40 = vpop.f32.mrb[10].mxu0  ;;  %v2090_v42 = vmax.f32 %v1709_v37, %v1901_v38  ;;  %11053 = vmatprep.mubr.msk.f32.mxu0 %vm194_vm1, %v157_v32  ;;  %v166_v31 = vld [vmem:[%s14900_s0 + $0x3f8] sm:$0xff]  ;;  %v167_v33 = vld [vmem:[%s14900_s0 + $0x400] sm:$0xff] }
  0xf6   :  { %v753_v43 = vadd.f32 %v10893_v40, %v12933_v51  ;;  %v747_v44 = vpop.f32.mrb[11].mxu0  ;;  %1569 = vst.msk [vmem:[#allocation2 + $0x40] sm:$0xff] %vm1560_vm4, %v1424_v39  ;;  %v2185_v48 = vmax.f32 %v2089_v35, %v2091_v36  ;;  %v168_v40 = vld [vmem:[%s14900_s0 + $0x408] sm:$0xff] }
  0xf7   :  { %v748_v46 = vadd.f32 %v12933_v51, %v747_v44  ;;  %v10896_v50 = vpop.f32.mrb[12].mxu0  ;;  %v2184_v52 = vmax.f32 %v2088_v41, %v2090_v42 }
  0xf8   :  { %v1427_v49 = vmax.f32 %v753_v43, 0.0  ;;  %v763_v54 = vadd.f32 %v10896_v50, %v12933_v51  ;;  %v757_v55 = vpop.f32.mrb[13].mxu0  ;;  %11054 = vmatmul.mubr.msk.f32.gmra.mrb[118].mxu0 %vm194_vm1, %v158_v45  ;;  %2234 = vst.msk [vmem:[#allocation3 + $0x8] sm:$0xf] %vm2233_vm5, %v2185_v48  ;;  %v1713_v6 = vld [vmem:[#allocation2 + $0x30] ss:$2 sm:$0xff] }
  0xf9   :  { %v1426_v53 = vmax.f32 %v748_v46, 0.0  ;;  %v758_v56 = vadd.f32 %v12933_v51, %v757_v55  ;;  %11056 = vmatprep.mubr.msk.f32.mxu0 %vm194_vm1, %v159_v47  ;;  %2232 = vst.msk [vmem:[#allocation3] sm:$0xff] %vm1560_vm4, %v2184_v52  ;;  %v1905_v7 = vld [vmem:[#allocation2 + $0x31] ss:$2 sm:$0xff] }
  0xfa   :  { %1572 = vst.msk [vmem:[#allocation2 + $0x58] sm:$0xff] %vm1560_vm4, %v1427_v49  ;;  %v1429_v58 = vmax.f32 %v763_v54, 0.0  ;;  %v2092_v19 = vmax.f32 %v1713_v6, %v1905_v7  ;;  %v169_v45 = vld [vmem:[%s14900_s0 + $0x410] sm:$0xff]  ;;  %v172_v6 = vld [vmem:[%s14900_s0 + $0x428] sm:$0xff] }
  0xfb   :  { %1571 = vst.msk [vmem:[#allocation2 + $0x50] sm:$0xff] %vm1560_vm4, %v1426_v53  ;;  %v1428_v60 = vmax.f32 %v758_v56, 0.0  ;;  %v10899_v61 = vpop.f32.mrb[14].mxu0 }
  0xfc   :  { %1574 = vst.msk [vmem:[#allocation2 + $0x68] sm:$0xff] %vm1560_vm4, %v1429_v58  ;;  %v773_v62 = vadd.f32 %v10899_v61, %v12933_v51  ;;  %v767_v63 = vpop.f32.mrb[15].mxu0  ;;  %11057 = vmatmul.mubr.msk.f32.gmra.mrb[120].mxu0 %vm194_vm1, %v160_v57  ;;  %v170_v57 = vld [vmem:[%s14900_s0 + $0x418] sm:$0xff]  ;;  %v171_v61 = vld [vmem:[%s14900_s0 + $0x420] sm:$0xff] }
  0xfd   :  { %v1715_v0 = vld [vmem:[#allocation2 + $0x40] ss:$2 sm:$0xf]  ;;  %1573 = vst.msk [vmem:[#allocation2 + $0x60] sm:$0xff] %vm1560_vm4, %v1428_v60  ;;  %v768_v1 = vadd.f32 %v12933_v51, %v767_v63  ;;  %11059 = vmatprep.mubr.msk.f32.mxu0 %vm194_vm1, %v161_v59 }
  0xfe   :  { %v1907_v3 = vld [vmem:[#allocation2 + $0x41] ss:$2 sm:$0xf]  ;;  %v1431_v4 = vmax.f32 %v773_v62, 0.0 }
  0xff   :  { %v1430_v8 = vmax.f32 %v768_v1, 0.0  ;;  %v10902_v9 = vpop.f32.mrb[16].mxu0  ;;  %v2093_v13 = vmax.f32 %v1715_v0, %v1907_v3 }
 0x100   :  { %1576 = vst.msk [vmem:[#allocation2 + $0x78] sm:$0xff] %vm1560_vm4, %v1431_v4  ;;  %v783_v12 = vadd.f32 %v10902_v9, %v12933_v51  ;;  %11060 = vmatmul.mubr.msk.f32.gmra.mrb[122].mxu0 %vm194_vm1, %v162_v2  ;;  %v777_v17 = vpop.f32.mrb[17].mxu0 }
 0x101   :  { %v1719_v10 = vld [vmem:[#allocation2 + $0x58] ss:$2 sm:$0xf]  ;;  %v1911_v11 = vld [vmem:[#allocation2 + $0x59] ss:$2 sm:$0xf]  ;;  %11062 = vmatprep.mubr.msk.f32.mxu0 %vm194_vm1, %v163_v5  ;;  %v778_v22 = vadd.f32 %v12933_v51, %v777_v17 }
 0x102   :  { %v2095_v14 = vmax.f32 %v1719_v10, %v1911_v11  ;;  %v1717_v15 = vld [vmem:[#allocation2 + $0x48] ss:$2 sm:$0xff]  ;;  %v1909_v16 = vld [vmem:[#allocation2 + $0x49] ss:$2 sm:$0xff]  ;;  %1575 = vst.msk [vmem:[#allocation2 + $0x70] sm:$0xff] %vm1560_vm4, %v1430_v8  ;;  %v1433_v21 = vmax.f32 %v783_v12, 0.0 }
 0x103   :  { %v2094_v20 = vmax.f32 %v1717_v15, %v1909_v16  ;;  %v10905_v25 = vpop.f32.mrb[18].mxu0  ;;  %v1432_v27 = vmax.f32 %v778_v22, 0.0  ;;  %v173_v8 = vld [vmem:[%s14900_s0 + $0x430] sm:$0xff]  ;;  %v174_v15 = vld [vmem:[%s14900_s0 + $0x438] sm:$0xff] }
 0x104   :  { %v2187_v24 = vmax.f32 %v2093_v13, %v2095_v14  ;;  %1578 = vst.msk [vmem:[#allocation2 + $0x88] sm:$0xff] %vm1560_vm4, %v1433_v21  ;;  %v793_v28 = vadd.f32 %v10905_v25, %v12933_v51  ;;  %v787_v29 = vpop.f32.mrb[19].mxu0  ;;  %11063 = vmatmul.mubr.msk.f32.gmra.mrb[124].mxu0 %vm194_vm1, %v164_v18  ;;  %v1721_v41 = vld [vmem:[#allocation2 + $0x60] ss:$2 sm:$0xff]  ;;  %v1913_v42 = vld [vmem:[#allocation2 + $0x61] ss:$2 sm:$0xff] }
 0x105   :  { %v2186_v26 = vmax.f32 %v2092_v19, %v2094_v20  ;;  %v788_v30 = vadd.f32 %v12933_v51, %v787_v29  ;;  %11065 = vmatprep.mubr.msk.f32.mxu0 %vm194_vm1, %v165_v23  ;;  %1577 = vst.msk [vmem:[#allocation2 + $0x80] sm:$0xff] %vm1560_vm4, %v1432_v27  ;;  %v2096_v58 = vmax.f32 %v1721_v41, %v1913_v42  ;;  %v175_v18 = vld [vmem:[%s14900_s0 + $0x440] sm:$0xff] }
 0x106   :  { %2236 = vst.msk [vmem:[#allocation3 + $0x18] sm:$0xf] %vm2233_vm5, %v2187_v24  ;;  %v1435_v32 = vmax.f32 %v793_v28, 0.0 }
 0x107   :  { %2235 = vst.msk [vmem:[#allocation3 + $0x10] sm:$0xff] %vm1560_vm4, %v2186_v26  ;;  %v1434_v34 = vmax.f32 %v788_v30, 0.0  ;;  %v10908_v35 = vpop.f32.mrb[20].mxu0 }
 0x108   :  { %1580 = vst.msk [vmem:[#allocation2 + $0x98] sm:$0xff] %vm1560_vm4, %v1435_v32  ;;  %v803_v37 = vadd.f32 %v10908_v35, %v12933_v51  ;;  %11066 = vmatmul.mubr.msk.f32.gmra.mrb[126].mxu0 %vm194_vm1, %v166_v31  ;;  %v797_v39 = vpop.f32.mrb[21].mxu0  ;;  %v176_v31 = vld [vmem:[%s14900_s0 + $0x448] sm:$0xff] }
 0x109   :  { %v1723_v36 = vld [vmem:[#allocation2 + $0x70] ss:$2 sm:$0xf]  ;;  %v1915_v38 = vld [vmem:[#allocation2 + $0x71] ss:$2 sm:$0xf]  ;;  %11068 = vmatprep.mubr.msk.f32.mxu0 %vm194_vm1, %v167_v33  ;;  %v798_v44 = vadd.f32 %v12933_v51, %v797_v39 }
 0x10a   :  { %1579 = vst.msk [vmem:[#allocation2 + $0x90] sm:$0xff] %vm1560_vm4, %v1434_v34  ;;  %v1437_v43 = vmax.f32 %v803_v37, 0.0  ;;  %v2097_v48 = vmax.f32 %v1723_v36, %v1915_v38  ;;  %v177_v36 = vld [vmem:[%s14900_s0 + $0x450] sm:$0xff] }
 0x10b   :  { %v1727_v46 = vld [vmem:[#allocation2 + $0x88] ss:$2 sm:$0xf]  ;;  %v1919_v47 = vld [vmem:[#allocation2 + $0x89] ss:$2 sm:$0xf] }
 0x10c   :  { %v2099_v49 = vmax.f32 %v1727_v46, %v1919_v47  ;;  %1582 = vst.msk [vmem:[#allocation2 + $0xa8] sm:$0xff] %vm1560_vm4, %v1437_v43  ;;  %v1436_v50 = vmax.f32 %v798_v44, 0.0  ;;  %v10911_v52 = vpop.f32.mrb[22].mxu0  ;;  %11069 = vmatmul.mubr.msk.f32.gmra.mrb[128].mxu0 %vm194_vm1, %v168_v40  ;;  %v1725_v53 = vld [vmem:[#allocation2 + $0x78] ss:$2 sm:$0xff] }
 0x10d   :  { %v1917_v54 = vld [vmem:[#allocation2 + $0x79] ss:$2 sm:$0xff]  ;;  %v813_v55 = vadd.f32 %v10911_v52, %v12933_v51  ;;  %v807_v56 = vpop.f32.mrb[23].mxu0  ;;  %11071 = vmatprep.mubr.msk.f32.mxu0 %vm194_vm1, %v169_v45 }
 0x10e   :  { %v2098_v59 = vmax.f32 %v1725_v53, %v1917_v54  ;;  %1581 = vst.msk [vmem:[#allocation2 + $0xa0] sm:$0xff] %vm1560_vm4, %v1436_v50  ;;  %v808_v60 = vadd.f32 %v12933_v51, %v807_v56  ;;  %v2189_v62 = vmax.f32 %v2097_v48, %v2099_v49  ;;  %v178_v44 = vld [vmem:[%s14900_s0 + $0x458] sm:$0xff]  ;;  %v179_v46 = vld [vmem:[%s14900_s0 + $0x460] sm:$0xff]  ;;  %v180_v54 = vld [vmem:[%s14900_s0 + $0x468] sm:$0xff] }
 0x10f   :  { %v1439_v63 = vmax.f32 %v813_v55, 0.0  ;;  %v10914_v0 = vpop.f32.mrb[24].mxu0 }
 0x110   :  { %v1438_v1 = vmax.f32 %v808_v60, 0.0  ;;  %v823_v2 = vadd.f32 %v10914_v0, %v12933_v51  ;;  %v817_v3 = vpop.f32.mrb[25].mxu0  ;;  %11072 = vmatmul.mubr.msk.f32.gmra.mrb[130].mxu0 %vm194_vm1, %v170_v57  ;;  %v2188_v4 = vmax.f32 %v2096_v58, %v2098_v59  ;;  %2238 = vst.msk [vmem:[#allocation3 + $0x28] sm:$0xf] %vm2233_vm5, %v2189_v62  ;;  %v181_v59 = vld [vmem:[%s14900_s0 + $0x470] sm:$0xff] }
 0x111   :  { %1584 = vst.msk [vmem:[#allocation2 + $0xb8] sm:$0xff] %vm1560_vm4, %v1439_v63  ;;  %v818_v5 = vadd.f32 %v12933_v51, %v817_v3  ;;  %11074 = vmatprep.mubr.msk.f32.mxu0 %vm194_vm1, %v171_v61  ;;  %v1729_v19 = vld [vmem:[#allocation2 + $0x90] ss:$2 sm:$0xff]  ;;  %v1921_v20 = vld [vmem:[#allocation2 + $0x91] ss:$2 sm:$0xff] }
 0x112   :  { %1583 = vst.msk [vmem:[#allocation2 + $0xb0] sm:$0xff] %vm1560_vm4, %v1438_v1  ;;  %v1441_v7 = vmax.f32 %v823_v2, 0.0  ;;  %2237 = vst.msk [vmem:[#allocation3 + $0x20] sm:$0xff] %vm1560_vm4, %v2188_v4  ;;  %v2100_v32 = vmax.f32 %v1729_v19, %v1921_v20  ;;  %v182_v2 = vld [vmem:[%s14900_s0 + $0x478] sm:$0xff] }
 0x113   :  { %v1440_v9 = vmax.f32 %v818_v5, 0.0  ;;  %v10917_v10 = vpop.f32.mrb[26].mxu0 }
 0x114   :  { %1586 = vst.msk [vmem:[#allocation2 + $0xc8] sm:$0xff] %vm1560_vm4, %v1441_v7  ;;  %v833_v11 = vadd.f32 %v10917_v10, %v12933_v51  ;;  %v827_v12 = vpop.f32.mrb[27].mxu0  ;;  %11075 = vmatmul.mubr.msk.f32.gmra.mrb[132].mxu0 %vm194_vm1, %v172_v6 }
 0x115   :  { %v1731_v13 = vld [vmem:[#allocation2 + $0xa0] ss:$2 sm:$0xf]  ;;  %1585 = vst.msk [vmem:[#allocation2 + $0xc0] sm:$0xff] %vm1560_vm4, %v1440_v9  ;;  %v828_v14 = vadd.f32 %v12933_v51, %v827_v12  ;;  %11077 = vmatprep.mubr.msk.f32.mxu0 %vm194_vm1, %v173_v8 }
 0x116   :  { %v1923_v16 = vld [vmem:[#allocation2 + $0xa1] ss:$2 sm:$0xf]  ;;  %v1443_v17 = vmax.f32 %v833_v11, 0.0 }
 0x117   :  { %v1442_v21 = vmax.f32 %v828_v14, 0.0  ;;  %v10920_v22 = vpop.f32.mrb[28].mxu0  ;;  %v2101_v26 = vmax.f32 %v1731_v13, %v1923_v16 }
 0x118   :  { %v1735_v23 = vld [vmem:[#allocation2 + $0xb8] ss:$2 sm:$0xf]  ;;  %v1927_v24 = vld [vmem:[#allocation2 + $0xb9] ss:$2 sm:$0xf]  ;;  %v843_v25 = vadd.f32 %v10920_v22, %v12933_v51  ;;  %11078 = vmatmul.mubr.msk.f32.gmra.mrb[134].mxu0 %vm194_vm1, %v174_v15 }
 0x119   :  { %1588 = vst.msk [vmem:[#allocation2 + $0xd8] sm:$0xff] %vm1560_vm4, %v1443_v17  ;;  %v2103_v27 = vmax.f32 %v1735_v23, %v1927_v24  ;;  %v1733_v28 = vld [vmem:[#allocation2 + $0xa8] ss:$2 sm:$0xff]  ;;  %v1925_v29 = vld [vmem:[#allocation2 + $0xa9] ss:$2 sm:$0xff]  ;;  %1587 = vst.msk [vmem:[#allocation2 + $0xd0] sm:$0xff] %vm1560_vm4, %v1442_v21  ;;  %11080 = vmatprep.mubr.msk.f32.mxu0 %vm194_vm1, %v175_v18 }
 0x11a   :  { %v837_v30 = vpop.f32.mrb[29].mxu0  ;;  %v2102_v33 = vmax.f32 %v1733_v28, %v1925_v29  ;;  %v1445_v34 = vmax.f32 %v843_v25, 0.0  ;;  %v2298_v17 = vld [vmem:[#allocation3 + $0x1] sm:$0xff]  ;;  %v2299_v23 = vld [vmem:[#allocation3 + $0x11] sm:$0xff] }
 0x11b   :  { %v838_v35 = vadd.f32 %v12933_v51, %v837_v30  ;;  %v10923_v37 = vpop.f32.mrb[30].mxu0  ;;  %v2191_v38 = vmax.f32 %v2101_v26, %v2103_v27  ;;  %v2300_v26 = vld [vmem:[#allocation3 + $0x21] sm:$0xff] }
 0x11c   :  { %1590 = vst.msk [vmem:[#allocation2 + $0xe8] sm:$0xff] %vm1560_vm4, %v1445_v34  ;;  %v853_v40 = vadd.f32 %v10923_v37, %v12933_v51  ;;  %v847_v41 = vpop.f32.mrb[31].mxu0  ;;  %11081 = vmatmul.mubr.msk.f32.gmra.mrb[136].mxu0 %vm194_vm1, %v176_v31  ;;  %v2190_v42 = vmax.f32 %v2100_v32, %v2102_v33  ;;  %v1737_v55 = vld [vmem:[#allocation2 + $0xc0] ss:$2 sm:$0xff]  ;;  %v1929_v56 = vld [vmem:[#allocation2 + $0xc1] ss:$2 sm:$0xff] }
 0x11d   :  { %v1444_v39 = vmax.f32 %v838_v35, 0.0  ;;  %v848_v43 = vadd.f32 %v12933_v51, %v847_v41  ;;  %11083 = vmatprep.mubr.msk.f32.mxu0 %vm194_vm1, %v177_v36  ;;  %2240 = vst.msk [vmem:[#allocation3 + $0x38] sm:$0xf] %vm2233_vm5, %v2191_v38  ;;  %v2104_v8 = vmax.f32 %v1737_v55, %v1929_v56 }
 0x11e   :  { %v1447_v45 = vmax.f32 %v853_v40, 0.0  ;;  %2239 = vst.msk [vmem:[#allocation3 + $0x30] sm:$0xff] %vm1560_vm4, %v2190_v42 }
 0x11f   :  { %1589 = vst.msk [vmem:[#allocation2 + $0xe0] sm:$0xff] %vm1560_vm4, %v1444_v39  ;;  %v1446_v47 = vmax.f32 %v848_v43, 0.0  ;;  %v10926_v48 = vpop.f32.mrb[32].mxu0 }
 0x120   :  { %v1739_v49 = vld [vmem:[#allocation2 + $0xd0] ss:$2 sm:$0xf]  ;;  %1592 = vst.msk [vmem:[#allocation2 + $0xf8] sm:$0xff] %vm1560_vm4, %v1447_v45  ;;  %v863_v50 = vadd.f32 %v10926_v48, %v12933_v51  ;;  %11084 = vmatmul.mubr.msk.f32.gmra.mrb[138].mxu0 %vm194_vm1, %v178_v44  ;;  %v857_v53 = vpop.f32.mrb[33].mxu0 }
 0x121   :  { %v1931_v52 = vld [vmem:[#allocation2 + $0xd1] ss:$2 sm:$0xf]  ;;  %1591 = vst.msk [vmem:[#allocation2 + $0xf0] sm:$0xff] %vm1560_vm4, %v1446_v47  ;;  %11086 = vmatprep.mubr.msk.f32.mxu0 %vm194_vm1, %v179_v46  ;;  %v858_v58 = vadd.f32 %v12933_v51, %v857_v53 }
 0x122   :  { %v1449_v57 = vmax.f32 %v863_v50, 0.0  ;;  %v2105_v62 = vmax.f32 %v1739_v49, %v1931_v52 }
 0x123   :  { %v1743_v60 = vld [vmem:[#allocation2 + $0xe8] ss:$2 sm:$0xf]  ;;  %v1935_v61 = vld [vmem:[#allocation2 + $0xe9] ss:$2 sm:$0xf] }
 0x124   :  { %v2107_v63 = vmax.f32 %v1743_v60, %v1935_v61  ;;  %1594 = vst.msk [vmem:[#allocation2 + $0x108] sm:$0xff] %vm1560_vm4, %v1449_v57  ;;  %v1448_v0 = vmax.f32 %v858_v58, 0.0  ;;  %v10929_v1 = vpop.f32.mrb[34].mxu0  ;;  %11087 = vmatmul.mubr.msk.f32.gmra.mrb[140].mxu0 %vm194_vm1, %v180_v54 }
 0x125   :  { %v873_v5 = vadd.f32 %v10929_v1, %v12933_v51  ;;  %v867_v6 = vpop.f32.mrb[35].mxu0  ;;  %v3613_v7 = vld [vmem:[#allocation3 + $0x31] sm:$0xff]  ;;  %11089 = vmatprep.mubr.msk.f32.mxu0 %vm194_vm1, %v181_v59 }
 0x126   :  { %v1741_v3 = vld [vmem:[#allocation2 + $0xd8] ss:$2 sm:$0xff]  ;;  %v1933_v4 = vld [vmem:[#allocation2 + $0xd9] ss:$2 sm:$0xff]  ;;  %1593 = vst.msk [vmem:[#allocation2 + $0x100] sm:$0xff] %vm1560_vm4, %v1448_v0  ;;  %v868_v10 = vadd.f32 %v12933_v51, %v867_v6  ;;  %11253 = vmatprep.mubr.msk.f32.mxu1 %vm1560_vm4, %v3613_v7  ;;  %v2193_v11 = vmax.f32 %v2105_v62, %v2107_v63 }
 0x127   :  { %v2106_v9 = vmax.f32 %v1741_v3, %v1933_v4  ;;  %v1451_v12 = vmax.f32 %v873_v5, 0.0  ;;  %v10932_v13 = vpop.f32.mrb[36].mxu0 }
 0x128   :  { %v1450_v14 = vmax.f32 %v868_v10, 0.0  ;;  %v883_v15 = vadd.f32 %v10932_v13, %v12933_v51  ;;  %v877_v16 = vpop.f32.mrb[37].mxu0  ;;  %11090 = vmatmul.mubr.msk.f32.gmra.mrb[142].mxu0 %vm194_vm1, %v182_v2  ;;  %2242 = vst.msk [vmem:[#allocation3 + $0x48] sm:$0xf] %vm2233_vm5, %v2193_v11  ;;  %v1745_v31 = vld [vmem:[#allocation2 + $0xf0] ss:$2 sm:$0xff] }
 0x129   :  { %v2192_v18 = vmax.f32 %v2104_v8, %v2106_v9  ;;  %1596 = vst.msk [vmem:[#allocation2 + $0x118] sm:$0xff] %vm1560_vm4, %v1451_v12  ;;  %v878_v19 = vadd.f32 %v12933_v51, %v877_v16  ;;  %11094 = vmatprep.mubr.msk.f32.mxu0 %vm1560_vm4, %v2298_v17  ;;  %v1937_v32 = vld [vmem:[#allocation2 + $0xf1] ss:$2 sm:$0xff] }
 0x12a   :  { %1595 = vst.msk [vmem:[#allocation2 + $0x110] sm:$0xff] %vm1560_vm4, %v1450_v14  ;;  %v1453_v20 = vmax.f32 %v883_v15, 0.0  ;;  %v2108_v44 = vmax.f32 %v1745_v31, %v1937_v32 }
 0x12b   :  { %2241 = vst.msk [vmem:[#allocation3 + $0x40] sm:$0xff] %vm1560_vm4, %v2192_v18  ;;  %v1452_v21 = vmax.f32 %v878_v19, 0.0  ;;  %v10935_v22 = vpop.f32.mrb[38].mxu0 }
 0x12c   :  { %1598 = vst.msk [vmem:[#allocation2 + $0x128] sm:$0xff] %vm1560_vm4, %v1453_v20  ;;  %v893_v24 = vadd.f32 %v10935_v22, %v12933_v51  ;;  %v887_v25 = vpop.f32.mrb[39].mxu0  ;;  %11095 = vmatmul.mubr.msk.f32.vlgmr.msra.gmra.mrb[144].mxu0 %vm1560_vm4, %v2299_v23 }
 0x12d   :  { %v1747_v27 = vld [vmem:[#allocation2 + $0x100] ss:$2 sm:$0xf]  ;;  %1597 = vst.msk [vmem:[#allocation2 + $0x120] sm:$0xff] %vm1560_vm4, %v1452_v21  ;;  %v888_v28 = vadd.f32 %v12933_v51, %v887_v25  ;;  %11097 = vmatprep.mubr.msk.f32.mxu0 %vm1560_vm4, %v2300_v26 }
 0x12e   :  { %v1939_v29 = vld [vmem:[#allocation2 + $0x101] ss:$2 sm:$0xf]  ;;  %v1455_v30 = vmax.f32 %v893_v24, 0.0 }
 0x12f   :  { %v1454_v33 = vmax.f32 %v888_v28, 0.0  ;;  %v10938_v34 = vpop.f32.mrb[40].mxu0  ;;  %v2109_v38 = vmax.f32 %v1747_v27, %v1939_v29 }
 0x130   :  { %v1751_v35 = vld [vmem:[#allocation2 + $0x118] ss:$2 sm:$0xf]  ;;  %v1943_v36 = vld [vmem:[#allocation2 + $0x119] ss:$2 sm:$0xf]  ;;  %v903_v37 = vadd.f32 %v10938_v34, %v12933_v51  ;;  %11098 = vmatmul.mubr.msk.f32.gmra.mrb[146].mxu0 %vm1560_vm4, %v3613_v7 }
 0x131   :  { %1600 = vst.msk [vmem:[#allocation2 + $0x138] sm:$0xff] %vm1560_vm4, %v1455_v30  ;;  %v2111_v39 = vmax.f32 %v1751_v35, %v1943_v36  ;;  %v1749_v40 = vld [vmem:[#allocation2 + $0x108] ss:$2 sm:$0xff]  ;;  %v1941_v41 = vld [vmem:[#allocation2 + $0x109] ss:$2 sm:$0xff]  ;;  %1599 = vst.msk [vmem:[#allocation2 + $0x130] sm:$0xff] %vm1560_vm4, %v1454_v33 }
 0x132   :  { %v897_v42 = vpop.f32.mrb[41].mxu0  ;;  %v2302_v43 = vld [vmem:[#allocation3 + $0x41] sm:$0xff]  ;;  %v2110_v45 = vmax.f32 %v1749_v40, %v1941_v41  ;;  %v1457_v46 = vmax.f32 %v903_v37, 0.0 }
 0x133   :  { %v898_v47 = vadd.f32 %v12933_v51, %v897_v42  ;;  %11100 = vmatprep.mubr.msk.f32.mxu0 %vm1560_vm4, %v2302_v43  ;;  %11254 = vmatmul.mubr.msk.f32.vlgmr.msra.gmra.mrb[0].mxu1 %vm1560_vm4, %v2302_v43  ;;  %v10941_v48 = vpop.f32.mrb[42].mxu0  ;;  %v2195_v49 = vmax.f32 %v2109_v38, %v2111_v39 }
 0x134   :  { %1602 = vst.msk [vmem:[#allocation2 + $0x148] sm:$0xff] %vm1560_vm4, %v1457_v46  ;;  %v913_v52 = vadd.f32 %v10941_v48, %v12933_v51  ;;  %v907_v53 = vpop.f32.mrb[43].mxu0  ;;  %v2194_v54 = vmax.f32 %v2108_v44, %v2110_v45  ;;  %v1753_v63 = vld [vmem:[#allocation2 + $0x120] ss:$2 sm:$0xff]  ;;  %v1945_v0 = vld [vmem:[#allocation2 + $0x121] ss:$2 sm:$0xff] }
 0x135   :  { %v1456_v50 = vmax.f32 %v898_v47, 0.0  ;;  %v908_v55 = vadd.f32 %v12933_v51, %v907_v53  ;;  %2244 = vst.msk [vmem:[#allocation3 + $0x58] sm:$0xf] %vm2233_vm5, %v2195_v49  ;;  %v2112_v9 = vmax.f32 %v1753_v63, %v1945_v0 }
 0x136   :  { %v1459_v56 = vmax.f32 %v913_v52, 0.0  ;;  %2243 = vst.msk [vmem:[#allocation3 + $0x50] sm:$0xff] %vm1560_vm4, %v2194_v54 }
 0x137   :  { %1601 = vst.msk [vmem:[#allocation2 + $0x140] sm:$0xff] %vm1560_vm4, %v1456_v50  ;;  %v1458_v57 = vmax.f32 %v908_v55, 0.0  ;;  %v10944_v58 = vpop.f32.mrb[44].mxu0 }
 0x138   :  { %v1755_v59 = vld [vmem:[#allocation2 + $0x130] ss:$2 sm:$0xf]  ;;  %1604 = vst.msk [vmem:[#allocation2 + $0x158] sm:$0xff] %vm1560_vm4, %v1459_v56  ;;  %v923_v60 = vadd.f32 %v10944_v58, %v12933_v51  ;;  %v917_v62 = vpop.f32.mrb[45].mxu0 }
 0x139   :  { %v1947_v61 = vld [vmem:[#allocation2 + $0x131] ss:$2 sm:$0xf]  ;;  %1603 = vst.msk [vmem:[#allocation2 + $0x150] sm:$0xff] %vm1560_vm4, %v1458_v57  ;;  %v918_v2 = vadd.f32 %v12933_v51, %v917_v62 }
 0x13a   :  { %v1461_v1 = vmax.f32 %v923_v60, 0.0  ;;  %v2113_v5 = vmax.f32 %v1755_v59, %v1947_v61 }
 0x13b   :  { %v1759_v3 = vld [vmem:[#allocation2 + $0x148] ss:$2 sm:$0xf]  ;;  %v1951_v4 = vld [vmem:[#allocation2 + $0x149] ss:$2 sm:$0xf] }
 0x13c   :  { %v2115_v6 = vmax.f32 %v1759_v3, %v1951_v4  ;;  %1606 = vst.msk [vmem:[#allocation2 + $0x168] sm:$0xff] %vm1560_vm4, %v1461_v1  ;;  %v1460_v7 = vmax.f32 %v918_v2, 0.0  ;;  %v10947_v8 = vpop.f32.mrb[46].mxu0 }
 0x13d   :  { %v933_v12 = vadd.f32 %v10947_v8, %v12933_v51  ;;  %v927_v13 = vpop.f32.mrb[47].mxu0  ;;  %v2303_v14 = vld [vmem:[#allocation3 + $0x51] sm:$0xff] }
 0x13e   :  { %v1757_v10 = vld [vmem:[#allocation2 + $0x138] ss:$2 sm:$0xff]  ;;  %v1949_v11 = vld [vmem:[#allocation2 + $0x139] ss:$2 sm:$0xff]  ;;  %1605 = vst.msk [vmem:[#allocation2 + $0x160] sm:$0xff] %vm1560_vm4, %v1460_v7  ;;  %v928_v16 = vadd.f32 %v12933_v51, %v927_v13  ;;  %11101 = vmatmul.mubr.msk.f32.gmra.mrb[148].mxu0 %vm1560_vm4, %v2303_v14  ;;  %11256 = vmatprep.mubr.msk.f32.mxu1 %vm1560_vm4, %v2303_v14  ;;  %v2197_v17 = vmax.f32 %v2113_v5, %v2115_v6 }
 0x13f   :  { %v2114_v15 = vmax.f32 %v1757_v10, %v1949_v11  ;;  %v1463_v18 = vmax.f32 %v933_v12, 0.0  ;;  %v10950_v19 = vpop.f32.mrb[48].mxu0 }
 0x140   :  { %v1462_v20 = vmax.f32 %v928_v16, 0.0  ;;  %v943_v21 = vadd.f32 %v10950_v19, %v12933_v51  ;;  %v937_v22 = vpop.f32.mrb[49].mxu0  ;;  %2246 = vst.msk [vmem:[#allocation3 + $0x68] sm:$0xf] %vm2233_vm5, %v2197_v17  ;;  %v1761_v34 = vld [vmem:[#allocation2 + $0x150] ss:$2 sm:$0xff] }
 0x141   :  { %v2196_v23 = vmax.f32 %v2112_v9, %v2114_v15  ;;  %1608 = vst.msk [vmem:[#allocation2 + $0x178] sm:$0xff] %vm1560_vm4, %v1463_v18  ;;  %v938_v24 = vadd.f32 %v12933_v51, %v937_v22  ;;  %v1953_v35 = vld [vmem:[#allocation2 + $0x151] ss:$2 sm:$0xff] }
 0x142   :  { %1607 = vst.msk [vmem:[#allocation2 + $0x170] sm:$0xff] %vm1560_vm4, %v1462_v20  ;;  %v1465_v25 = vmax.f32 %v943_v21, 0.0  ;;  %v2116_v47 = vmax.f32 %v1761_v34, %v1953_v35 }
 0x143   :  { %2245 = vst.msk [vmem:[#allocation3 + $0x60] sm:$0xff] %vm1560_vm4, %v2196_v23  ;;  %v1464_v26 = vmax.f32 %v938_v24, 0.0  ;;  %v10953_v27 = vpop.f32.mrb[50].mxu0 }
 0x144   :  { %1610 = vst.msk [vmem:[#allocation2 + $0x188] sm:$0xff] %vm1560_vm4, %v1465_v25  ;;  %v953_v28 = vadd.f32 %v10953_v27, %v12933_v51  ;;  %v947_v29 = vpop.f32.mrb[51].mxu0 }
 0x145   :  { %v1763_v30 = vld [vmem:[#allocation2 + $0x160] ss:$2 sm:$0xf]  ;;  %1609 = vst.msk [vmem:[#allocation2 + $0x180] sm:$0xff] %vm1560_vm4, %v1464_v26  ;;  %v948_v31 = vadd.f32 %v12933_v51, %v947_v29 }
 0x146   :  { %v1955_v32 = vld [vmem:[#allocation2 + $0x161] ss:$2 sm:$0xf]  ;;  %v1467_v33 = vmax.f32 %v953_v28, 0.0 }
 0x147   :  { %v1466_v36 = vmax.f32 %v948_v31, 0.0  ;;  %v10956_v37 = vpop.f32.mrb[52].mxu0  ;;  %v2117_v41 = vmax.f32 %v1763_v30, %v1955_v32 }
 0x148   :  { %v1767_v38 = vld [vmem:[#allocation2 + $0x178] ss:$2 sm:$0xf]  ;;  %v1959_v39 = vld [vmem:[#allocation2 + $0x179] ss:$2 sm:$0xf]  ;;  %v963_v40 = vadd.f32 %v10956_v37, %v12933_v51 }
 0x149   :  { %1612 = vst.msk [vmem:[#allocation2 + $0x198] sm:$0xff] %vm1560_vm4, %v1467_v33  ;;  %v2119_v42 = vmax.f32 %v1767_v38, %v1959_v39  ;;  %v1765_v43 = vld [vmem:[#allocation2 + $0x168] ss:$2 sm:$0xff]  ;;  %v1957_v44 = vld [vmem:[#allocation2 + $0x169] ss:$2 sm:$0xff]  ;;  %1611 = vst.msk [vmem:[#allocation2 + $0x190] sm:$0xff] %vm1560_vm4, %v1466_v36 }
 0x14a   :  { %v957_v45 = vpop.f32.mrb[53].mxu0  ;;  %v2304_v46 = vld [vmem:[#allocation3 + $0x61] sm:$0xff]  ;;  %v2118_v48 = vmax.f32 %v1765_v43, %v1957_v44  ;;  %v1469_v49 = vmax.f32 %v963_v40, 0.0 }
 0x14b   :  { %v958_v50 = vadd.f32 %v12933_v51, %v957_v45  ;;  %11103 = vmatprep.mubr.msk.f32.mxu0 %vm1560_vm4, %v2304_v46  ;;  %11257 = vmatmul.mubr.msk.f32.gmra.mrb[2].mxu1 %vm1560_vm4, %v2304_v46  ;;  %v10959_v52 = vpop.f32.mrb[54].mxu0  ;;  %v2199_v53 = vmax.f32 %v2117_v41, %v2119_v42 }
 0x14c   :  { %1614 = vst.msk [vmem:[#allocation2 + $0x1a8] sm:$0xff] %vm1560_vm4, %v1469_v49  ;;  %v973_v55 = vadd.f32 %v10959_v52, %v12933_v51  ;;  %v967_v56 = vpop.f32.mrb[55].mxu0  ;;  %v2198_v57 = vmax.f32 %v2116_v47, %v2118_v48  ;;  %v1769_v2 = vld [vmem:[#allocation2 + $0x180] ss:$2 sm:$0xff]  ;;  %v1961_v3 = vld [vmem:[#allocation2 + $0x181] ss:$2 sm:$0xff] }
 0x14d   :  { %v1468_v54 = vmax.f32 %v958_v50, 0.0  ;;  %v968_v58 = vadd.f32 %v12933_v51, %v967_v56  ;;  %2248 = vst.msk [vmem:[#allocation3 + $0x78] sm:$0xf] %vm2233_vm5, %v2199_v53  ;;  %v2120_v12 = vmax.f32 %v1769_v2, %v1961_v3  ;;  %v2297_v2 = vld [vmem:[%s14903_s3] sm:$0xff] }
 0x14e   :  { %v1471_v59 = vmax.f32 %v973_v55, 0.0  ;;  %2247 = vst.msk [vmem:[#allocation3 + $0x70] sm:$0xff] %vm1560_vm4, %v2198_v57  ;;  %11118 = vmatprep.subr.mxu0 %v2297_v2 }
 0x14f   :  { %1613 = vst.msk [vmem:[#allocation2 + $0x1a0] sm:$0xff] %vm1560_vm4, %v1468_v54  ;;  %v1470_v60 = vmax.f32 %v968_v58, 0.0  ;;  %v10962_v61 = vpop.f32.mrb[56].mxu0  ;;  %v13247_v54 = vld [vmem:[%s14902_s2] ss:$0 sm:$0xff]  ;;  %11119 = vmatpush3.msra.mxu0 %v2297_v2 }
 0x150   :  { %v1771_v62 = vld [vmem:[#allocation2 + $0x190] ss:$2 sm:$0xf]  ;;  %1616 = vst.msk [vmem:[#allocation2 + $0x1b8] sm:$0xff] %vm1560_vm4, %v1471_v59  ;;  %v983_v63 = vadd.f32 %v10962_v61, %v12933_v51  ;;  %v977_v1 = vpop.f32.mrb[57].mxu0 }
 0x151   :  { %v1963_v0 = vld [vmem:[#allocation2 + $0x191] ss:$2 sm:$0xf]  ;;  %1615 = vst.msk [vmem:[#allocation2 + $0x1b0] sm:$0xff] %vm1560_vm4, %v1470_v60  ;;  %v978_v5 = vadd.f32 %v12933_v51, %v977_v1 }
 0x152   :  { %v1473_v4 = vmax.f32 %v983_v63, 0.0  ;;  %v2121_v8 = vmax.f32 %v1771_v62, %v1963_v0  ;;  %v9864_v63 = vld [vmem:[%s14903_s3 + $0x38] sm:$0xff] }
 0x153   :  { %v1775_v6 = vld [vmem:[#allocation2 + $0x1a8] ss:$2 sm:$0xf]  ;;  %v1967_v7 = vld [vmem:[#allocation2 + $0x1a9] ss:$2 sm:$0xf]  ;;  %11274 = vmatprep.subr.mxu1 %v9864_v63 }
 0x154   :  { %v2123_v9 = vmax.f32 %v1775_v6, %v1967_v7  ;;  %1618 = vst.msk [vmem:[#allocation2 + $0x1c8] sm:$0xff] %vm1560_vm4, %v1473_v4  ;;  %v1472_v10 = vmax.f32 %v978_v5, 0.0  ;;  %v10965_v11 = vpop.f32.mrb[58].mxu0  ;;  %11275 = vmatpush3.msra.mxu1 %v9864_v63 }
 0x155   :  { %v993_v15 = vadd.f32 %v10965_v11, %v12933_v51  ;;  %v987_v16 = vpop.f32.mrb[59].mxu0  ;;  %v2305_v17 = vld [vmem:[#allocation3 + $0x71] sm:$0xff] }
 0x156   :  { %v1773_v13 = vld [vmem:[#allocation2 + $0x198] ss:$2 sm:$0xff]  ;;  %v1965_v14 = vld [vmem:[#allocation2 + $0x199] ss:$2 sm:$0xff]  ;;  %1617 = vst.msk [vmem:[#allocation2 + $0x1c0] sm:$0xff] %vm1560_vm4, %v1472_v10  ;;  %v988_v19 = vadd.f32 %v12933_v51, %v987_v16  ;;  %11104 = vmatmul.mubr.msk.f32.gmra.mrb[150].mxu0 %vm1560_vm4, %v2305_v17  ;;  %11259 = vmatprep.mubr.msk.f32.mxu1 %vm1560_vm4, %v2305_v17  ;;  %v2201_v20 = vmax.f32 %v2121_v8, %v2123_v9 }
 0x157   :  { %v2122_v18 = vmax.f32 %v1773_v13, %v1965_v14  ;;  %v1475_v21 = vmax.f32 %v993_v15, 0.0  ;;  %v10968_v22 = vpop.f32.mrb[60].mxu0 }
 0x158   :  { %v1474_v23 = vmax.f32 %v988_v19, 0.0  ;;  %v1003_v24 = vadd.f32 %v10968_v22, %v12933_v51  ;;  %v997_v25 = vpop.f32.mrb[61].mxu0  ;;  %2250 = vst.msk [vmem:[#allocation3 + $0x88] sm:$0xf] %vm2233_vm5, %v2201_v20  ;;  %v1777_v37 = vld [vmem:[#allocation2 + $0x1b0] ss:$2 sm:$0xff] }
 0x159   :  { %v2200_v26 = vmax.f32 %v2120_v12, %v2122_v18  ;;  %1620 = vst.msk [vmem:[#allocation2 + $0x1d8] sm:$0xff] %vm1560_vm4, %v1475_v21  ;;  %v998_v27 = vadd.f32 %v12933_v51, %v997_v25  ;;  %v1969_v38 = vld [vmem:[#allocation2 + $0x1b1] ss:$2 sm:$0xff] }
 0x15a   :  { %1619 = vst.msk [vmem:[#allocation2 + $0x1d0] sm:$0xff] %vm1560_vm4, %v1474_v23  ;;  %v1477_v28 = vmax.f32 %v1003_v24, 0.0  ;;  %v2124_v50 = vmax.f32 %v1777_v37, %v1969_v38 }
 0x15b   :  { %2249 = vst.msk [vmem:[#allocation3 + $0x80] sm:$0xff] %vm1560_vm4, %v2200_v26  ;;  %v1476_v29 = vmax.f32 %v998_v27, 0.0  ;;  %v10971_v30 = vpop.f32.mrb[62].mxu0 }
 0x15c   :  { %1622 = vst.msk [vmem:[#allocation2 + $0x1e8] sm:$0xff] %vm1560_vm4, %v1477_v28  ;;  %v1013_v31 = vadd.f32 %v10971_v30, %v12933_v51  ;;  %v1007_v32 = vpop.f32.mrb[63].mxu0 }
 0x15d   :  { %v1779_v33 = vld [vmem:[#allocation2 + $0x1c0] ss:$2 sm:$0xf]  ;;  %1621 = vst.msk [vmem:[#allocation2 + $0x1e0] sm:$0xff] %vm1560_vm4, %v1476_v29  ;;  %v1008_v34 = vadd.f32 %v12933_v51, %v1007_v32 }
 0x15e   :  { %v1971_v35 = vld [vmem:[#allocation2 + $0x1c1] ss:$2 sm:$0xf]  ;;  %v1479_v36 = vmax.f32 %v1013_v31, 0.0 }
 0x15f   :  { %v1478_v39 = vmax.f32 %v1008_v34, 0.0  ;;  %v10974_v40 = vpop.f32.mrb[64].mxu0  ;;  %v2125_v44 = vmax.f32 %v1779_v33, %v1971_v35  ;;  %v13280_v35 = vld [vmem:[%s14903_s3 + $0x40] sm:$0xff] }
 0x160   :  { %v1783_v41 = vld [vmem:[#allocation2 + $0x1d8] ss:$2 sm:$0xf]  ;;  %v1975_v42 = vld [vmem:[#allocation2 + $0x1d9] ss:$2 sm:$0xf]  ;;  %v1023_v43 = vadd.f32 %v10974_v40, %v12933_v51  ;;  %11300 = vmatprep.subr.mxu1 %v13280_v35 }
 0x161   :  { %1624 = vst.msk [vmem:[#allocation2 + $0x1f8] sm:$0xff] %vm1560_vm4, %v1479_v36  ;;  %v2127_v45 = vmax.f32 %v1783_v41, %v1975_v42  ;;  %v1781_v46 = vld [vmem:[#allocation2 + $0x1c8] ss:$2 sm:$0xff]  ;;  %v1973_v47 = vld [vmem:[#allocation2 + $0x1c9] ss:$2 sm:$0xff]  ;;  %1623 = vst.msk [vmem:[#allocation2 + $0x1f0] sm:$0xff] %vm1560_vm4, %v1478_v39 }
 0x162   :  { %v1017_v48 = vpop.f32.mrb[65].mxu0  ;;  %v3618_v49 = vld [vmem:[#allocation3 + $0x81] sm:$0xff]  ;;  %v2126_v52 = vmax.f32 %v1781_v46, %v1973_v47  ;;  %v1481_v53 = vmax.f32 %v1023_v43, 0.0 }
 0x163   :  { %v1018_v55 = vadd.f32 %v13247_v54, %v1017_v48  ;;  %11260 = vmatmul.mubr.msk.f32.gmra.mrb[4].mxu1 %vm1560_vm4, %v3618_v49  ;;  %v10977_v51 = vpop.f32.mrb[66].mxu0  ;;  %v2203_v56 = vmax.f32 %v2125_v44, %v2127_v45 }
 0x164   :  { %1626 = vst.msk [vmem:[#allocation2 + $0x208] sm:$0xff] %vm1560_vm4, %v1481_v53  ;;  %v1033_v58 = vadd.f32 %v13247_v54, %v10977_v51  ;;  %v1027_v59 = vpop.f32.mrb[67].mxu0  ;;  %v2202_v60 = vmax.f32 %v2124_v50, %v2126_v52  ;;  %v1785_v7 = vld [vmem:[#allocation2 + $0x1e0] ss:$2 sm:$0xff]  ;;  %v1977_v8 = vld [vmem:[#allocation2 + $0x1e1] ss:$2 sm:$0xff] }
 0x165   :  { %v1480_v57 = vmax.f32 %v1018_v55, 0.0  ;;  %v1028_v61 = vadd.f32 %v13247_v54, %v1027_v59  ;;  %2252 = vst.msk [vmem:[#allocation3 + $0x98] sm:$0xf] %vm2233_vm5, %v2203_v56  ;;  %v2128_v21 = vmax.f32 %v1785_v7, %v1977_v8 }
 0x166   :  { %v1483_v62 = vmax.f32 %v1033_v58, 0.0  ;;  %2251 = vst.msk [vmem:[#allocation3 + $0x90] sm:$0xff] %vm1560_vm4, %v2202_v60 }
 0x167   :  { %1625 = vst.msk [vmem:[#allocation2 + $0x200] sm:$0xff] %vm1560_vm4, %v1480_v57  ;;  %v1482_v0 = vmax.f32 %v1028_v61, 0.0  ;;  %v10980_v1 = vpop.f32.mrb[68].mxu0 }
 0x168   :  { %v1787_v3 = vld [vmem:[#allocation2 + $0x1f0] ss:$2 sm:$0xf]  ;;  %1628 = vst.msk [vmem:[#allocation2 + $0x218] sm:$0xff] %vm1560_vm4, %v1483_v62  ;;  %v1043_v4 = vadd.f32 %v13247_v54, %v10980_v1  ;;  %v1037_v6 = vpop.f32.mrb[69].mxu0 }
 0x169   :  { %v1979_v5 = vld [vmem:[#allocation2 + $0x1f1] ss:$2 sm:$0xf]  ;;  %1627 = vst.msk [vmem:[#allocation2 + $0x210] sm:$0xff] %vm1560_vm4, %v1482_v0  ;;  %v1038_v10 = vadd.f32 %v13247_v54, %v1037_v6 }
 0x16a   :  { %v1485_v9 = vmax.f32 %v1043_v4, 0.0  ;;  %v2129_v13 = vmax.f32 %v1787_v3, %v1979_v5 }
 0x16b   :  { %v1791_v11 = vld [vmem:[#allocation2 + $0x208] ss:$2 sm:$0xf]  ;;  %v1983_v12 = vld [vmem:[#allocation2 + $0x209] ss:$2 sm:$0xf] }
 0x16c   :  { %v2131_v14 = vmax.f32 %v1791_v11, %v1983_v12  ;;  %1630 = vst.msk [vmem:[#allocation2 + $0x228] sm:$0xff] %vm1560_vm4, %v1485_v9  ;;  %v1484_v15 = vmax.f32 %v1038_v10, 0.0  ;;  %v10983_v16 = vpop.f32.mrb[70].mxu0 }
 0x16d   :  { %v1053_v19 = vadd.f32 %v13247_v54, %v10983_v16  ;;  %v1047_v20 = vpop.f32.mrb[71].mxu0 }
 0x16e   :  { %v1789_v17 = vld [vmem:[#allocation2 + $0x1f8] ss:$2 sm:$0xff]  ;;  %v1981_v18 = vld [vmem:[#allocation2 + $0x1f9] ss:$2 sm:$0xff]  ;;  %1629 = vst.msk [vmem:[#allocation2 + $0x220] sm:$0xff] %vm1560_vm4, %v1484_v15  ;;  %v1048_v23 = vadd.f32 %v13247_v54, %v1047_v20  ;;  %v2205_v24 = vmax.f32 %v2129_v13, %v2131_v14 }
 0x16f   :  { %v2130_v22 = vmax.f32 %v1789_v17, %v1981_v18  ;;  %v1487_v25 = vmax.f32 %v1053_v19, 0.0  ;;  %v10986_v26 = vpop.f32.mrb[72].mxu0 }
 0x170   :  { %v1486_v27 = vmax.f32 %v1048_v23, 0.0  ;;  %v1063_v28 = vadd.f32 %v13247_v54, %v10986_v26  ;;  %v1057_v29 = vpop.f32.mrb[73].mxu0  ;;  %2254 = vst.msk [vmem:[#allocation3 + $0xa8] sm:$0xf] %vm2233_vm5, %v2205_v24  ;;  %v1793_v42 = vld [vmem:[#allocation2 + $0x210] ss:$2 sm:$0xff] }
 0x171   :  { %v2204_v30 = vmax.f32 %v2128_v21, %v2130_v22  ;;  %1632 = vst.msk [vmem:[#allocation2 + $0x238] sm:$0xff] %vm1560_vm4, %v1487_v25  ;;  %v1058_v31 = vadd.f32 %v13247_v54, %v1057_v29  ;;  %v1985_v43 = vld [vmem:[#allocation2 + $0x211] ss:$2 sm:$0xff] }
 0x172   :  { %1631 = vst.msk [vmem:[#allocation2 + $0x230] sm:$0xff] %vm1560_vm4, %v1486_v27  ;;  %v1489_v32 = vmax.f32 %v1063_v28, 0.0  ;;  %v2132_v51 = vmax.f32 %v1793_v42, %v1985_v43  ;;  %v13308_v29 = vld [vmem:[%s14903_s3 + $0x10] sm:$0xff] }
 0x173   :  { %2253 = vst.msk [vmem:[#allocation3 + $0xa0] sm:$0xff] %vm1560_vm4, %v2204_v30  ;;  %v1488_v33 = vmax.f32 %v1058_v31, 0.0  ;;  %v10989_v34 = vpop.f32.mrb[74].mxu0  ;;  %11144 = vmatprep.subr.mxu0 %v13308_v29 }
 0x174   :  { %1634 = vst.msk [vmem:[#allocation2 + $0x248] sm:$0xff] %vm1560_vm4, %v1489_v32  ;;  %v1073_v36 = vadd.f32 %v13247_v54, %v10989_v34  ;;  %v1067_v37 = vpop.f32.mrb[75].mxu0 }
 0x175   :  { %v1795_v38 = vld [vmem:[#allocation2 + $0x220] ss:$2 sm:$0xf]  ;;  %1633 = vst.msk [vmem:[#allocation2 + $0x240] sm:$0xff] %vm1560_vm4, %v1488_v33  ;;  %v1068_v39 = vadd.f32 %v13247_v54, %v1067_v37 }
 0x176   :  { %v1987_v40 = vld [vmem:[#allocation2 + $0x221] ss:$2 sm:$0xf]  ;;  %v1491_v41 = vmax.f32 %v1073_v36, 0.0 }
 0x177   :  { %v1490_v44 = vmax.f32 %v1068_v39, 0.0  ;;  %v10992_v45 = vpop.f32.mrb[76].mxu0  ;;  %v2133_v49 = vmax.f32 %v1795_v38, %v1987_v40 }
 0x178   :  { %v1799_v46 = vld [vmem:[#allocation2 + $0x238] ss:$2 sm:$0xf]  ;;  %v1991_v47 = vld [vmem:[#allocation2 + $0x239] ss:$2 sm:$0xf]  ;;  %v1083_v48 = vadd.f32 %v13247_v54, %v10992_v45 }
 0x179   :  { %1636 = vst.msk [vmem:[#allocation2 + $0x258] sm:$0xff] %vm1560_vm4, %v1491_v41  ;;  %v2135_v50 = vmax.f32 %v1799_v46, %v1991_v47  ;;  %v1797_v52 = vld [vmem:[#allocation2 + $0x228] ss:$2 sm:$0xff]  ;;  %v1989_v53 = vld [vmem:[#allocation2 + $0x229] ss:$2 sm:$0xff]  ;;  %1635 = vst.msk [vmem:[#allocation2 + $0x250] sm:$0xff] %vm1560_vm4, %v1490_v44 }
 0x17a   :  { %v1077_v55 = vpop.f32.mrb[77].mxu0  ;;  %v2134_v56 = vmax.f32 %v1797_v52, %v1989_v53  ;;  %v1493_v57 = vmax.f32 %v1083_v48, 0.0 }
 0x17b   :  { %v1078_v58 = vadd.f32 %v13247_v54, %v1077_v55  ;;  %v10995_v59 = vpop.f32.mrb[78].mxu0  ;;  %v2207_v60 = vmax.f32 %v2133_v49, %v2135_v50 }
 0x17c   :  { %1638 = vst.msk [vmem:[#allocation2 + $0x268] sm:$0xff] %vm1560_vm4, %v1493_v57  ;;  %v1093_v62 = vadd.f32 %v13247_v54, %v10995_v59  ;;  %v1087_v63 = vpop.f32.mrb[79].mxu0  ;;  %v2206_v0 = vmax.f32 %v2132_v51, %v2134_v56  ;;  %v1801_v9 = vld [vmem:[#allocation2 + $0x240] ss:$2 sm:$0xff]  ;;  %v1993_v10 = vld [vmem:[#allocation2 + $0x241] ss:$2 sm:$0xff] }
 0x17d   :  { %v1492_v61 = vmax.f32 %v1078_v58, 0.0  ;;  %v1088_v1 = vadd.f32 %v13247_v54, %v1087_v63  ;;  %2256 = vst.msk [vmem:[#allocation3 + $0xb8] sm:$0xf] %vm2233_vm5, %v2207_v60  ;;  %v2136_v23 = vmax.f32 %v1801_v9, %v1993_v10 }
 0x17e   :  { %v1495_v2 = vmax.f32 %v1093_v62, 0.0  ;;  %2255 = vst.msk [vmem:[#allocation3 + $0xb0] sm:$0xff] %vm1560_vm4, %v2206_v0 }
 0x17f   :  { %1637 = vst.msk [vmem:[#allocation2 + $0x260] sm:$0xff] %vm1560_vm4, %v1492_v61  ;;  %v1494_v3 = vmax.f32 %v1088_v1, 0.0  ;;  %v10998_v4 = vpop.f32.mrb[80].mxu0 }
 0x180   :  { %v1803_v5 = vld [vmem:[#allocation2 + $0x250] ss:$2 sm:$0xf]  ;;  %1640 = vst.msk [vmem:[#allocation2 + $0x278] sm:$0xff] %vm1560_vm4, %v1495_v2  ;;  %v1103_v6 = vadd.f32 %v13247_v54, %v10998_v4  ;;  %v1097_v8 = vpop.f32.mrb[81].mxu0 }
 0x181   :  { %v1995_v7 = vld [vmem:[#allocation2 + $0x251] ss:$2 sm:$0xf]  ;;  %1639 = vst.msk [vmem:[#allocation2 + $0x270] sm:$0xff] %vm1560_vm4, %v1494_v3  ;;  %v1098_v12 = vadd.f32 %v13247_v54, %v1097_v8 }
 0x182   :  { %v1497_v11 = vmax.f32 %v1103_v6, 0.0  ;;  %v2137_v15 = vmax.f32 %v1803_v5, %v1995_v7 }
 0x183   :  { %v1807_v13 = vld [vmem:[#allocation2 + $0x268] ss:$2 sm:$0xf]  ;;  %v1999_v14 = vld [vmem:[#allocation2 + $0x269] ss:$2 sm:$0xf] }
 0x184   :  { %v2139_v16 = vmax.f32 %v1807_v13, %v1999_v14  ;;  %1642 = vst.msk [vmem:[#allocation2 + $0x288] sm:$0xff] %vm1560_vm4, %v1497_v11  ;;  %v1496_v17 = vmax.f32 %v1098_v12, 0.0  ;;  %v11001_v18 = vpop.f32.mrb[82].mxu0 }
 0x185   :  { %v1113_v21 = vadd.f32 %v13247_v54, %v11001_v18  ;;  %v1107_v22 = vpop.f32.mrb[83].mxu0 }
 0x186   :  { %v1805_v19 = vld [vmem:[#allocation2 + $0x258] ss:$2 sm:$0xff]  ;;  %v1997_v20 = vld [vmem:[#allocation2 + $0x259] ss:$2 sm:$0xff]  ;;  %1641 = vst.msk [vmem:[#allocation2 + $0x280] sm:$0xff] %vm1560_vm4, %v1496_v17  ;;  %v1108_v25 = vadd.f32 %v13247_v54, %v1107_v22  ;;  %v2209_v26 = vmax.f32 %v2137_v15, %v2139_v16 }
 0x187   :  { %v2138_v24 = vmax.f32 %v1805_v19, %v1997_v20  ;;  %v1499_v27 = vmax.f32 %v1113_v21, 0.0  ;;  %v11004_v28 = vpop.f32.mrb[84].mxu0 }
 0x188   :  { %v1498_v30 = vmax.f32 %v1108_v25, 0.0  ;;  %v1123_v31 = vadd.f32 %v13247_v54, %v11004_v28  ;;  %v1117_v32 = vpop.f32.mrb[85].mxu0  ;;  %2258 = vst.msk [vmem:[#allocation3 + $0xc8] sm:$0xf] %vm2233_vm5, %v2209_v26  ;;  %v1809_v45 = vld [vmem:[#allocation2 + $0x270] ss:$2 sm:$0xff] }
 0x189   :  { %v2208_v33 = vmax.f32 %v2136_v23, %v2138_v24  ;;  %1644 = vst.msk [vmem:[#allocation2 + $0x298] sm:$0xff] %vm1560_vm4, %v1499_v27  ;;  %v1118_v34 = vadd.f32 %v13247_v54, %v1117_v32  ;;  %v2001_v46 = vld [vmem:[#allocation2 + $0x271] ss:$2 sm:$0xff] }
 0x18a   :  { %1643 = vst.msk [vmem:[#allocation2 + $0x290] sm:$0xff] %vm1560_vm4, %v1498_v30  ;;  %v1501_v36 = vmax.f32 %v1123_v31, 0.0  ;;  %v2140_v59 = vmax.f32 %v1809_v45, %v2001_v46 }
 0x18b   :  { %2257 = vst.msk [vmem:[#allocation3 + $0xc0] sm:$0xff] %vm1560_vm4, %v2208_v33  ;;  %v1500_v37 = vmax.f32 %v1118_v34, 0.0  ;;  %v11007_v38 = vpop.f32.mrb[86].mxu0 }
 0x18c   :  { %1646 = vst.msk [vmem:[#allocation2 + $0x2a8] sm:$0xff] %vm1560_vm4, %v1501_v36  ;;  %v1133_v39 = vadd.f32 %v13247_v54, %v11007_v38  ;;  %v1127_v40 = vpop.f32.mrb[87].mxu0 }
 0x18d   :  { %v1811_v41 = vld [vmem:[#allocation2 + $0x280] ss:$2 sm:$0xf]  ;;  %1645 = vst.msk [vmem:[#allocation2 + $0x2a0] sm:$0xff] %vm1560_vm4, %v1500_v37  ;;  %v1128_v42 = vadd.f32 %v13247_v54, %v1127_v40 }
 0x18e   :  { %v2003_v43 = vld [vmem:[#allocation2 + $0x281] ss:$2 sm:$0xf]  ;;  %v1503_v44 = vmax.f32 %v1133_v39, 0.0 }
 0x18f   :  { %v1502_v47 = vmax.f32 %v1128_v42, 0.0  ;;  %v11010_v48 = vpop.f32.mrb[88].mxu0  ;;  %v2141_v53 = vmax.f32 %v1811_v41, %v2003_v43 }
 0x190   :  { %v1815_v49 = vld [vmem:[#allocation2 + $0x298] ss:$2 sm:$0xf]  ;;  %v2007_v50 = vld [vmem:[#allocation2 + $0x299] ss:$2 sm:$0xf]  ;;  %v1143_v52 = vadd.f32 %v13247_v54, %v11010_v48 }
 0x191   :  { %1648 = vst.msk [vmem:[#allocation2 + $0x2b8] sm:$0xff] %vm1560_vm4, %v1503_v44  ;;  %v2143_v55 = vmax.f32 %v1815_v49, %v2007_v50  ;;  %v1813_v51 = vld [vmem:[#allocation2 + $0x288] ss:$2 sm:$0xff]  ;;  %v2005_v56 = vld [vmem:[#allocation2 + $0x289] ss:$2 sm:$0xff]  ;;  %1647 = vst.msk [vmem:[#allocation2 + $0x2b0] sm:$0xff] %vm1560_vm4, %v1502_v47 }
 0x192   :  { %v1137_v57 = vpop.f32.mrb[89].mxu0  ;;  %v2306_v58 = vld [vmem:[#allocation3 + $0xc1] sm:$0xff]  ;;  %v2142_v60 = vmax.f32 %v1813_v51, %v2005_v56  ;;  %v1505_v61 = vmax.f32 %v1143_v52, 0.0 }
 0x193   :  { %v1138_v62 = vadd.f32 %v13247_v54, %v1137_v57  ;;  %11106 = vmatprep.mubr.msk.f32.mxu0 %vm1560_vm4, %v2306_v58  ;;  %v11013_v63 = vpop.f32.mrb[90].mxu0  ;;  %v2211_v0 = vmax.f32 %v2141_v53, %v2143_v55 }
 0x194   :  { %1650 = vst.msk [vmem:[#allocation2 + $0x2c8] sm:$0xff] %vm1560_vm4, %v1505_v61  ;;  %v1153_v2 = vadd.f32 %v13247_v54, %v11013_v63  ;;  %v1147_v3 = vpop.f32.mrb[91].mxu0  ;;  %v2210_v4 = vmax.f32 %v2140_v59, %v2142_v60  ;;  %v1817_v13 = vld [vmem:[#allocation2 + $0x2a0] ss:$2 sm:$0xff]  ;;  %v2009_v14 = vld [vmem:[#allocation2 + $0x2a1] ss:$2 sm:$0xff] }
 0x195   :  { %v1504_v1 = vmax.f32 %v1138_v62, 0.0  ;;  %v1148_v5 = vadd.f32 %v13247_v54, %v1147_v3  ;;  %2260 = vst.msk [vmem:[#allocation3 + $0xd8] sm:$0xf] %vm2233_vm5, %v2211_v0  ;;  %v2144_v23 = vmax.f32 %v1817_v13, %v2009_v14 }
 0x196   :  { %v1507_v6 = vmax.f32 %v1153_v2, 0.0  ;;  %2259 = vst.msk [vmem:[#allocation3 + $0xd0] sm:$0xff] %vm1560_vm4, %v2210_v4 }
 0x197   :  { %1649 = vst.msk [vmem:[#allocation2 + $0x2c0] sm:$0xff] %vm1560_vm4, %v1504_v1  ;;  %v1506_v7 = vmax.f32 %v1148_v5, 0.0  ;;  %v11016_v8 = vpop.f32.mrb[92].mxu0 }
 0x198   :  { %v1819_v9 = vld [vmem:[#allocation2 + $0x2b0] ss:$2 sm:$0xf]  ;;  %1652 = vst.msk [vmem:[#allocation2 + $0x2d8] sm:$0xff] %vm1560_vm4, %v1507_v6  ;;  %v1163_v10 = vadd.f32 %v13247_v54, %v11016_v8  ;;  %v1157_v12 = vpop.f32.mrb[93].mxu0 }
 0x199   :  { %v2011_v11 = vld [vmem:[#allocation2 + $0x2b1] ss:$2 sm:$0xf]  ;;  %1651 = vst.msk [vmem:[#allocation2 + $0x2d0] sm:$0xff] %vm1560_vm4, %v1506_v7  ;;  %v1158_v16 = vadd.f32 %v13247_v54, %v1157_v12 }
 0x19a   :  { %v1509_v15 = vmax.f32 %v1163_v10, 0.0  ;;  %v2145_v19 = vmax.f32 %v1819_v9, %v2011_v11 }
 0x19b   :  { %v1823_v17 = vld [vmem:[#allocation2 + $0x2c8] ss:$2 sm:$0xf]  ;;  %v2015_v18 = vld [vmem:[#allocation2 + $0x2c9] ss:$2 sm:$0xf] }
 0x19c   :  { %v2147_v20 = vmax.f32 %v1823_v17, %v2015_v18  ;;  %1654 = vst.msk [vmem:[#allocation2 + $0x2e8] sm:$0xff] %vm1560_vm4, %v1509_v15  ;;  %v1508_v21 = vmax.f32 %v1158_v16, 0.0  ;;  %v11019_v22 = vpop.f32.mrb[94].mxu0 }
 0x19d   :  { %v1173_v26 = vadd.f32 %v13247_v54, %v11019_v22  ;;  %v1167_v27 = vpop.f32.mrb[95].mxu0  ;;  %v2307_v28 = vld [vmem:[#allocation3 + $0xd1] sm:$0xff] }
 0x19e   :  { %v1821_v24 = vld [vmem:[#allocation2 + $0x2b8] ss:$2 sm:$0xff]  ;;  %v2013_v25 = vld [vmem:[#allocation2 + $0x2b9] ss:$2 sm:$0xff]  ;;  %1653 = vst.msk [vmem:[#allocation2 + $0x2e0] sm:$0xff] %vm1560_vm4, %v1508_v21  ;;  %v1168_v31 = vadd.f32 %v13247_v54, %v1167_v27  ;;  %11107 = vmatmul.mubr.msk.f32.gmra.mrb[152].mxu0 %vm1560_vm4, %v2307_v28  ;;  %11262 = vmatprep.mubr.msk.f32.mxu1 %vm1560_vm4, %v2307_v28  ;;  %v2213_v32 = vmax.f32 %v2145_v19, %v2147_v20 }
 0x19f   :  { %v2146_v30 = vmax.f32 %v1821_v24, %v2013_v25  ;;  %v1511_v33 = vmax.f32 %v1173_v26, 0.0  ;;  %v11022_v34 = vpop.f32.mrb[96].mxu0 }
 0x1a0   :  { %v1510_v36 = vmax.f32 %v1168_v31, 0.0  ;;  %v1183_v37 = vadd.f32 %v13247_v54, %v11022_v34  ;;  %v1177_v38 = vpop.f32.mrb[97].mxu0  ;;  %2262 = vst.msk [vmem:[#allocation3 + $0xe8] sm:$0xf] %vm2233_vm5, %v2213_v32  ;;  %v1825_v50 = vld [vmem:[#allocation2 + $0x2d0] ss:$2 sm:$0xff] }
 0x1a1   :  { %v2212_v39 = vmax.f32 %v2144_v23, %v2146_v30  ;;  %1656 = vst.msk [vmem:[#allocation2 + $0x2f8] sm:$0xff] %vm1560_vm4, %v1511_v33  ;;  %v1178_v40 = vadd.f32 %v13247_v54, %v1177_v38  ;;  %v2017_v52 = vld [vmem:[#allocation2 + $0x2d1] ss:$2 sm:$0xff] }
 0x1a2   :  { %1655 = vst.msk [vmem:[#allocation2 + $0x2f0] sm:$0xff] %vm1560_vm4, %v1510_v36  ;;  %v1513_v41 = vmax.f32 %v1183_v37, 0.0  ;;  %v2148_v0 = vmax.f32 %v1825_v50, %v2017_v52 }
 0x1a3   :  { %2261 = vst.msk [vmem:[#allocation3 + $0xe0] sm:$0xff] %vm1560_vm4, %v2212_v39  ;;  %v1512_v42 = vmax.f32 %v1178_v40, 0.0  ;;  %v11025_v43 = vpop.f32.mrb[98].mxu0 }
 0x1a4   :  { %1658 = vst.msk [vmem:[#allocation2 + $0x308] sm:$0xff] %vm1560_vm4, %v1513_v41  ;;  %v1193_v44 = vadd.f32 %v13247_v54, %v11025_v43  ;;  %v1187_v45 = vpop.f32.mrb[99].mxu0 }
 0x1a5   :  { %v1827_v46 = vld [vmem:[#allocation2 + $0x2e0] ss:$2 sm:$0xf]  ;;  %1657 = vst.msk [vmem:[#allocation2 + $0x300] sm:$0xff] %vm1560_vm4, %v1512_v42  ;;  %v1188_v47 = vadd.f32 %v13247_v54, %v1187_v45 }
 0x1a6   :  { %v2019_v48 = vld [vmem:[#allocation2 + $0x2e1] ss:$2 sm:$0xf]  ;;  %v1515_v49 = vmax.f32 %v1193_v44, 0.0 }
 0x1a7   :  { %v1514_v53 = vmax.f32 %v1188_v47, 0.0  ;;  %v11028_v55 = vpop.f32.mrb[100].mxu0  ;;  %v2149_v58 = vmax.f32 %v1827_v46, %v2019_v48 }
 0x1a8   :  { %v1831_v51 = vld [vmem:[#allocation2 + $0x2f8] ss:$2 sm:$0xf]  ;;  %v2023_v56 = vld [vmem:[#allocation2 + $0x2f9] ss:$2 sm:$0xf]  ;;  %v1203_v57 = vadd.f32 %v13247_v54, %v11028_v55 }
 0x1a9   :  { %1660 = vst.msk [vmem:[#allocation2 + $0x318] sm:$0xff] %vm1560_vm4, %v1515_v49  ;;  %v2151_v59 = vmax.f32 %v1831_v51, %v2023_v56  ;;  %v1829_v60 = vld [vmem:[#allocation2 + $0x2e8] ss:$2 sm:$0xff]  ;;  %v2021_v61 = vld [vmem:[#allocation2 + $0x2e9] ss:$2 sm:$0xff]  ;;  %1659 = vst.msk [vmem:[#allocation2 + $0x310] sm:$0xff] %vm1560_vm4, %v1514_v53 }
 0x1aa   :  { %v1197_v62 = vpop.f32.mrb[101].mxu0  ;;  %v2308_v63 = vld [vmem:[#allocation3 + $0xe1] sm:$0xff]  ;;  %v2150_v1 = vmax.f32 %v1829_v60, %v2021_v61  ;;  %v1517_v2 = vmax.f32 %v1203_v57, 0.0 }
 0x1ab   :  { %v1198_v3 = vadd.f32 %v13247_v54, %v1197_v62  ;;  %11109 = vmatprep.mubr.msk.f32.mxu0 %vm1560_vm4, %v2308_v63  ;;  %11263 = vmatmul.mubr.msk.f32.gmra.mrb[6].mxu1 %vm1560_vm4, %v2308_v63  ;;  %v11031_v4 = vpop.f32.mrb[102].mxu0  ;;  %v2215_v5 = vmax.f32 %v2149_v58, %v2151_v59 }
 0x1ac   :  { %1662 = vst.msk [vmem:[#allocation2 + $0x328] sm:$0xff] %vm1560_vm4, %v1517_v2  ;;  %v1213_v7 = vadd.f32 %v13247_v54, %v11031_v4  ;;  %v1207_v8 = vpop.f32.mrb[103].mxu0  ;;  %v2214_v9 = vmax.f32 %v2148_v0, %v2150_v1  ;;  %v1833_v18 = vld [vmem:[#allocation2 + $0x300] ss:$2 sm:$0xff]  ;;  %v2025_v19 = vld [vmem:[#allocation2 + $0x301] ss:$2 sm:$0xff] }
 0x1ad   :  { %v1516_v6 = vmax.f32 %v1198_v3, 0.0  ;;  %v1208_v10 = vadd.f32 %v13247_v54, %v1207_v8  ;;  %2264 = vst.msk [vmem:[#allocation3 + $0xf8] sm:$0xf] %vm2233_vm5, %v2215_v5  ;;  %v2152_v28 = vmax.f32 %v1833_v18, %v2025_v19 }
 0x1ae   :  { %v1519_v11 = vmax.f32 %v1213_v7, 0.0  ;;  %2263 = vst.msk [vmem:[#allocation3 + $0xf0] sm:$0xff] %vm1560_vm4, %v2214_v9 }
 0x1af   :  { %1661 = vst.msk [vmem:[#allocation2 + $0x320] sm:$0xff] %vm1560_vm4, %v1516_v6  ;;  %v1518_v12 = vmax.f32 %v1208_v10, 0.0  ;;  %v11034_v13 = vpop.f32.mrb[104].mxu0 }
 0x1b0   :  { %v1835_v14 = vld [vmem:[#allocation2 + $0x310] ss:$2 sm:$0xf]  ;;  %1664 = vst.msk [vmem:[#allocation2 + $0x338] sm:$0xff] %vm1560_vm4, %v1519_v11  ;;  %v1223_v15 = vadd.f32 %v13247_v54, %v11034_v13  ;;  %v1217_v17 = vpop.f32.mrb[105].mxu0 }
 0x1b1   :  { %v2027_v16 = vld [vmem:[#allocation2 + $0x311] ss:$2 sm:$0xf]  ;;  %1663 = vst.msk [vmem:[#allocation2 + $0x330] sm:$0xff] %vm1560_vm4, %v1518_v12  ;;  %v1218_v21 = vadd.f32 %v13247_v54, %v1217_v17 }
 0x1b2   :  { %v1521_v20 = vmax.f32 %v1223_v15, 0.0  ;;  %v2153_v24 = vmax.f32 %v1835_v14, %v2027_v16 }
 0x1b3   :  { %v1839_v22 = vld [vmem:[#allocation2 + $0x328] ss:$2 sm:$0xf]  ;;  %v2031_v23 = vld [vmem:[#allocation2 + $0x329] ss:$2 sm:$0xf] }
 0x1b4   :  { %v2155_v25 = vmax.f32 %v1839_v22, %v2031_v23  ;;  %1666 = vst.msk [vmem:[#allocation2 + $0x348] sm:$0xff] %vm1560_vm4, %v1521_v20  ;;  %v1520_v26 = vmax.f32 %v1218_v21, 0.0  ;;  %v11037_v27 = vpop.f32.mrb[106].mxu0 }
 0x1b5   :  { %v1233_v32 = vadd.f32 %v13247_v54, %v11037_v27  ;;  %v1227_v33 = vpop.f32.mrb[107].mxu0  ;;  %v2309_v34 = vld [vmem:[#allocation3 + $0xf1] sm:$0xff] }
 0x1b6   :  { %v1837_v30 = vld [vmem:[#allocation2 + $0x318] ss:$2 sm:$0xff]  ;;  %v2029_v31 = vld [vmem:[#allocation2 + $0x319] ss:$2 sm:$0xff]  ;;  %1665 = vst.msk [vmem:[#allocation2 + $0x340] sm:$0xff] %vm1560_vm4, %v1520_v26  ;;  %v1228_v37 = vadd.f32 %v13247_v54, %v1227_v33  ;;  %11110 = vmatmul.mubr.msk.f32.gmra.mrb[154].mxu0 %vm1560_vm4, %v2309_v34  ;;  %11265 = vmatprep.mubr.msk.f32.mxu1 %vm1560_vm4, %v2309_v34  ;;  %v2217_v38 = vmax.f32 %v2153_v24, %v2155_v25 }
 0x1b7   :  { %v2154_v36 = vmax.f32 %v1837_v30, %v2029_v31  ;;  %v1523_v39 = vmax.f32 %v1233_v32, 0.0  ;;  %v11040_v40 = vpop.f32.mrb[108].mxu0 }
 0x1b8   :  { %v1522_v41 = vmax.f32 %v1228_v37, 0.0  ;;  %v1243_v42 = vadd.f32 %v13247_v54, %v11040_v40  ;;  %v1237_v43 = vpop.f32.mrb[109].mxu0  ;;  %2266 = vst.msk [vmem:[#allocation3 + $0x108] sm:$0xf] %vm2233_vm5, %v2217_v38  ;;  %v1841_v56 = vld [vmem:[#allocation2 + $0x330] ss:$2 sm:$0xff] }
 0x1b9   :  { %v2216_v44 = vmax.f32 %v2152_v28, %v2154_v36  ;;  %1668 = vst.msk [vmem:[#allocation2 + $0x358] sm:$0xff] %vm1560_vm4, %v1523_v39  ;;  %v1238_v45 = vadd.f32 %v13247_v54, %v1237_v43  ;;  %v2033_v57 = vld [vmem:[#allocation2 + $0x331] ss:$2 sm:$0xff] }
 0x1ba   :  { %1667 = vst.msk [vmem:[#allocation2 + $0x350] sm:$0xff] %vm1560_vm4, %v1522_v41  ;;  %v1525_v46 = vmax.f32 %v1243_v42, 0.0  ;;  %v2156_v5 = vmax.f32 %v1841_v56, %v2033_v57 }
 0x1bb   :  { %2265 = vst.msk [vmem:[#allocation3 + $0x100] sm:$0xff] %vm1560_vm4, %v2216_v44  ;;  %v1524_v47 = vmax.f32 %v1238_v45, 0.0  ;;  %v11043_v48 = vpop.f32.mrb[110].mxu0 }
 0x1bc   :  { %1670 = vst.msk [vmem:[#allocation2 + $0x368] sm:$0xff] %vm1560_vm4, %v1525_v46  ;;  %v1253_v49 = vadd.f32 %v13247_v54, %v11043_v48  ;;  %v1247_v50 = vpop.f32.mrb[111].mxu0 }
 0x1bd   :  { %v1843_v52 = vld [vmem:[#allocation2 + $0x340] ss:$2 sm:$0xf]  ;;  %1669 = vst.msk [vmem:[#allocation2 + $0x360] sm:$0xff] %vm1560_vm4, %v1524_v47  ;;  %v1248_v53 = vadd.f32 %v13247_v54, %v1247_v50 }
 0x1be   :  { %v2035_v55 = vld [vmem:[#allocation2 + $0x341] ss:$2 sm:$0xf]  ;;  %v1527_v51 = vmax.f32 %v1253_v49, 0.0 }
 0x1bf   :  { %v1526_v58 = vmax.f32 %v1248_v53, 0.0  ;;  %v11046_v59 = vpop.f32.mrb[112].mxu0  ;;  %v2157_v63 = vmax.f32 %v1843_v52, %v2035_v55 }
 0x1c0   :  { %v1847_v60 = vld [vmem:[#allocation2 + $0x358] ss:$2 sm:$0xf]  ;;  %v2039_v61 = vld [vmem:[#allocation2 + $0x359] ss:$2 sm:$0xf]  ;;  %v1263_v62 = vadd.f32 %v13247_v54, %v11046_v59 }
 0x1c1   :  { %1672 = vst.msk [vmem:[#allocation2 + $0x378] sm:$0xff] %vm1560_vm4, %v1527_v51  ;;  %v2159_v0 = vmax.f32 %v1847_v60, %v2039_v61  ;;  %v1845_v1 = vld [vmem:[#allocation2 + $0x348] ss:$2 sm:$0xff]  ;;  %v2037_v2 = vld [vmem:[#allocation2 + $0x349] ss:$2 sm:$0xff]  ;;  %1671 = vst.msk [vmem:[#allocation2 + $0x370] sm:$0xff] %vm1560_vm4, %v1526_v58 }
 0x1c2   :  { %v1257_v3 = vpop.f32.mrb[113].mxu0  ;;  %v13387_v4 = vld [vmem:[#allocation3 + $0x101] sm:$0xff]  ;;  %v2158_v6 = vmax.f32 %v1845_v1, %v2037_v2  ;;  %v1529_v7 = vmax.f32 %v1263_v62, 0.0 }
 0x1c3   :  { %v1258_v8 = vadd.f32 %v13247_v54, %v1257_v3  ;;  %11112 = vmatprep.mubr.msk.f32.mxu0 %vm1560_vm4, %v13387_v4  ;;  %11266 = vmatmul.mubr.msk.f32.gmra.mrb[8].mxu1 %vm1560_vm4, %v13387_v4  ;;  %v11049_v9 = vpop.f32.mrb[114].mxu0  ;;  %v2219_v10 = vmax.f32 %v2157_v63, %v2159_v0 }
 0x1c4   :  { %1674 = vst.msk [vmem:[#allocation2 + $0x388] sm:$0xff] %vm1560_vm4, %v1529_v7  ;;  %v1273_v12 = vadd.f32 %v13247_v54, %v11049_v9  ;;  %v1267_v13 = vpop.f32.mrb[115].mxu0  ;;  %v2218_v14 = vmax.f32 %v2156_v5, %v2158_v6  ;;  %v1849_v23 = vld [vmem:[#allocation2 + $0x360] ss:$2 sm:$0xff]  ;;  %v2041_v24 = vld [vmem:[#allocation2 + $0x361] ss:$2 sm:$0xff] }
 0x1c5   :  { %v1528_v11 = vmax.f32 %v1258_v8, 0.0  ;;  %v1268_v15 = vadd.f32 %v13247_v54, %v1267_v13  ;;  %2268 = vst.msk [vmem:[#allocation3 + $0x118] sm:$0xf] %vm2233_vm5, %v2219_v10  ;;  %v2160_v34 = vmax.f32 %v1849_v23, %v2041_v24 }
 0x1c6   :  { %v1531_v16 = vmax.f32 %v1273_v12, 0.0  ;;  %2267 = vst.msk [vmem:[#allocation3 + $0x110] sm:$0xff] %vm1560_vm4, %v2218_v14 }
 0x1c7   :  { %1673 = vst.msk [vmem:[#allocation2 + $0x380] sm:$0xff] %vm1560_vm4, %v1528_v11  ;;  %v1530_v17 = vmax.f32 %v1268_v15, 0.0  ;;  %v11052_v18 = vpop.f32.mrb[116].mxu0 }
 0x1c8   :  { %v1851_v19 = vld [vmem:[#allocation2 + $0x370] ss:$2 sm:$0xf]  ;;  %1676 = vst.msk [vmem:[#allocation2 + $0x398] sm:$0xff] %vm1560_vm4, %v1531_v16  ;;  %v1283_v20 = vadd.f32 %v13247_v54, %v11052_v18  ;;  %v1277_v22 = vpop.f32.mrb[117].mxu0 }
 0x1c9   :  { %v2043_v21 = vld [vmem:[#allocation2 + $0x371] ss:$2 sm:$0xf]  ;;  %1675 = vst.msk [vmem:[#allocation2 + $0x390] sm:$0xff] %vm1560_vm4, %v1530_v17  ;;  %v1278_v26 = vadd.f32 %v13247_v54, %v1277_v22 }
 0x1ca   :  { %v1533_v25 = vmax.f32 %v1283_v20, 0.0  ;;  %v2161_v30 = vmax.f32 %v1851_v19, %v2043_v21 }
 0x1cb   :  { %v1855_v27 = vld [vmem:[#allocation2 + $0x388] ss:$2 sm:$0xf]  ;;  %v2047_v28 = vld [vmem:[#allocation2 + $0x389] ss:$2 sm:$0xf] }
 0x1cc   :  { %v2163_v31 = vmax.f32 %v1855_v27, %v2047_v28  ;;  %1678 = vst.msk [vmem:[#allocation2 + $0x3a8] sm:$0xff] %vm1560_vm4, %v1533_v25  ;;  %v1532_v32 = vmax.f32 %v1278_v26, 0.0  ;;  %v11055_v33 = vpop.f32.mrb[118].mxu0 }
 0x1cd   :  { %v1293_v38 = vadd.f32 %v13247_v54, %v11055_v33  ;;  %v1287_v39 = vpop.f32.mrb[119].mxu0  ;;  %v13406_v40 = vld [vmem:[#allocation3 + $0x111] sm:$0xff] }
 0x1ce   :  { %v1853_v36 = vld [vmem:[#allocation2 + $0x378] ss:$2 sm:$0xff]  ;;  %v2045_v37 = vld [vmem:[#allocation2 + $0x379] ss:$2 sm:$0xff]  ;;  %1677 = vst.msk [vmem:[#allocation2 + $0x3a0] sm:$0xff] %vm1560_vm4, %v1532_v32  ;;  %v1288_v42 = vadd.f32 %v13247_v54, %v1287_v39  ;;  %11113 = vmatmul.mubr.msk.f32.gmra.mrb[156].mxu0 %vm1560_vm4, %v13406_v40  ;;  %11268 = vmatprep.mubr.msk.f32.mxu1 %vm1560_vm4, %v13406_v40  ;;  %v2221_v43 = vmax.f32 %v2161_v30, %v2163_v31 }
 0x1cf   :  { %v2162_v41 = vmax.f32 %v1853_v36, %v2045_v37  ;;  %v1535_v44 = vmax.f32 %v1293_v38, 0.0  ;;  %v11058_v45 = vpop.f32.mrb[120].mxu0 }
 0x1d0   :  { %v1534_v46 = vmax.f32 %v1288_v42, 0.0  ;;  %v1303_v47 = vadd.f32 %v13247_v54, %v11058_v45  ;;  %v1297_v48 = vpop.f32.mrb[121].mxu0  ;;  %2270 = vst.msk [vmem:[#allocation3 + $0x128] sm:$0xf] %vm2233_vm5, %v2221_v43  ;;  %v1857_v61 = vld [vmem:[#allocation2 + $0x390] ss:$2 sm:$0xff] }
 0x1d1   :  { %v2220_v49 = vmax.f32 %v2160_v34, %v2162_v41  ;;  %1680 = vst.msk [vmem:[#allocation2 + $0x3b8] sm:$0xff] %vm1560_vm4, %v1535_v44  ;;  %v1298_v50 = vadd.f32 %v13247_v54, %v1297_v48  ;;  %v2049_v62 = vld [vmem:[#allocation2 + $0x391] ss:$2 sm:$0xff] }
 0x1d2   :  { %1679 = vst.msk [vmem:[#allocation2 + $0x3b0] sm:$0xff] %vm1560_vm4, %v1534_v46  ;;  %v1537_v52 = vmax.f32 %v1303_v47, 0.0  ;;  %v2164_v11 = vmax.f32 %v1857_v61, %v2049_v62  ;;  %v13478_v61 = vld [vmem:[#allocation3 + $0x40] sm:$0xff] }
 0x1d3   :  { %2269 = vst.msk [vmem:[#allocation3 + $0x120] sm:$0xff] %vm1560_vm4, %v2220_v49  ;;  %v1536_v53 = vmax.f32 %v1298_v50, 0.0  ;;  %v11061_v55 = vpop.f32.mrb[122].mxu0  ;;  %v2281_v49 = vld [vmem:[#allocation3] sm:$0xff] }
 0x1d4   :  { %1682 = vst.msk [vmem:[#allocation2 + $0x3c8] sm:$0xff] %vm1560_vm4, %v1537_v52  ;;  %v1313_v51 = vadd.f32 %v13247_v54, %v11061_v55  ;;  %v1307_v56 = vpop.f32.mrb[123].mxu0 }
 0x1d5   :  { %v1859_v57 = vld [vmem:[#allocation2 + $0x3a0] ss:$2 sm:$0xf]  ;;  %1681 = vst.msk [vmem:[#allocation2 + $0x3c0] sm:$0xff] %vm1560_vm4, %v1536_v53  ;;  %v1308_v58 = vadd.f32 %v13247_v54, %v1307_v56  ;;  %v13456_v56 = vld [vmem:[#allocation3 + $0x10] sm:$0xff] }
 0x1d6   :  { %v2051_v59 = vld [vmem:[#allocation2 + $0x3a1] ss:$2 sm:$0xf]  ;;  %v1539_v60 = vmax.f32 %v1313_v51, 0.0 }
 0x1d7   :  { %v1538_v63 = vmax.f32 %v1308_v58, 0.0  ;;  %v11064_v0 = vpop.f32.mrb[124].mxu0  ;;  %v2165_v5 = vmax.f32 %v1859_v57, %v2051_v59  ;;  %v13461_v57 = vld [vmem:[%s14903_s3 + $0x18] sm:$0xff]  ;;  %v13473_v58 = vld [vmem:[#allocation3 + $0x30] sm:$0xff] }
 0x1d8   :  { %v1863_v1 = vld [vmem:[#allocation2 + $0x3b8] ss:$2 sm:$0xf]  ;;  %v2055_v2 = vld [vmem:[#allocation2 + $0x3b9] ss:$2 sm:$0xf]  ;;  %v1323_v3 = vadd.f32 %v13247_v54, %v11064_v0 }
 0x1d9   :  { %1684 = vst.msk [vmem:[#allocation2 + $0x3d8] sm:$0xff] %vm1560_vm4, %v1539_v60  ;;  %v2167_v6 = vmax.f32 %v1863_v1, %v2055_v2  ;;  %v1861_v7 = vld [vmem:[#allocation2 + $0x3a8] ss:$2 sm:$0xff]  ;;  %v2053_v8 = vld [vmem:[#allocation2 + $0x3a9] ss:$2 sm:$0xff]  ;;  %1683 = vst.msk [vmem:[#allocation2 + $0x3d0] sm:$0xff] %vm1560_vm4, %v1538_v63 }
 0x1da   :  { %v1317_v9 = vpop.f32.mrb[125].mxu0  ;;  %v13427_v10 = vld [vmem:[#allocation3 + $0x121] sm:$0xff]  ;;  %v2166_v12 = vmax.f32 %v1861_v7, %v2053_v8  ;;  %v1541_v13 = vmax.f32 %v1323_v3, 0.0 }
 0x1db   :  { %v1318_v14 = vadd.f32 %v13247_v54, %v1317_v9  ;;  %11115 = vmatprep.mubr.msk.f32.mxu0 %vm1560_vm4, %v13427_v10  ;;  %11269 = vmatmul.mubr.msk.f32.gmra.mrb[10].mxu1 %vm1560_vm4, %v13427_v10  ;;  %v2223_v15 = vmax.f32 %v2165_v5, %v2167_v6  ;;  %v11067_v16 = vpop.f32.mrb[126].mxu0  ;;  %v3838_v5 = vld [vmem:[#allocation3 + $0x12] sm:$0xff]  ;;  %v13490_v8 = vld [vmem:[#allocation3 + $0x60] sm:$0xff] }
 0x1dc   :  { %1686 = vst.msk [vmem:[#allocation2 + $0x3e8] sm:$0xff] %vm1560_vm4, %v1541_v13  ;;  %v2222_v18 = vmax.f32 %v2164_v11, %v2166_v12  ;;  %v1333_v19 = vadd.f32 %v13247_v54, %v11067_v16  ;;  %v1327_v20 = vpop.f32.mrb[127].mxu0  ;;  %v1865_v30 = vld [vmem:[#allocation2 + $0x3c0] ss:$2 sm:$0xff]  ;;  %v2057_v31 = vld [vmem:[#allocation2 + $0x3c1] ss:$2 sm:$0xff] }
 0x1dd   :  { %v1540_v17 = vmax.f32 %v1318_v14, 0.0  ;;  %2272 = vst.msk [vmem:[#allocation3 + $0x138] sm:$0xf] %vm2233_vm5, %v2223_v15  ;;  %v1328_v21 = vadd.f32 %v13247_v54, %v1327_v20  ;;  %v2168_v42 = vmax.f32 %v1865_v30, %v2057_v31  ;;  %v13495_v14 = vld [vmem:[#allocation3 + $0x70] sm:$0xff]  ;;  %v13497_v15 = vld [vmem:[#allocation3 + $0x22] sm:$0xff] }
 0x1de   :  { %2271 = vst.msk [vmem:[#allocation3 + $0x130] sm:$0xff] %vm1560_vm4, %v2222_v18  ;;  %v1543_v22 = vmax.f32 %v1333_v19, 0.0  ;;  %v13502_v16 = vld [vmem:[%s14903_s3 + $0x48] sm:$0xff]  ;;  %v2289_v18 = vld [vmem:[#allocation3 + $0xc0] sm:$0xff]  ;;  %v13511_v19 = vld [vmem:[#allocation3 + $0x32] sm:$0xff] }
 0x1df   :  { %1685 = vst.msk [vmem:[#allocation2 + $0x3e0] sm:$0xff] %vm1560_vm4, %v1540_v17  ;;  %v1542_v23 = vmax.f32 %v1328_v21, 0.0  ;;  %v11070_v24 = vpop.f32.mrb[128].mxu0  ;;  %v13517_v20 = vld [vmem:[#allocation3 + $0xd0] sm:$0xff]  ;;  %v13519_v21 = vld [vmem:[#allocation3 + $0x42] sm:$0xff] }
 0x1e0   :  { %v1867_v25 = vld [vmem:[#allocation2 + $0x3d0] ss:$2 sm:$0xf]  ;;  %1688 = vst.msk [vmem:[#allocation2 + $0x3f8] sm:$0xff] %vm1560_vm4, %v1543_v22  ;;  %v1343_v26 = vadd.f32 %v13247_v54, %v11070_v24  ;;  %v1337_v28 = vpop.f32.mrb[129].mxu0  ;;  %v13535_v24 = vld [vmem:[#allocation3 + $0x62] sm:$0xff] }
 0x1e1   :  { %v2059_v27 = vld [vmem:[#allocation2 + $0x3d1] ss:$2 sm:$0xf]  ;;  %1687 = vst.msk [vmem:[#allocation2 + $0x3f0] sm:$0xff] %vm1560_vm4, %v1542_v23  ;;  %v1338_v33 = vadd.f32 %v13247_v54, %v1337_v28  ;;  %v13551_v28 = vld [vmem:[#allocation3 + $0x82] sm:$0xff] }
 0x1e2   :  { %v1545_v32 = vmax.f32 %v1343_v26, 0.0  ;;  %v2169_v37 = vmax.f32 %v1867_v25, %v2059_v27  ;;  %v13527_v22 = vld [vmem:[#allocation3 + $0x52] sm:$0xff]  ;;  %v13541_v25 = vld [vmem:[#allocation3 + $0x100] sm:$0xff] }
 0x1e3   :  { %v1871_v34 = vld [vmem:[#allocation2 + $0x3e8] ss:$2 sm:$0xf]  ;;  %v2063_v36 = vld [vmem:[#allocation2 + $0x3e9] ss:$2 sm:$0xf] }
 0x1e4   :  { %v2171_v38 = vmax.f32 %v1871_v34, %v2063_v36  ;;  %1690 = vst.msk [vmem:[#allocation2 + $0x408] sm:$0xff] %vm1560_vm4, %v1545_v32  ;;  %v1544_v39 = vmax.f32 %v1338_v33, 0.0  ;;  %v11073_v41 = vpop.f32.mrb[130].mxu0  ;;  %v13533_v23 = vld [vmem:[#allocation3 + $0xf0] sm:$0xff]  ;;  %v13557_v30 = vld [vmem:[#allocation3 + $0x120] sm:$0xff] }
 0x1e5   :  { %v13445_v45 = vld [vmem:[#allocation3 + $0x131] sm:$0xff]  ;;  %v1353_v46 = vadd.f32 %v13247_v54, %v11073_v41  ;;  %v1347_v47 = vpop.f32.mrb[131].mxu0  ;;  %v13564_v33 = vld [vmem:[#allocation3 + $0xe2] sm:$0xff] }
 0x1e6   :  { %v1869_v43 = vld [vmem:[#allocation2 + $0x3d8] ss:$2 sm:$0xff]  ;;  %v2061_v44 = vld [vmem:[#allocation2 + $0x3d9] ss:$2 sm:$0xff]  ;;  %11116 = vmatmul.mubr.msk.f32.gmra.mrb[158].mxu0 %vm1560_vm4, %v13445_v45  ;;  %11271 = vmatprep.mubr.msk.f32.mxu1 %vm1560_vm4, %v13445_v45  ;;  %v2225_v50 = vmax.f32 %v2169_v37, %v2171_v38  ;;  %1689 = vst.msk [vmem:[#allocation2 + $0x400] sm:$0xff] %vm1560_vm4, %v1544_v39  ;;  %v1348_v52 = vadd.f32 %v13247_v54, %v1347_v47  ;;  %v13549_v27 = vld [vmem:[#allocation3 + $0x110] sm:$0xff] }
 0x1e7   :  { %v2170_v48 = vmax.f32 %v1869_v43, %v2061_v44  ;;  %11120 = vmatprep.mubr.msk.f32.mxu0 %vm1560_vm4, %v2281_v49  ;;  %v1547_v53 = vmax.f32 %v1353_v46, 0.0  ;;  %v13466_v54 = vld [vmem:[#allocation3 + $0x20] sm:$0xff]  ;;  %v13543_v26 = vld [vmem:[#allocation3 + $0x72] sm:$0xff] }
 0x1e8   :  { %2274 = vst.msk [vmem:[#allocation3 + $0x148] sm:$0xf] %vm2233_vm5, %v2225_v50  ;;  %v1546_v51 = vmax.f32 %v1348_v52, 0.0  ;;  %v1873_v62 = vld [vmem:[#allocation2 + $0x3f0] ss:$2 sm:$0xff]  ;;  %v2702_v34 = vld [vmem:[#allocation3 + $0x2] sm:$0xff] }
 0x1e9   :  { %v2224_v55 = vmax.f32 %v2168_v42, %v2170_v48  ;;  %1692 = vst.msk [vmem:[#allocation2 + $0x418] sm:$0xff] %vm1560_vm4, %v1547_v53  ;;  %v2065_v63 = vld [vmem:[#allocation2 + $0x3f1] ss:$2 sm:$0xff]  ;;  %v13575_v37 = vld [vmem:[#allocation3 + $0x102] sm:$0xff] }
 0x1ea   :  { %11121 = vmatmul.mubr.msk.f32.vlgmr.msra.gmra.mrb[144].mxu0 %vm1560_vm4, %v13456_v56  ;;  %1691 = vst.msk [vmem:[#allocation2 + $0x410] sm:$0xff] %vm1560_vm4, %v1546_v51  ;;  %v2172_v6 = vmax.f32 %v1873_v62, %v2065_v63  ;;  %v3846_v31 = vld [vmem:[#allocation3 + $0xd2] sm:$0xff]  ;;  %v9813_v39 = vld [vmem:[%s14903_s3 + $0x20] sm:$0xff] }
 0x1eb   :  { %2273 = vst.msk [vmem:[#allocation3 + $0x140] sm:$0xff] %vm1560_vm4, %v2224_v55  ;;  %11123 = vmatprep.mubr.msk.f32.mxu0 %vm1560_vm4, %v13466_v54  ;;  %11145 = vmatpush3.msra.mxu0 %v13308_v29  ;;  %v13482_v29 = vld [vmem:[#allocation3 + $0x50] sm:$0xff]  ;;  %v13590_v41 = vld [vmem:[#allocation3 + $0x122] sm:$0xff] }
 0x1ec   :  { %11170 = vmatprep.subr.mxu0 %v13461_v57  ;;  %v13562_v32 = vld [vmem:[#allocation3 + $0x130] sm:$0xff]  ;;  %v13611_v46 = vld [vmem:[#allocation3 + $0x23] sm:$0xff] }
 0x1ed   :  { %v1875_v59 = vld [vmem:[#allocation2 + $0x400] ss:$2 sm:$0xf]  ;;  %v2067_v60 = vld [vmem:[#allocation2 + $0x401] ss:$2 sm:$0xf] }
 0x1ee   :  { %11124 = vmatmul.mubr.msk.f32.gmra.mrb[146].mxu0 %vm1560_vm4, %v13473_v58  ;;  %v2173_v0 = vmax.f32 %v1875_v59, %v2067_v60  ;;  %v13570_v36 = vld [vmem:[#allocation3 + $0xf2] sm:$0xff]  ;;  %v2710_v48 = vld [vmem:[#allocation3 + $0xc2] sm:$0xff] }
 0x1ef   :  { %11126 = vmatprep.mubr.msk.f32.mxu0 %vm1560_vm4, %v13478_v61  ;;  %v13580_v38 = vld [vmem:[#allocation3 + $0x112] sm:$0xff]  ;;  %v13626_v50 = vld [vmem:[#allocation3 + $0x43] sm:$0xff] }
 0x1f0   :  { %v1879_v1 = vld [vmem:[#allocation2 + $0x418] ss:$2 sm:$0xf]  ;;  %v2071_v2 = vld [vmem:[#allocation2 + $0x419] ss:$2 sm:$0xf] }
 0x1f1   :  { %v2175_v7 = vmax.f32 %v1879_v1, %v2071_v2  ;;  %v1877_v9 = vld [vmem:[#allocation2 + $0x408] ss:$2 sm:$0xff]  ;;  %v2069_v11 = vld [vmem:[#allocation2 + $0x409] ss:$2 sm:$0xff] }
 0x1f2   :  { %v13484_v3 = vld [vmem:[#allocation3 + $0x141] sm:$0xff]  ;;  %11127 = vmatmul.mubr.msk.f32.gmra.mrb[148].mxu0 %vm1560_vm4, %v13482_v29  ;;  %v2174_v12 = vmax.f32 %v1877_v9, %v2069_v11  ;;  %v13596_v42 = vld [vmem:[#allocation3 + $0x132] sm:$0xff] }
 0x1f3   :  { %11272 = vmatmul.mubr.msk.f32.gmra.mrb[12].mxu1 %vm1560_vm4, %v13484_v3  ;;  %11129 = vmatprep.mubr.msk.f32.mxu0 %vm1560_vm4, %v13490_v8  ;;  %v2227_v13 = vmax.f32 %v2173_v0, %v2175_v7  ;;  %v13602_v43 = vld [vmem:[#allocation3 + $0x142] sm:$0xff]  ;;  %v4065_v44 = vld [vmem:[#allocation3 + $0x13] sm:$0xff] }
 0x1f4   :  { %11276 = vmatprep.mubr.msk.f32.mxu1 %vm1560_vm4, %v3838_v5  ;;  %v2226_v17 = vmax.f32 %v2172_v6, %v2174_v12  ;;  %v9915_v47 = vld [vmem:[%s14903_s3 + $0x50] sm:$0xff]  ;;  %v13637_v53 = vld [vmem:[#allocation3 + $0x63] sm:$0xff]  ;;  %v9932_v11 = vld [vmem:[%s14903_s3 + $0x58] sm:$0xff] }
 0x1f5   :  { %2276 = vst.msk [vmem:[#allocation3 + $0x158] sm:$0xf] %vm2233_vm5, %v2227_v13  ;;  %v13622_v49 = vld [vmem:[#allocation3 + $0x33] sm:$0xff]  ;;  %v13649_v51 = vld [vmem:[#allocation3 + $0x83] sm:$0xff] }
 0x1f6   :  { %11130 = vmatmul.mubr.msk.f32.gmra.mrb[150].mxu0 %vm1560_vm4, %v13495_v14  ;;  %2275 = vst.msk [vmem:[#allocation3 + $0x150] sm:$0xff] %vm1560_vm4, %v2226_v17  ;;  %v13631_v52 = vld [vmem:[#allocation3 + $0x53] sm:$0xff]  ;;  %v13658_v59 = vld [vmem:[#allocation3 + $0xe3] sm:$0xff] }
 0x1f7   :  { %11277 = vmatmul.mubr.msk.f32.vlgmr.msra.gmra.mrb[14].mxu1 %vm1560_vm4, %v13497_v15  ;;  %11132 = vmatprep.mubr.msk.f32.mxu0 %vm1560_vm4, %v2289_v18  ;;  %v13643_v55 = vld [vmem:[#allocation3 + $0x73] sm:$0xff]  ;;  %v2929_v60 = vld [vmem:[#allocation3 + $0x3] sm:$0xff] }
 0x1f8   :  { %11301 = vmatpush3.msra.mxu1 %v13280_v35  ;;  %11279 = vmatprep.mubr.msk.f32.mxu1 %vm1560_vm4, %v13511_v19  ;;  %v13525_v35 = vld [vmem:[#allocation3 + $0xe0] sm:$0xff]  ;;  %v13664_v62 = vld [vmem:[#allocation3 + $0xf3] sm:$0xff]  ;;  %v9830_v1 = vld [vmem:[%s14903_s3 + $0x28] sm:$0xff] }
 0x1f9   :  { %11326 = vmatprep.subr.mxu1 %v13502_v16  ;;  %v13669_v63 = vld [vmem:[#allocation3 + $0x103] sm:$0xff]  ;;  %v13674_v0 = vld [vmem:[#allocation3 + $0x113] sm:$0xff] }
 0x1fa   :  { %11133 = vmatmul.mubr.msk.f32.gmra.mrb[152].mxu0 %vm1560_vm4, %v13517_v20  ;;  %v13683_v2 = vld [vmem:[#allocation3 + $0x123] sm:$0xff]  ;;  %v4292_v7 = vld [vmem:[#allocation3 + $0x14] sm:$0xff] }
 0x1fb   :  { %11280 = vmatmul.mubr.msk.f32.gmra.mrb[0].mxu1 %vm1560_vm4, %v13519_v21  ;;  %11135 = vmatprep.mubr.msk.f32.mxu0 %vm1560_vm4, %v13525_v35  ;;  %v13695_v6 = vld [vmem:[#allocation3 + $0x143] sm:$0xff]  ;;  %v13714_v13 = vld [vmem:[#allocation3 + $0x34] sm:$0xff] }
 0x1fc   :  { %11282 = vmatprep.mubr.msk.f32.mxu1 %vm1560_vm4, %v13527_v22  ;;  %v13704_v9 = vld [vmem:[#allocation3 + $0x24] sm:$0xff]  ;;  %v13723_v17 = vld [vmem:[#allocation3 + $0x54] sm:$0xff] }
 0x1fd   :  { %v2937_v12 = vld [vmem:[#allocation3 + $0xc3] sm:$0xff]  ;;  %14937 = vst [vmem:[#allocation9_spill] sm:$0xff] %v13723_v17 }
 0x1fe   :  { %11136 = vmatmul.mubr.msk.f32.gmra.mrb[154].mxu0 %vm1560_vm4, %v13533_v23  ;;  %v13729_v18 = vld [vmem:[#allocation3 + $0x64] sm:$0xff] }
 0x1ff   :  { %11283 = vmatmul.mubr.msk.f32.gmra.mrb[2].mxu1 %vm1560_vm4, %v13535_v24  ;;  %11138 = vmatprep.mubr.msk.f32.mxu0 %vm1560_vm4, %v13541_v25 }
 0x200   :  { %11285 = vmatprep.mubr.msk.f32.mxu1 %vm1560_vm4, %v13543_v26 }
 0x202   :  { %11139 = vmatmul.mubr.msk.f32.gmra.mrb[156].mxu0 %vm1560_vm4, %v13549_v27 }
 0x203   :  { %11286 = vmatmul.mubr.msk.f32.gmra.mrb[4].mxu1 %vm1560_vm4, %v13551_v28  ;;  %11141 = vmatprep.mubr.msk.f32.mxu0 %vm1560_vm4, %v13557_v30 }
 0x204   :  { %11288 = vmatprep.mubr.msk.f32.mxu1 %vm1560_vm4, %v3846_v31 }
 0x206   :  { %11142 = vmatmul.mubr.msk.f32.gmra.mrb[158].mxu0 %vm1560_vm4, %v13562_v32 }
 0x207   :  { %11289 = vmatmul.mubr.msk.f32.gmra.mrb[6].mxu1 %vm1560_vm4, %v13564_v33  ;;  %11146 = vmatprep.mubr.msk.f32.mxu0 %vm1560_vm4, %v2702_v34  ;;  %v13741_v34 = vld [vmem:[#allocation3 + $0x84] sm:$0xff] }
 0x208   :  { %11291 = vmatprep.mubr.msk.f32.mxu1 %vm1560_vm4, %v13570_v36  ;;  %14938 = vst [vmem:[#allocation10_spill] sm:$0xff] %v13741_v34 }
 0x20a   :  { %11147 = vmatmul.mubr.msk.f32.vlgmr.msra.gmra.mrb[144].mxu0 %vm1560_vm4, %v3838_v5  ;;  %v13689_v5 = vld [vmem:[#allocation3 + $0x133] sm:$0xff] }
 0x20b   :  { %11292 = vmatmul.mubr.msk.f32.gmra.mrb[8].mxu1 %vm1560_vm4, %v13575_v37  ;;  %11149 = vmatprep.mubr.msk.f32.mxu0 %vm1560_vm4, %v13497_v15 }
 0x20c   :  { %11294 = vmatprep.mubr.msk.f32.mxu1 %vm1560_vm4, %v13580_v38  ;;  %11171 = vmatpush3.msra.mxu0 %v13461_v57  ;;  %v4073_v57 = vld [vmem:[#allocation3 + $0xd3] sm:$0xff] }
 0x20d   :  { %11196 = vmatprep.subr.mxu0 %v9813_v39 }
 0x20e   :  { %11150 = vmatmul.mubr.msk.f32.gmra.mrb[146].mxu0 %vm1560_vm4, %v13511_v19 }
 0x20f   :  { %11295 = vmatmul.mubr.msk.f32.gmra.mrb[10].mxu1 %vm1560_vm4, %v13590_v41  ;;  %11152 = vmatprep.mubr.msk.f32.mxu0 %vm1560_vm4, %v13519_v21 }
 0x210   :  { %11297 = vmatprep.mubr.msk.f32.mxu1 %vm1560_vm4, %v13596_v42 }
 0x212   :  { %11153 = vmatmul.mubr.msk.f32.gmra.mrb[148].mxu0 %vm1560_vm4, %v13527_v22 }
 0x213   :  { %11298 = vmatmul.mubr.msk.f32.gmra.mrb[12].mxu1 %vm1560_vm4, %v13602_v43  ;;  %11155 = vmatprep.mubr.msk.f32.mxu0 %vm1560_vm4, %v13535_v24 }
 0x214   :  { %11302 = vmatprep.mubr.msk.f32.mxu1 %vm1560_vm4, %v4065_v44 }
 0x216   :  { %11156 = vmatmul.mubr.msk.f32.gmra.mrb[150].mxu0 %vm1560_vm4, %v13543_v26 }
 0x217   :  { %11303 = vmatmul.mubr.msk.f32.vlgmr.msra.gmra.mrb[14].mxu1 %vm1560_vm4, %v13611_v46  ;;  %11158 = vmatprep.mubr.msk.f32.mxu0 %vm1560_vm4, %v2710_v48  ;;  %v13756_v48 = vld [vmem:[#allocation3 + $0xf4] sm:$0xff] }
 0x218   :  { %11327 = vmatpush3.msra.mxu1 %v13502_v16  ;;  %11305 = vmatprep.mubr.msk.f32.mxu1 %vm1560_vm4, %v13622_v49  ;;  %v13718_v16 = vld [vmem:[#allocation3 + $0x44] sm:$0xff]  ;;  %14940 = vst [vmem:[#allocation12_spill] sm:$0xff] %v13756_v48 }
 0x219   :  { %11352 = vmatprep.subr.mxu1 %v9915_v47 }
 0x21a   :  { %11159 = vmatmul.mubr.msk.f32.gmra.mrb[152].mxu0 %vm1560_vm4, %v3846_v31  ;;  %v13735_v31 = vld [vmem:[#allocation3 + $0x74] sm:$0xff] }
 0x21b   :  { %11306 = vmatmul.mubr.msk.f32.gmra.mrb[0].mxu1 %vm1560_vm4, %v13626_v50  ;;  %11161 = vmatprep.mubr.msk.f32.mxu0 %vm1560_vm4, %v13564_v33 }
 0x21c   :  { %11308 = vmatprep.mubr.msk.f32.mxu1 %vm1560_vm4, %v13631_v52 }
 0x21e   :  { %11162 = vmatmul.mubr.msk.f32.gmra.mrb[154].mxu0 %vm1560_vm4, %v13570_v36 }
 0x21f   :  { %11309 = vmatmul.mubr.msk.f32.gmra.mrb[2].mxu1 %vm1560_vm4, %v13637_v53  ;;  %11164 = vmatprep.mubr.msk.f32.mxu0 %vm1560_vm4, %v13575_v37 }
 0x220   :  { %11311 = vmatprep.mubr.msk.f32.mxu1 %vm1560_vm4, %v13643_v55 }
 0x222   :  { %11165 = vmatmul.mubr.msk.f32.gmra.mrb[156].mxu0 %vm1560_vm4, %v13580_v38 }
 0x223   :  { %11312 = vmatmul.mubr.msk.f32.gmra.mrb[4].mxu1 %vm1560_vm4, %v13649_v51  ;;  %11167 = vmatprep.mubr.msk.f32.mxu0 %vm1560_vm4, %v13590_v41 }
 0x224   :  { %11314 = vmatprep.mubr.msk.f32.mxu1 %vm1560_vm4, %v4073_v57 }
 0x226   :  { %11168 = vmatmul.mubr.msk.f32.gmra.mrb[158].mxu0 %vm1560_vm4, %v13596_v42 }
 0x227   :  { %11315 = vmatmul.mubr.msk.f32.gmra.mrb[6].mxu1 %vm1560_vm4, %v13658_v59  ;;  %11172 = vmatprep.mubr.msk.f32.mxu0 %vm1560_vm4, %v2929_v60  ;;  %v13766_v60 = vld [vmem:[#allocation3 + $0x114] sm:$0xff] }
 0x228   :  { %11317 = vmatprep.mubr.msk.f32.mxu1 %vm1560_vm4, %v13664_v62  ;;  %14942 = vst [vmem:[#allocation14_spill] sm:$0xff] %v13766_v60 }
 0x22a   :  { %11173 = vmatmul.mubr.msk.f32.vlgmr.msra.gmra.mrb[144].mxu0 %vm1560_vm4, %v4065_v44  ;;  %v13750_v44 = vld [vmem:[#allocation3 + $0xe4] sm:$0xff] }
 0x22b   :  { %11318 = vmatmul.mubr.msk.f32.gmra.mrb[8].mxu1 %vm1560_vm4, %v13669_v63  ;;  %11175 = vmatprep.mubr.msk.f32.mxu0 %vm1560_vm4, %v13611_v46  ;;  %14939 = vst [vmem:[#allocation11_spill] sm:$0xff] %v13750_v44 }
 0x22c   :  { %11320 = vmatprep.mubr.msk.f32.mxu1 %vm1560_vm4, %v13674_v0  ;;  %11197 = vmatpush3.msra.mxu0 %v9813_v39  ;;  %v4300_v39 = vld [vmem:[#allocation3 + $0xd4] sm:$0xff] }
 0x22d   :  { %11222 = vmatprep.subr.mxu0 %v9830_v1 }
 0x22e   :  { %11176 = vmatmul.mubr.msk.f32.gmra.mrb[146].mxu0 %vm1560_vm4, %v13622_v49 }
 0x22f   :  { %11321 = vmatmul.mubr.msk.f32.gmra.mrb[10].mxu1 %vm1560_vm4, %v13683_v2  ;;  %11178 = vmatprep.mubr.msk.f32.mxu0 %vm1560_vm4, %v13626_v50 }
 0x230   :  { %11323 = vmatprep.mubr.msk.f32.mxu1 %vm1560_vm4, %v13689_v5 }
 0x232   :  { %11179 = vmatmul.mubr.msk.f32.gmra.mrb[148].mxu0 %vm1560_vm4, %v13631_v52 }
 0x233   :  { %11324 = vmatmul.mubr.msk.f32.gmra.mrb[12].mxu1 %vm1560_vm4, %v13695_v6  ;;  %11181 = vmatprep.mubr.msk.f32.mxu0 %vm1560_vm4, %v13637_v53 }
 0x234   :  { %11328 = vmatprep.mubr.msk.f32.mxu1 %vm1560_vm4, %v4292_v7 }
 0x236   :  { %11182 = vmatmul.mubr.msk.f32.gmra.mrb[150].mxu0 %vm1560_vm4, %v13643_v55 }
 0x237   :  { %11329 = vmatmul.mubr.msk.f32.vlgmr.msra.gmra.mrb[14].mxu1 %vm1560_vm4, %v13704_v9  ;;  %11184 = vmatprep.mubr.msk.f32.mxu0 %vm1560_vm4, %v2937_v12  ;;  %v13772_v12 = vld [vmem:[#allocation3 + $0x124] sm:$0xff] }
 0x238   :  { %11353 = vmatpush3.msra.mxu1 %v9915_v47  ;;  %11331 = vmatprep.mubr.msk.f32.mxu1 %vm1560_vm4, %v13714_v13  ;;  %v3156_v47 = vld [vmem:[#allocation3 + $0x4] sm:$0xff]  ;;  %14943 = vst [vmem:[#allocation15_spill] sm:$0xff] %v13772_v12 }
 0x239   :  { %11378 = vmatprep.subr.mxu1 %v9932_v11 }
 0x23a   :  { %11185 = vmatmul.mubr.msk.f32.gmra.mrb[152].mxu0 %vm1560_vm4, %v4073_v57  ;;  %v13761_v57 = vld [vmem:[#allocation3 + $0x104] sm:$0xff] }
 0x23b   :  { %11332 = vmatmul.mubr.msk.f32.gmra.mrb[0].mxu1 %vm1560_vm4, %v13718_v16  ;;  %11187 = vmatprep.mubr.msk.f32.mxu0 %vm1560_vm4, %v13658_v59  ;;  %14941 = vst [vmem:[#allocation13_spill] sm:$0xff] %v13761_v57 }
 0x23c   :  { %11334 = vmatprep.mubr.msk.f32.mxu1 %vm1560_vm4, %v13723_v17 }
 0x23e   :  { %11188 = vmatmul.mubr.msk.f32.gmra.mrb[154].mxu0 %vm1560_vm4, %v13664_v62 }
 0x23f   :  { %11335 = vmatmul.mubr.msk.f32.gmra.mrb[2].mxu1 %vm1560_vm4, %v13729_v18  ;;  %11190 = vmatprep.mubr.msk.f32.mxu0 %vm1560_vm4, %v13669_v63 }
 0x240   :  { %11337 = vmatprep.mubr.msk.f32.mxu1 %vm1560_vm4, %v13735_v31 }
 0x242   :  { %11191 = vmatmul.mubr.msk.f32.gmra.mrb[156].mxu0 %vm1560_vm4, %v13674_v0 }
 0x243   :  { %11338 = vmatmul.mubr.msk.f32.gmra.mrb[4].mxu1 %vm1560_vm4, %v13741_v34  ;;  %11193 = vmatprep.mubr.msk.f32.mxu0 %vm1560_vm4, %v13683_v2  ;;  %v13800_v34 = vld [vmem:[%s14903_s3 + $0x60] sm:$0xff] }
 0x244   :  { %11340 = vmatprep.mubr.msk.f32.mxu1 %vm1560_vm4, %v4300_v39 }
 0x246   :  { %11194 = vmatmul.mubr.msk.f32.gmra.mrb[158].mxu0 %vm1560_vm4, %v13689_v5 }
 0x247   :  { %11341 = vmatmul.mubr.msk.f32.gmra.mrb[6].mxu1 %vm1560_vm4, %v13750_v44  ;;  %11198 = vmatprep.mubr.msk.f32.mxu0 %vm1560_vm4, %v3156_v47  ;;  %v12394_v47 = vld [vmem:[%s14903_s3 + $0x30] sm:$0xff] }
 0x248   :  { %11343 = vmatprep.mubr.msk.f32.mxu1 %vm1560_vm4, %v13756_v48 }
 0x24a   :  { %11199 = vmatmul.mubr.msk.f32.vlgmr.msra.gmra.mrb[144].mxu0 %vm1560_vm4, %v4292_v7  ;;  %v13781_v7 = vld [vmem:[#allocation3 + $0x134] sm:$0xff] }
 0x24b   :  { %11344 = vmatmul.mubr.msk.f32.gmra.mrb[8].mxu1 %vm1560_vm4, %v13761_v57  ;;  %11201 = vmatprep.mubr.msk.f32.mxu0 %vm1560_vm4, %v13704_v9  ;;  %14944 = vst [vmem:[#allocation16_spill] sm:$0xff] %v13781_v7 }
 0x24c   :  { %11346 = vmatprep.mubr.msk.f32.mxu1 %vm1560_vm4, %v13766_v60  ;;  %11223 = vmatpush3.msra.mxu0 %v9830_v1  ;;  %v13787_v1 = vld [vmem:[#allocation3 + $0x144] sm:$0xff] }
 0x24d   :  { %11248 = vmatprep.subr.mxu0 %v12394_v47  ;;  %14945 = vst [vmem:[#allocation17_spill] sm:$0xff] %v13787_v1 }
 0x24e   :  { %11202 = vmatmul.mubr.msk.f32.gmra.mrb[146].mxu0 %vm1560_vm4, %v13714_v13 }
 0x24f   :  { %11347 = vmatmul.mubr.msk.f32.gmra.mrb[10].mxu1 %vm1560_vm4, %v13772_v12  ;;  %11204 = vmatprep.mubr.msk.f32.mxu0 %vm1560_vm4, %v13718_v16 }
 0x250   :  { %11349 = vmatprep.mubr.msk.f32.mxu1 %vm1560_vm4, %v13781_v7 }
 0x252   :  { %11205 = vmatmul.mubr.msk.f32.gmra.mrb[148].mxu0 %vm1560_vm4, %v13723_v17  ;;  %v3164_v17 = vld [vmem:[#allocation3 + $0xc4] sm:$0xff] }
 0x253   :  { %11350 = vmatmul.mubr.msk.f32.gmra.mrb[12].mxu1 %vm1560_vm4, %v13787_v1  ;;  %11207 = vmatprep.mubr.msk.f32.mxu0 %vm1560_vm4, %v13729_v18 }
 0x254   :  { %11354 = vmatprep.mubr.msk.f32.mxu1 %vm1560_vm4, %v13466_v54 }
 0x256   :  { %11208 = vmatmul.mubr.msk.f32.gmra.mrb[150].mxu0 %vm1560_vm4, %v13735_v31 }
 0x257   :  { %11355 = vmatmul.mubr.msk.f32.vlgmr.msra.gmra.mrb[14].mxu1 %vm1560_vm4, %v13473_v58  ;;  %11210 = vmatprep.mubr.msk.f32.mxu0 %vm1560_vm4, %v3164_v17  ;;  %v13827_v17 = vld [vmem:[#allocation3 + $0x90] sm:$0xff] }
 0x258   :  { %11379 = vmatpush3.msra.mxu1 %v9932_v11  ;;  %11357 = vmatprep.mubr.msk.f32.mxu1 %vm1560_vm4, %v13478_v61  ;;  %v13821_v11 = vld [vmem:[#allocation3 + $0x80] sm:$0xff]  ;;  %14946 = vst [vmem:[#allocation18_spill] sm:$0xff] %v13827_v17 }
 0x259   :  { %11404 = vmatprep.subr.mxu1 %v13800_v34 }
 0x25a   :  { %11211 = vmatmul.mubr.msk.f32.gmra.mrb[152].mxu0 %vm1560_vm4, %v4300_v39  ;;  %v11076_v39 = vpop.f32.mrb[132].mxu0 }
 0x25b   :  { %11358 = vmatmul.mubr.msk.f32.gmra.mrb[0].mxu1 %vm1560_vm4, %v13482_v29  ;;  %11213 = vmatprep.mubr.msk.f32.mxu0 %vm1560_vm4, %v13750_v44  ;;  %v1357_v1 = vpop.f32.mrb[133].mxu0 }
 0x25c   :  { %11360 = vmatprep.mubr.msk.f32.mxu1 %vm1560_vm4, %v13490_v8 }
 0x25e   :  { %11214 = vmatmul.mubr.msk.f32.gmra.mrb[154].mxu0 %vm1560_vm4, %v13756_v48 }
 0x25f   :  { %11361 = vmatmul.mubr.msk.f32.gmra.mrb[2].mxu1 %vm1560_vm4, %v13495_v14  ;;  %11216 = vmatprep.mubr.msk.f32.mxu0 %vm1560_vm4, %v13761_v57 }
 0x260   :  { %11363 = vmatprep.mubr.msk.f32.mxu1 %vm1560_vm4, %v13821_v11 }
 0x262   :  { %11217 = vmatmul.mubr.msk.f32.gmra.mrb[156].mxu0 %vm1560_vm4, %v13766_v60 }
 0x263   :  { %11364 = vmatmul.mubr.msk.f32.gmra.mrb[4].mxu1 %vm1560_vm4, %v13827_v17  ;;  %11219 = vmatprep.mubr.msk.f32.mxu0 %vm1560_vm4, %v13772_v12 }
 0x264   :  { %11366 = vmatprep.mubr.msk.f32.mxu1 %vm1560_vm4, %v13525_v35 }
 0x266   :  { %11220 = vmatmul.mubr.msk.f32.gmra.mrb[158].mxu0 %vm1560_vm4, %v13781_v7  ;;  %v11079_v7 = vpop.f32.mrb[134].mxu0 }
 0x267   :  { %11367 = vmatmul.mubr.msk.f32.gmra.mrb[6].mxu1 %vm1560_vm4, %v13533_v23  ;;  %11224 = vmatprep.mubr.msk.f32.mxu0 %vm1560_vm4, %v13456_v56  ;;  %v13856_v56 = vld [vmem:[%s14902_s2] ss:$0 sm:$0xff]  ;;  %v1367_v57 = vpop.f32.mrb[135].mxu0 }
 0x268   :  { %11369 = vmatprep.mubr.msk.f32.mxu1 %vm1560_vm4, %v13541_v25  ;;  %v1363_v17 = vadd.f32 %v13856_v56, %v11076_v39  ;;  %v1373_v60 = vadd.f32 %v13856_v56, %v11079_v7  ;;  %v1368_v39 = vadd.f32 %v13856_v56, %v1367_v57  ;;  %v11082_v44 = vpop.f32.mrb[136].mxu0 }
 0x269   :  { %v1377_v7 = vpop.f32.mrb[137].mxu0 }
 0x26a   :  { %11225 = vmatmul.mubr.msk.f32.vlgmr.msra.gmra.mrb[144].mxu0 %vm1560_vm4, %v13466_v54  ;;  %v1358_v54 = vadd.f32 %v13856_v56, %v1357_v1  ;;  %v1549_v12 = vmax.f32 %v1363_v17, 0.0  ;;  %v1550_v1 = vmax.f32 %v1368_v39, 0.0  ;;  %v1378_v17 = vadd.f32 %v13856_v56, %v1377_v7 }
 0x26b   :  { %11370 = vmatmul.mubr.msk.f32.gmra.mrb[8].mxu1 %vm1560_vm4, %v13549_v27  ;;  %11227 = vmatprep.mubr.msk.f32.mxu0 %vm1560_vm4, %v13473_v58  ;;  %v13865_v58 = vld [vmem:[#allocation3 + $0x140] sm:$0xff] }
 0x26c   :  { %11372 = vmatprep.mubr.msk.f32.mxu1 %vm1560_vm4, %v13557_v30  ;;  %11249 = vmatpush3.msra.mxu0 %v12394_v47  ;;  %v1548_v48 = vmax.f32 %v1358_v54, 0.0  ;;  %1694 = vst.msk [vmem:[#allocation2 + $0x428] sm:$0xff] %vm1560_vm4, %v1549_v12  ;;  %v1551_v47 = vmax.f32 %v1373_v60, 0.0  ;;  %v13876_v54 = vld [vmem:[#allocation3 + $0x150] sm:$0xff]  ;;  %1695 = vst.msk [vmem:[#allocation2 + $0x430] sm:$0xff] %vm1560_vm4, %v1550_v1  ;;  %v13907_v12 = vld [vmem:[#allocation3 + $0x61] sm:$0xff] }
 0x26d   :  { %v13903_v60 = vld [vmem:[#allocation3 + $0x51] sm:$0xff] }
 0x26e   :  { %11228 = vmatmul.mubr.msk.f32.gmra.mrb[146].mxu0 %vm1560_vm4, %v13478_v61  ;;  %v1383_v61 = vadd.f32 %v13856_v56, %v11082_v44  ;;  %1693 = vst.msk [vmem:[#allocation2 + $0x420] sm:$0xff] %vm1560_vm4, %v1548_v48  ;;  %1696 = vst.msk [vmem:[#allocation2 + $0x438] sm:$0xff] %vm1560_vm4, %v1551_v47  ;;  %v1552_v44 = vmax.f32 %v1378_v17, 0.0  ;;  %v13889_v48 = vld [vmem:[#allocation3 + $0x31] sm:$0xff] }
 0x26f   :  { %11373 = vmatmul.mubr.msk.f32.gmra.mrb[10].mxu1 %vm1560_vm4, %v13562_v32  ;;  %11230 = vmatprep.mubr.msk.f32.mxu0 %vm1560_vm4, %v13482_v29  ;;  %v4747_v29 = vld [vmem:[#allocation3 + $0x21] sm:$0xff]  ;;  %14947 = vst [vmem:[#allocation19_spill] sm:$0xff] %v13889_v48  ;;  %14949 = vst [vmem:[#allocation21_spill] sm:$0xff] %v13903_v60 }
 0x270   :  { %11375 = vmatprep.mubr.msk.f32.mxu1 %vm1560_vm4, %v13865_v58  ;;  %v1553_v57 = vmax.f32 %v1383_v61, 0.0  ;;  %1697 = vst.msk [vmem:[#allocation2 + $0x440] sm:$0xff] %vm1560_vm4, %v1552_v44 }
 0x272   :  { %11231 = vmatmul.mubr.msk.f32.gmra.mrb[148].mxu0 %vm1560_vm4, %v13490_v8  ;;  %1698 = vst.msk [vmem:[#allocation2 + $0x448] sm:$0xff] %vm1560_vm4, %v1553_v57  ;;  %v9966_v8 = vld [vmem:[%s14903_s3 + $0x68] sm:$0xff]  ;;  %v13917_v57 = vld [vmem:[#allocation3 + $0x71] sm:$0xff] }
 0x273   :  { %11376 = vmatmul.mubr.msk.f32.gmra.mrb[12].mxu1 %vm1560_vm4, %v13876_v54  ;;  %11233 = vmatprep.mubr.msk.f32.mxu0 %vm1560_vm4, %v13495_v14  ;;  %v13901_v14 = vld [vmem:[#allocation3 + $0x41] sm:$0xff]  ;;  %v1883_v61 = vld [vmem:[#allocation2 + $0x430] ss:$2 sm:$0xf] }
 0x274   :  { %11380 = vmatprep.mubr.msk.f32.mxu1 %vm1560_vm4, %v4747_v29  ;;  %14948 = vst [vmem:[#allocation20_spill] sm:$0xff] %v13901_v14  ;;  %v2075_v7 = vld [vmem:[#allocation2 + $0x431] ss:$2 sm:$0xf] }
 0x275   :  { %v1881_v39 = vld [vmem:[#allocation2 + $0x420] ss:$2 sm:$0xff]  ;;  %v2073_v47 = vld [vmem:[#allocation2 + $0x421] ss:$2 sm:$0xff] }
 0x276   :  { %11234 = vmatmul.mubr.msk.f32.gmra.mrb[150].mxu0 %vm1560_vm4, %v13821_v11  ;;  %v2176_v44 = vmax.f32 %v1881_v39, %v2073_v47 }
 0x277   :  { %11381 = vmatmul.mubr.msk.f32.vlgmr.msra.gmra.mrb[14].mxu1 %vm1560_vm4, %v13889_v48  ;;  %11236 = vmatprep.mubr.msk.f32.mxu0 %vm1560_vm4, %v13517_v20  ;;  %v1885_v1 = vld [vmem:[#allocation2 + $0x438] ss:$2 sm:$0xff]  ;;  %v2077_v17 = vld [vmem:[#allocation2 + $0x439] ss:$2 sm:$0xff] }
 0x278   :  { %11405 = vmatpush3.msra.mxu1 %v13800_v34  ;;  %11383 = vmatprep.mubr.msk.f32.mxu1 %vm1560_vm4, %v13901_v14  ;;  %v2178_v14 = vmax.f32 %v1885_v1, %v2077_v17  ;;  %v14132_v1 = vld [vmem:[#allocation3 + $0x130] sm:$0xff] }
 0x279   :  { %11430 = vmatprep.subr.mxu1 %v9966_v8  ;;  %v1887_v20 = vld [vmem:[#allocation2 + $0x448] ss:$2 sm:$0xf]  ;;  %v2079_v34 = vld [vmem:[#allocation2 + $0x449] ss:$2 sm:$0xf] }
 0x27a   :  { %11237 = vmatmul.mubr.msk.f32.gmra.mrb[152].mxu0 %vm1560_vm4, %v13525_v35  ;;  %v13923_v35 = vld [vmem:[#allocation3 + $0x81] sm:$0xff]  ;;  %v2179_v48 = vmax.f32 %v1887_v20, %v2079_v34  ;;  %v2228_v39 = vmax.f32 %v2176_v44, %v2178_v14  ;;  %v14961_v14 = vld [vmem:[#allocation18_spill] sm:$0xff]  ;;  %v14962_v44 = vld [vmem:[#allocation19_spill] sm:$0xff] }
 0x27b   :  { %11384 = vmatmul.mubr.msk.f32.gmra.mrb[0].mxu1 %vm1560_vm4, %v13903_v60  ;;  %11239 = vmatprep.mubr.msk.f32.mxu0 %vm1560_vm4, %v13533_v23  ;;  %v2177_v60 = vmax.f32 %v1883_v61, %v2075_v7  ;;  %v13929_v23 = vld [vmem:[#allocation3 + $0x91] sm:$0xff]  ;;  %v14120_v7 = vld [vmem:[#allocation3 + $0x100] sm:$0xff] }
 0x27c   :  { %11386 = vmatprep.mubr.msk.f32.mxu1 %vm1560_vm4, %v13907_v12  ;;  %2277 = vst.msk [vmem:[#allocation3 + $0x160] sm:$0xff] %vm1560_vm4, %v2228_v39  ;;  %v5664_v61 = vld [vmem:[#allocation3 + $0xf0] sm:$0xff]  ;;  %v14128_v34 = vld [vmem:[#allocation3 + $0x120] sm:$0xff] }
 0x27d   :  { %v2229_v47 = vmax.f32 %v2177_v60, %v2179_v48  ;;  %v14103_v48 = vld [vmem:[#allocation3 + $0x60] sm:$0xff]  ;;  %v14124_v20 = vld [vmem:[#allocation3 + $0x110] sm:$0xff] }
 0x27e   :  { %11240 = vmatmul.mubr.msk.f32.gmra.mrb[154].mxu0 %vm1560_vm4, %v13541_v25  ;;  %v4755_v25 = vld [vmem:[#allocation3 + $0xe1] sm:$0xff]  ;;  %v10051_v39 = vld [vmem:[%s14903_s3 + $0x90] sm:$0xff] }
 0x27f   :  { %11387 = vmatmul.mubr.msk.f32.gmra.mrb[2].mxu1 %vm1560_vm4, %v13917_v57  ;;  %11242 = vmatprep.mubr.msk.f32.mxu0 %vm1560_vm4, %v13549_v27  ;;  %2278 = vst.msk [vmem:[#allocation3 + $0x168] sm:$0xf] %vm2233_vm5, %v2229_v47  ;;  %v13940_v27 = vld [vmem:[#allocation3 + $0xf1] sm:$0xff]  ;;  %v14115_v60 = vld [vmem:[#allocation3 + $0xa0] sm:$0xff] }
 0x280   :  { %11389 = vmatprep.mubr.msk.f32.mxu1 %vm1560_vm4, %v13923_v35  ;;  %v14964_v47 = vld [vmem:[#allocation21_spill] sm:$0xff] }
 0x282   :  { %11243 = vmatmul.mubr.msk.f32.gmra.mrb[156].mxu0 %vm1560_vm4, %v13557_v30  ;;  %v3611_v30 = vld [vmem:[#allocation3 + $0x11] sm:$0xff] }
 0x283   :  { %11390 = vmatmul.mubr.msk.f32.gmra.mrb[4].mxu1 %vm1560_vm4, %v13929_v23  ;;  %11245 = vmatprep.mubr.msk.f32.mxu0 %vm1560_vm4, %v13562_v32  ;;  %v13958_v32 = vld [vmem:[#allocation3 + $0x151] sm:$0xff]  ;;  %v14140_v17 = vld [vmem:[#allocation3 + $0x160] sm:$0xff] }
 0x284   :  { %11392 = vmatprep.mubr.msk.f32.mxu1 %vm1560_vm4, %v4755_v25  ;;  %v14963_v25 = vld [vmem:[#allocation20_spill] sm:$0xff] }
 0x286   :  { %11246 = vmatmul.mubr.msk.f32.gmra.mrb[158].mxu0 %vm1560_vm4, %v13865_v58 }
 0x287   :  { %11393 = vmatmul.mubr.msk.f32.gmra.mrb[6].mxu1 %vm1560_vm4, %v13940_v27  ;;  %11250 = vmatprep.mubr.msk.f32.mxu0 %vm1560_vm4, %v3611_v30 }
 0x288   :  { %11395 = vmatprep.mubr.msk.f32.mxu1 %vm1560_vm4, %v13387_v4  ;;  %v9983_v4 = vld [vmem:[%s14903_s3 + $0x70] sm:$0xff] }
 0x28a   :  { %11251 = vmatmul.mubr.msk.f32.vlgmr.msra.gmra.mrb[144].mxu0 %vm1560_vm4, %v4747_v29  ;;  %v14099_v29 = vld [vmem:[#allocation3 + $0x50] sm:$0xff] }
 0x28b   :  { %11396 = vmatmul.mubr.msk.f32.gmra.mrb[8].mxu1 %vm1560_vm4, %v13406_v40  ;;  %v13979_v40 = vld [vmem:[#allocation3 + $0x92] sm:$0xff] }
 0x28c   :  { %11398 = vmatprep.mubr.msk.f32.mxu1 %vm1560_vm4, %v13427_v10  ;;  %v13997_v10 = vld [vmem:[#allocation3 + $0x152] sm:$0xff] }
 0x28f   :  { %11399 = vmatmul.mubr.msk.f32.gmra.mrb[10].mxu1 %vm1560_vm4, %v13445_v45  ;;  %v10000_v45 = vld [vmem:[%s14903_s3 + $0x78] sm:$0xff] }
 0x290   :  { %11401 = vmatprep.mubr.msk.f32.mxu1 %vm1560_vm4, %v13484_v3  ;;  %v11085_v3 = vpop.f32.mrb[138].mxu0 }
 0x293   :  { %11402 = vmatmul.mubr.msk.f32.gmra.mrb[12].mxu1 %vm1560_vm4, %v13958_v32 }
 0x294   :  { %11406 = vmatprep.mubr.msk.f32.mxu1 %vm1560_vm4, %v13497_v15  ;;  %v1393_v15 = vadd.f32 %v13856_v56, %v11085_v3 }
 0x297   :  { %11407 = vmatmul.mubr.msk.f32.vlgmr.msra.gmra.mrb[14].mxu1 %vm1560_vm4, %v13511_v19  ;;  %v1387_v19 = vpop.f32.mrb[139].mxu0 }
 0x298   :  { %11431 = vmatpush3.msra.mxu1 %v9966_v8  ;;  %11409 = vmatprep.mubr.msk.f32.mxu1 %vm1560_vm4, %v13519_v21  ;;  %v1388_v21 = vadd.f32 %v13856_v56, %v1387_v19  ;;  %v14107_v8 = vld [vmem:[#allocation3 + $0x70] sm:$0xff] }
 0x299   :  { %11456 = vmatprep.subr.mxu1 %v9983_v4 }
 0x29b   :  { %11410 = vmatmul.mubr.msk.f32.gmra.mrb[0].mxu1 %vm1560_vm4, %v13527_v22  ;;  %v11088_v22 = vpop.f32.mrb[140].mxu0 }
 0x29c   :  { %11412 = vmatprep.mubr.msk.f32.mxu1 %vm1560_vm4, %v13535_v24  ;;  %v1555_v24 = vmax.f32 %v1393_v15, 0.0 }
 0x29e   :  { %1700 = vst.msk [vmem:[#allocation2 + $0x458] sm:$0xff] %vm1560_vm4, %v1555_v24 }
 0x29f   :  { %11413 = vmatmul.mubr.msk.f32.gmra.mrb[2].mxu1 %vm1560_vm4, %v13543_v26  ;;  %v1403_v26 = vadd.f32 %v13856_v56, %v11088_v22 }
 0x2a0   :  { %11415 = vmatprep.mubr.msk.f32.mxu1 %vm1560_vm4, %v13551_v28  ;;  %v1397_v28 = vpop.f32.mrb[141].mxu0 }
 0x2a3   :  { %11416 = vmatmul.mubr.msk.f32.gmra.mrb[4].mxu1 %vm1560_vm4, %v13979_v40 }
 0x2a4   :  { %11418 = vmatprep.mubr.msk.f32.mxu1 %vm1560_vm4, %v13564_v33  ;;  %v1554_v33 = vmax.f32 %v1388_v21, 0.0 }
 0x2a6   :  { %1699 = vst.msk [vmem:[#allocation2 + $0x450] sm:$0xff] %vm1560_vm4, %v1554_v33 }
 0x2a7   :  { %11419 = vmatmul.mubr.msk.f32.gmra.mrb[6].mxu1 %vm1560_vm4, %v13570_v36  ;;  %v1398_v36 = vadd.f32 %v13856_v56, %v1397_v28 }
 0x2a8   :  { %11421 = vmatprep.mubr.msk.f32.mxu1 %vm1560_vm4, %v13575_v37  ;;  %v11091_v37 = vpop.f32.mrb[142].mxu0 }
 0x2ab   :  { %11422 = vmatmul.mubr.msk.f32.gmra.mrb[8].mxu1 %vm1560_vm4, %v13580_v38  ;;  %v1557_v38 = vmax.f32 %v1403_v26, 0.0 }
 0x2ac   :  { %11424 = vmatprep.mubr.msk.f32.mxu1 %vm1560_vm4, %v13590_v41  ;;  %v1413_v41 = vadd.f32 %v13856_v56, %v11091_v37 }
 0x2ad   :  { %1702 = vst.msk [vmem:[#allocation2 + $0x468] sm:$0xff] %vm1560_vm4, %v1557_v38  ;;  %v1889_v30 = vld [vmem:[#allocation2 + $0x450] ss:$2 sm:$0xff]  ;;  %v2081_v19 = vld [vmem:[#allocation2 + $0x451] ss:$2 sm:$0xff] }
 0x2ae   :  { %v2180_v24 = vmax.f32 %v1889_v30, %v2081_v19  ;;  %v14256_v19 = vld [vmem:[#allocation3 + $0x142] sm:$0xff] }
 0x2af   :  { %11425 = vmatmul.mubr.msk.f32.gmra.mrb[10].mxu1 %vm1560_vm4, %v13596_v42  ;;  %v1407_v42 = vpop.f32.mrb[143].mxu0 }
 0x2b0   :  { %11427 = vmatprep.mubr.msk.f32.mxu1 %vm1560_vm4, %v13602_v43  ;;  %v1556_v43 = vmax.f32 %v1398_v36, 0.0  ;;  %v14161_v36 = vld [vmem:[#allocation3 + $0xa1] sm:$0xff] }
 0x2b2   :  { %1701 = vst.msk [vmem:[#allocation2 + $0x460] sm:$0xff] %vm1560_vm4, %v1556_v43  ;;  %v14177_v43 = vld [vmem:[#allocation3 + $0x121] sm:$0xff] }
 0x2b3   :  { %11428 = vmatmul.mubr.msk.f32.gmra.mrb[12].mxu1 %vm1560_vm4, %v13997_v10 }
 0x2b4   :  { %11432 = vmatprep.mubr.msk.f32.mxu1 %vm1560_vm4, %v13611_v46  ;;  %v1408_v46 = vadd.f32 %v13856_v56, %v1407_v42  ;;  %v10034_v56 = vld [vmem:[%s14903_s3 + $0x88] sm:$0xff]  ;;  %v14173_v42 = vld [vmem:[#allocation3 + $0x111] sm:$0xff] }
 0x2b7   :  { %11433 = vmatmul.mubr.msk.f32.vlgmr.msra.gmra.mrb[14].mxu1 %vm1560_vm4, %v13622_v49  ;;  %v14026_v49 = vld [vmem:[#allocation3 + $0x93] sm:$0xff] }
 0x2b8   :  { %11457 = vmatpush3.msra.mxu1 %v9983_v4  ;;  %11435 = vmatprep.mubr.msk.f32.mxu1 %vm1560_vm4, %v13626_v50  ;;  %v1559_v50 = vmax.f32 %v1413_v41, 0.0  ;;  %v14167_v41 = vld [vmem:[#allocation3 + $0x101] sm:$0xff] }
 0x2b9   :  { %11482 = vmatprep.subr.mxu1 %v10000_v45  ;;  %v1891_v4 = vld [vmem:[#allocation2 + $0x460] ss:$2 sm:$0xf] }
 0x2ba   :  { %1704 = vst.msk [vmem:[#allocation2 + $0x478] sm:$0xff] %vm1560_vm4, %v1559_v50  ;;  %v14191_v50 = vld [vmem:[#allocation3 + $0x161] sm:$0xff] }
 0x2bb   :  { %11436 = vmatmul.mubr.msk.f32.gmra.mrb[0].mxu1 %vm1560_vm4, %v13631_v52  ;;  %v1558_v52 = vmax.f32 %v1408_v46, 0.0  ;;  %v14185_v46 = vld [vmem:[#allocation3 + $0x141] sm:$0xff] }
 0x2bc   :  { %11438 = vmatprep.mubr.msk.f32.mxu1 %vm1560_vm4, %v13637_v53  ;;  %v14048_v53 = vld [vmem:[#allocation3 + $0x153] sm:$0xff] }
 0x2bd   :  { %1703 = vst.msk [vmem:[#allocation2 + $0x470] sm:$0xff] %vm1560_vm4, %v1558_v52  ;;  %14950 = vst [vmem:[#allocation22_spill] sm:$0xff] %v14048_v53  ;;  %v6110_v52 = vld [vmem:[#allocation3 + $0x32] sm:$0xff] }
 0x2bf   :  { %11439 = vmatmul.mubr.msk.f32.gmra.mrb[2].mxu1 %vm1560_vm4, %v13643_v55  ;;  %v10017_v55 = vld [vmem:[%s14903_s3 + $0x80] sm:$0xff] }
 0x2c0   :  { %11441 = vmatprep.mubr.msk.f32.mxu1 %vm1560_vm4, %v13649_v51  ;;  %v14951_v51 = vld [vmem:[#allocation9_spill] sm:$0xff] }
 0x2c1   :  { %v1895_v3 = vld [vmem:[#allocation2 + $0x478] ss:$2 sm:$0xf]  ;;  %v2087_v15 = vld [vmem:[#allocation2 + $0x479] ss:$2 sm:$0xf] }
 0x2c2   :  { %v2183_v28 = vmax.f32 %v1895_v3, %v2087_v15  ;;  %v14250_v3 = vld [vmem:[#allocation3 + $0x132] sm:$0xff] }
 0x2c3   :  { %11442 = vmatmul.mubr.msk.f32.gmra.mrb[4].mxu1 %vm1560_vm4, %v14026_v49 }
 0x2c4   :  { %11444 = vmatprep.mubr.msk.f32.mxu1 %vm1560_vm4, %v13658_v59  ;;  %v14952_v59 = vld [vmem:[#allocation10_spill] sm:$0xff] }
 0x2c5   :  { %v1893_v21 = vld [vmem:[#allocation2 + $0x468] ss:$2 sm:$0xff]  ;;  %v2085_v22 = vld [vmem:[#allocation2 + $0x469] ss:$2 sm:$0xff] }
 0x2c6   :  { %v2182_v33 = vmax.f32 %v1893_v21, %v2085_v22 }
 0x2c7   :  { %11445 = vmatmul.mubr.msk.f32.gmra.mrb[6].mxu1 %vm1560_vm4, %v13664_v62  ;;  %v14069_v62 = vld [vmem:[#allocation3 + $0x94] sm:$0xff] }
 0x2c8   :  { %11447 = vmatprep.mubr.msk.f32.mxu1 %vm1560_vm4, %v13669_v63  ;;  %14953 = vst [vmem:[#allocation9_spill] sm:$0xff] %v14069_v62  ;;  %v14954_v63 = vld [vmem:[#allocation11_spill] sm:$0xff]  ;;  %v2230_v37 = vmax.f32 %v2180_v24, %v2182_v33  ;;  %v14266_v24 = vld [vmem:[#allocation3 + $0x162] sm:$0xff] }
 0x2ca   :  { %2279 = vst.msk [vmem:[#allocation3 + $0x170] sm:$0xff] %vm1560_vm4, %v2230_v37  ;;  %v14275_v37 = vld [vmem:[#allocation3 + $0x43] sm:$0xff] }
 0x2cb   :  { %11448 = vmatmul.mubr.msk.f32.gmra.mrb[8].mxu1 %vm1560_vm4, %v13674_v0  ;;  %v14955_v0 = vld [vmem:[#allocation12_spill] sm:$0xff] }
 0x2cc   :  { %11450 = vmatprep.mubr.msk.f32.mxu1 %vm1560_vm4, %v13683_v2  ;;  %v14956_v2 = vld [vmem:[#allocation13_spill] sm:$0xff] }
 0x2cf   :  { %11451 = vmatmul.mubr.msk.f32.gmra.mrb[10].mxu1 %vm1560_vm4, %v13689_v5  ;;  %v14957_v5 = vld [vmem:[#allocation14_spill] sm:$0xff] }
 0x2d0   :  { %11453 = vmatprep.mubr.msk.f32.mxu1 %vm1560_vm4, %v13695_v6  ;;  %v14958_v6 = vld [vmem:[#allocation15_spill] sm:$0xff] }
 0x2d3   :  { %11454 = vmatmul.mubr.msk.f32.gmra.mrb[12].mxu1 %vm1560_vm4, %v14048_v53 }
 0x2d4   :  { %11458 = vmatprep.mubr.msk.f32.mxu1 %vm1560_vm4, %v13704_v9  ;;  %v14959_v9 = vld [vmem:[#allocation16_spill] sm:$0xff] }
 0x2d7   :  { %11459 = vmatmul.mubr.msk.f32.vlgmr.msra.gmra.mrb[14].mxu1 %vm1560_vm4, %v13714_v13  ;;  %v14960_v13 = vld [vmem:[#allocation17_spill] sm:$0xff] }
 0x2d8   :  { %11483 = vmatpush3.msra.mxu1 %v10000_v45  ;;  %11461 = vmatprep.mubr.msk.f32.mxu1 %vm1560_vm4, %v13718_v16  ;;  %v14087_v16 = vld [vmem:[#allocation3 + $0x154] sm:$0xff]  ;;  %v2083_v45 = vld [vmem:[#allocation2 + $0x461] ss:$2 sm:$0xf] }
 0x2d9   :  { %11508 = vmatprep.subr.mxu1 %v10017_v55  ;;  %v2181_v26 = vmax.f32 %v1891_v4, %v2083_v45  ;;  %v14244_v4 = vld [vmem:[#allocation3 + $0x122] sm:$0xff] }
 0x2db   :  { %11462 = vmatmul.mubr.msk.f32.gmra.mrb[0].mxu1 %vm1560_vm4, %v14951_v51  ;;  %v2231_v38 = vmax.f32 %v2181_v26, %v2183_v28  ;;  %v10068_v51 = vld [vmem:[%s14903_s3 + $0x98] sm:$0xff] }
 0x2dc   :  { %11464 = vmatprep.mubr.msk.f32.mxu1 %vm1560_vm4, %v13729_v18  ;;  %v5656_v18 = vld [vmem:[#allocation3 + $0x30] sm:$0xff] }
 0x2dd   :  { %2280 = vst.msk [vmem:[#allocation3 + $0x178] sm:$0xf] %vm2233_vm5, %v2231_v38  ;;  %v6337_v28 = vld [vmem:[#allocation3 + $0x33] sm:$0xff]  ;;  %v10085_v38 = vld [vmem:[%s14903_s3 + $0xa0] sm:$0xff] }
 0x2df   :  { %11465 = vmatmul.mubr.msk.f32.gmra.mrb[2].mxu1 %vm1560_vm4, %v13735_v31  ;;  %v14092_v31 = vld [vmem:[#allocation3 + $0x40] sm:$0xff] }
 0x2e0   :  { %11467 = vmatprep.mubr.msk.f32.mxu1 %vm1560_vm4, %v14952_v59  ;;  %v14203_v59 = vld [vmem:[#allocation3 + $0x52] sm:$0xff] }
 0x2e3   :  { %11468 = vmatmul.mubr.msk.f32.gmra.mrb[4].mxu1 %vm1560_vm4, %v14069_v62 }
 0x2e4   :  { %11470 = vmatprep.mubr.msk.f32.mxu1 %vm1560_vm4, %v14954_v63  ;;  %v14207_v63 = vld [vmem:[#allocation3 + $0x62] sm:$0xff] }
 0x2e7   :  { %11471 = vmatmul.mubr.msk.f32.gmra.mrb[6].mxu1 %vm1560_vm4, %v14955_v0  ;;  %v14211_v0 = vld [vmem:[#allocation3 + $0x72] sm:$0xff] }
 0x2e8   :  { %11473 = vmatprep.mubr.msk.f32.mxu1 %vm1560_vm4, %v14956_v2  ;;  %v14215_v2 = vld [vmem:[#allocation3 + $0x82] sm:$0xff] }
 0x2eb   :  { %11474 = vmatmul.mubr.msk.f32.gmra.mrb[8].mxu1 %vm1560_vm4, %v14957_v5 }
 0x2ec   :  { %11476 = vmatprep.mubr.msk.f32.mxu1 %vm1560_vm4, %v14958_v6  ;;  %v14223_v6 = vld [vmem:[#allocation3 + $0xa2] sm:$0xff] }
 0x2ef   :  { %11477 = vmatmul.mubr.msk.f32.gmra.mrb[10].mxu1 %vm1560_vm4, %v14959_v9 }
 0x2f0   :  { %11479 = vmatprep.mubr.msk.f32.mxu1 %vm1560_vm4, %v14960_v13 }
 0x2f3   :  { %11480 = vmatmul.mubr.msk.f32.gmra.mrb[12].mxu1 %vm1560_vm4, %v14087_v16 }
 0x2f4   :  { %11484 = vmatprep.mubr.msk.f32.mxu1 %vm1560_vm4, %v5656_v18  ;;  %v6118_v18 = vld [vmem:[#allocation3 + $0xf2] sm:$0xff] }
 0x2f7   :  { %11485 = vmatmul.mubr.msk.f32.vlgmr.msra.gmra.mrb[14].mxu1 %vm1560_vm4, %v14092_v31 }
 0x2f8   :  { %11509 = vmatpush3.msra.mxu1 %v10017_v55  ;;  %11487 = vmatprep.mubr.msk.f32.mxu1 %vm1560_vm4, %v14099_v29  ;;  %v14196_v55 = vld [vmem:[#allocation3 + $0x42] sm:$0xff] }
 0x2f9   :  { %11534 = vmatprep.subr.mxu1 %v10034_v56 }
 0x2fb   :  { %11488 = vmatmul.mubr.msk.f32.gmra.mrb[0].mxu1 %vm1560_vm4, %v14103_v48 }
 0x2fc   :  { %11490 = vmatprep.mubr.msk.f32.mxu1 %vm1560_vm4, %v14107_v8 }
 0x2ff   :  { %11491 = vmatmul.mubr.msk.f32.gmra.mrb[2].mxu1 %vm1560_vm4, %v13821_v11 }
 0x300   :  { %11493 = vmatprep.mubr.msk.f32.mxu1 %vm1560_vm4, %v14961_v14 }
 0x303   :  { %11494 = vmatmul.mubr.msk.f32.gmra.mrb[4].mxu1 %vm1560_vm4, %v14115_v60 }
 0x304   :  { %11496 = vmatprep.mubr.msk.f32.mxu1 %vm1560_vm4, %v5664_v61  ;;  %v14232_v61 = vld [vmem:[#allocation3 + $0x102] sm:$0xff] }
 0x307   :  { %11497 = vmatmul.mubr.msk.f32.gmra.mrb[6].mxu1 %vm1560_vm4, %v14120_v7 }
 0x308   :  { %11499 = vmatprep.mubr.msk.f32.mxu1 %vm1560_vm4, %v14124_v20 }
 0x30b   :  { %11500 = vmatmul.mubr.msk.f32.gmra.mrb[8].mxu1 %vm1560_vm4, %v14128_v34 }
 0x30c   :  { %11502 = vmatprep.mubr.msk.f32.mxu1 %vm1560_vm4, %v14132_v1 }
 0x30f   :  { %11503 = vmatmul.mubr.msk.f32.gmra.mrb[10].mxu1 %vm1560_vm4, %v13865_v58 }
 0x310   :  { %11505 = vmatprep.mubr.msk.f32.mxu1 %vm1560_vm4, %v13876_v54 }
 0x313   :  { %11506 = vmatmul.mubr.msk.f32.gmra.mrb[12].mxu1 %vm1560_vm4, %v14140_v17 }
 0x314   :  { %11510 = vmatprep.mubr.msk.f32.mxu1 %vm1560_vm4, %v14962_v44 }
 0x317   :  { %11511 = vmatmul.mubr.msk.f32.vlgmr.msra.gmra.mrb[14].mxu1 %vm1560_vm4, %v14963_v25 }
 0x318   :  { %11535 = vmatpush3.msra.mxu1 %v10034_v56  ;;  %11513 = vmatprep.mubr.msk.f32.mxu1 %vm1560_vm4, %v14964_v47 }
 0x319   :  { %11560 = vmatprep.subr.mxu1 %v10051_v39 }
 0x31b   :  { %11514 = vmatmul.mubr.msk.f32.gmra.mrb[0].mxu1 %vm1560_vm4, %v13907_v12 }
 0x31c   :  { %11516 = vmatprep.mubr.msk.f32.mxu1 %vm1560_vm4, %v13917_v57 }
 0x31f   :  { %11517 = vmatmul.mubr.msk.f32.gmra.mrb[2].mxu1 %vm1560_vm4, %v13923_v35 }
 0x320   :  { %11519 = vmatprep.mubr.msk.f32.mxu1 %vm1560_vm4, %v13929_v23 }
 0x323   :  { %11520 = vmatmul.mubr.msk.f32.gmra.mrb[4].mxu1 %vm1560_vm4, %v14161_v36 }
 0x324   :  { %11522 = vmatprep.mubr.msk.f32.mxu1 %vm1560_vm4, %v13940_v27  ;;  %v14181_v27 = vld [vmem:[#allocation3 + $0x131] sm:$0xff] }
 0x327   :  { %11523 = vmatmul.mubr.msk.f32.gmra.mrb[6].mxu1 %vm1560_vm4, %v14167_v41 }
 0x328   :  { %11525 = vmatprep.mubr.msk.f32.mxu1 %vm1560_vm4, %v14173_v42 }
 0x32b   :  { %11526 = vmatmul.mubr.msk.f32.gmra.mrb[8].mxu1 %vm1560_vm4, %v14177_v43 }
 0x32c   :  { %11528 = vmatprep.mubr.msk.f32.mxu1 %vm1560_vm4, %v14181_v27 }
 0x32f   :  { %11529 = vmatmul.mubr.msk.f32.gmra.mrb[10].mxu1 %vm1560_vm4, %v14185_v46 }
 0x330   :  { %11531 = vmatprep.mubr.msk.f32.mxu1 %vm1560_vm4, %v13958_v32 }
 0x333   :  { %11532 = vmatmul.mubr.msk.f32.gmra.mrb[12].mxu1 %vm1560_vm4, %v14191_v50 }
 0x334   :  { %11536 = vmatprep.mubr.msk.f32.mxu1 %vm1560_vm4, %v6110_v52 }
 0x337   :  { %11537 = vmatmul.mubr.msk.f32.vlgmr.msra.gmra.mrb[14].mxu1 %vm1560_vm4, %v14196_v55 }
 0x338   :  { %11561 = vmatpush3.msra.mxu1 %v10051_v39  ;;  %11539 = vmatprep.mubr.msk.f32.mxu1 %vm1560_vm4, %v14203_v59  ;;  %v14238_v39 = vld [vmem:[#allocation3 + $0x112] sm:$0xff] }
 0x339   :  { %11586 = vmatprep.subr.mxu1 %v10068_v51 }
 0x33b   :  { %11540 = vmatmul.mubr.msk.f32.gmra.mrb[0].mxu1 %vm1560_vm4, %v14207_v63 }
 0x33c   :  { %11542 = vmatprep.mubr.msk.f32.mxu1 %vm1560_vm4, %v14211_v0 }
 0x33f   :  { %11543 = vmatmul.mubr.msk.f32.gmra.mrb[2].mxu1 %vm1560_vm4, %v14215_v2 }
 0x340   :  { %11545 = vmatprep.mubr.msk.f32.mxu1 %vm1560_vm4, %v13979_v40 }
 0x341   :  { %v14221_v5 = vpop.f32.mrb[146].mxu0 }
 0x342   :  { %14965 = vst [vmem:[#allocation10_spill] sm:$0xff] %v14221_v5  ;;  %v14225_v9 = vpop.f32.mrb[147].mxu0  ;;  %v14342_v5 = vld [vmem:[#allocation3 + $0x44] sm:$0xff] }
 0x343   :  { %14966 = vst [vmem:[#allocation11_spill] sm:$0xff] %v14225_v9  ;;  %11546 = vmatmul.mubr.msk.f32.gmra.mrb[4].mxu1 %vm1560_vm4, %v14223_v6  ;;  %v6564_v9 = vld [vmem:[#allocation3 + $0x34] sm:$0xff] }
 0x344   :  { %11548 = vmatprep.mubr.msk.f32.mxu1 %vm1560_vm4, %v6118_v18  ;;  %v14284_v18 = vld [vmem:[#allocation3 + $0x53] sm:$0xff] }
 0x345   :  { %v14230_v56 = vpop.f32.mrb[148].mxu0 }
 0x346   :  { %14967 = vst [vmem:[#allocation12_spill] sm:$0xff] %v14230_v56  ;;  %v14234_v44 = vpop.f32.mrb[149].mxu0  ;;  %v14337_v56 = vld [vmem:[#allocation3 + $0x163] sm:$0xff] }
 0x347   :  { %14968 = vst [vmem:[#allocation13_spill] sm:$0xff] %v14234_v44  ;;  %11549 = vmatmul.mubr.msk.f32.gmra.mrb[6].mxu1 %vm1560_vm4, %v14232_v61  ;;  %v14327_v44 = vld [vmem:[#allocation3 + $0x133] sm:$0xff]  ;;  %14981 = vst [vmem:[#allocation27_spill] sm:$0xff] %v14337_v56 }
 0x348   :  { %11551 = vmatprep.mubr.msk.f32.mxu1 %vm1560_vm4, %v14238_v39 }
 0x349   :  { %v14242_v30 = vpop.f32.mrb[150].mxu0 }
 0x34a   :  { %14969 = vst [vmem:[#allocation14_spill] sm:$0xff] %v14242_v30  ;;  %v14246_v45 = vpop.f32.mrb[151].mxu0  ;;  %v14323_v30 = vld [vmem:[#allocation3 + $0x123] sm:$0xff] }
 0x34b   :  { %14970 = vst [vmem:[#allocation15_spill] sm:$0xff] %v14246_v45  ;;  %11552 = vmatmul.mubr.msk.f32.gmra.mrb[8].mxu1 %vm1560_vm4, %v14244_v4  ;;  %v14319_v45 = vld [vmem:[#allocation3 + $0x113] sm:$0xff] }
 0x34c   :  { %11554 = vmatprep.mubr.msk.f32.mxu1 %vm1560_vm4, %v14250_v3 }
 0x34d   :  { %v14254_v15 = vpop.f32.mrb[152].mxu0 }
 0x34e   :  { %14971 = vst [vmem:[#allocation16_spill] sm:$0xff] %v14254_v15  ;;  %v14258_v21 = vpop.f32.mrb[153].mxu0  ;;  %v14315_v15 = vld [vmem:[#allocation3 + $0x103] sm:$0xff] }
 0x34f   :  { %14972 = vst [vmem:[#allocation17_spill] sm:$0xff] %v14258_v21  ;;  %11555 = vmatmul.mubr.msk.f32.gmra.mrb[10].mxu1 %vm1560_vm4, %v14256_v19 }
 0x350   :  { %11557 = vmatprep.mubr.msk.f32.mxu1 %vm1560_vm4, %v13997_v10 }
 0x351   :  { %v14264_v22 = vpop.f32.mrb[154].mxu0 }
 0x352   :  { %14973 = vst [vmem:[#allocation18_spill] sm:$0xff] %v14264_v22  ;;  %v14268_v26 = vpop.f32.mrb[155].mxu0 }
 0x353   :  { %14974 = vst [vmem:[#allocation19_spill] sm:$0xff] %v14268_v26  ;;  %11558 = vmatmul.mubr.msk.f32.gmra.mrb[12].mxu1 %vm1560_vm4, %v14266_v24 }
 0x354   :  { %11562 = vmatprep.mubr.msk.f32.mxu1 %vm1560_vm4, %v6337_v28 }
 0x355   :  { %v14273_v33 = vpop.f32.mrb[156].mxu0 }
 0x356   :  { %14975 = vst [vmem:[#allocation20_spill] sm:$0xff] %v14273_v33  ;;  %v14280_v52 = vpop.f32.mrb[157].mxu0  ;;  %v14290_v33 = vld [vmem:[#allocation3 + $0x63] sm:$0xff] }
 0x357   :  { %14976 = vst [vmem:[#allocation21_spill] sm:$0xff] %v14280_v52  ;;  %11563 = vmatmul.mubr.msk.f32.vlgmr.msra.gmra.mrb[14].mxu1 %vm1560_vm4, %v14275_v37  ;;  %v14296_v52 = vld [vmem:[#allocation3 + $0x73] sm:$0xff] }
 0x358   :  { %11587 = vmatpush3.msra.mxu1 %v10068_v51  ;;  %11565 = vmatprep.mubr.msk.f32.mxu1 %vm1560_vm4, %v14284_v18  ;;  %v14302_v51 = vld [vmem:[#allocation3 + $0x83] sm:$0xff] }
 0x359   :  { %11612 = vmatprep.subr.mxu1 %v10085_v38  ;;  %v14288_v28 = vpop.f32.mrb[158].mxu0 }
 0x35a   :  { %14977 = vst [vmem:[#allocation23_spill] sm:$0xff] %v14288_v28  ;;  %v14292_v26 = vpop.f32.mrb[159].mxu0  ;;  %v6345_v28 = vld [vmem:[#allocation3 + $0xf3] sm:$0xff] }
 0x35b   :  { %14978 = vst [vmem:[#allocation24_spill] sm:$0xff] %v14292_v26  ;;  %11566 = vmatmul.mubr.msk.f32.gmra.mrb[0].mxu1 %vm1560_vm4, %v14290_v33  ;;  %v14310_v26 = vld [vmem:[#allocation3 + $0xa3] sm:$0xff] }
 0x35c   :  { %11568 = vmatprep.mubr.msk.f32.mxu1 %vm1560_vm4, %v14296_v52 }
 0x35d   :  { %v14300_v22 = vpop.f32.mrb[144].mxu0 }
 0x35e   :  { %14979 = vst [vmem:[#allocation25_spill] sm:$0xff] %v14300_v22  ;;  %v14304_v21 = vpop.f32.mrb[145].mxu0  ;;  %v14349_v22 = vld [vmem:[#allocation3 + $0x54] sm:$0xff] }
 0x35f   :  { %14980 = vst [vmem:[#allocation26_spill] sm:$0xff] %v14304_v21  ;;  %11569 = vmatmul.mubr.msk.f32.gmra.mrb[2].mxu1 %vm1560_vm4, %v14302_v51  ;;  %v10102_v21 = vld [vmem:[%s14903_s3 + $0xa8] sm:$0xff]  ;;  %14982 = vst [vmem:[#allocation28_spill] sm:$0xff] %v14349_v22 }
 0x360   :  { %11571 = vmatprep.mubr.msk.f32.mxu1 %vm1560_vm4, %v14026_v49 }
 0x363   :  { %11572 = vmatmul.mubr.msk.f32.gmra.mrb[4].mxu1 %vm1560_vm4, %v14310_v26 }
 0x364   :  { %11574 = vmatprep.mubr.msk.f32.mxu1 %vm1560_vm4, %v6345_v28  ;;  %v14331_v28 = vld [vmem:[#allocation3 + $0x143] sm:$0xff] }
 0x367   :  { %11575 = vmatmul.mubr.msk.f32.gmra.mrb[6].mxu1 %vm1560_vm4, %v14315_v15 }
 0x368   :  { %11577 = vmatprep.mubr.msk.f32.mxu1 %vm1560_vm4, %v14319_v45 }
 0x36b   :  { %11578 = vmatmul.mubr.msk.f32.gmra.mrb[8].mxu1 %vm1560_vm4, %v14323_v30 }
 0x36c   :  { %11580 = vmatprep.mubr.msk.f32.mxu1 %vm1560_vm4, %v14327_v44 }
 0x36f   :  { %11581 = vmatmul.mubr.msk.f32.gmra.mrb[10].mxu1 %vm1560_vm4, %v14331_v28 }
 0x370   :  { %11583 = vmatprep.mubr.msk.f32.mxu1 %vm1560_vm4, %v14048_v53  ;;  %v14361_v53 = vld [vmem:[#allocation3 + $0x84] sm:$0xff] }
 0x371   :  { %14985 = vst [vmem:[#allocation31_spill] sm:$0xff] %v14361_v53 }
 0x373   :  { %11584 = vmatmul.mubr.msk.f32.gmra.mrb[12].mxu1 %vm1560_vm4, %v14337_v56  ;;  %v14353_v56 = vld [vmem:[#allocation3 + $0x64] sm:$0xff] }
 0x374   :  { %11588 = vmatprep.mubr.msk.f32.mxu1 %vm1560_vm4, %v6564_v9  ;;  %14983 = vst [vmem:[#allocation29_spill] sm:$0xff] %v14353_v56  ;;  %v14357_v9 = vld [vmem:[#allocation3 + $0x74] sm:$0xff] }
 0x375   :  { %14984 = vst [vmem:[#allocation30_spill] sm:$0xff] %v14357_v9 }
 0x377   :  { %11589 = vmatmul.mubr.msk.f32.vlgmr.msra.gmra.mrb[14].mxu1 %vm1560_vm4, %v14342_v5 }
 0x378   :  { %11613 = vmatpush3.msra.mxu1 %v10085_v38  ;;  %11591 = vmatprep.mubr.msk.f32.mxu1 %vm1560_vm4, %v14349_v22  ;;  %v14367_v38 = vld [vmem:[#allocation3 + $0xa4] sm:$0xff]  ;;  %v6572_v22 = vld [vmem:[#allocation3 + $0xf4] sm:$0xff] }
 0x379   :  { %11638 = vmatprep.subr.mxu1 %v10102_v21 }
 0x37b   :  { %11592 = vmatmul.mubr.msk.f32.gmra.mrb[0].mxu1 %vm1560_vm4, %v14353_v56  ;;  %v14372_v56 = vld [vmem:[#allocation3 + $0x104] sm:$0xff] }
 0x37c   :  { %11594 = vmatprep.mubr.msk.f32.mxu1 %vm1560_vm4, %v14357_v9  ;;  %v14376_v9 = vld [vmem:[#allocation3 + $0x114] sm:$0xff] }
 0x37f   :  { %11595 = vmatmul.mubr.msk.f32.gmra.mrb[2].mxu1 %vm1560_vm4, %v14361_v53  ;;  %v14380_v53 = vld [vmem:[#allocation3 + $0x124] sm:$0xff] }
 0x380   :  { %11597 = vmatprep.mubr.msk.f32.mxu1 %vm1560_vm4, %v14069_v62  ;;  %14986 = vst [vmem:[#allocation32_spill] sm:$0xff] %v14380_v53  ;;  %v14384_v62 = vld [vmem:[#allocation3 + $0x134] sm:$0xff] }
 0x383   :  { %11598 = vmatmul.mubr.msk.f32.gmra.mrb[4].mxu1 %vm1560_vm4, %v14367_v38 }
 0x384   :  { %11600 = vmatprep.mubr.msk.f32.mxu1 %vm1560_vm4, %v6572_v22  ;;  %v14392_v22 = vld [vmem:[#allocation3 + $0x164] sm:$0xff] }
 0x387   :  { %11601 = vmatmul.mubr.msk.f32.gmra.mrb[6].mxu1 %vm1560_vm4, %v14372_v56 }
 0x388   :  { %11603 = vmatprep.mubr.msk.f32.mxu1 %vm1560_vm4, %v14376_v9 }
 0x38b   :  { %11604 = vmatmul.mubr.msk.f32.gmra.mrb[8].mxu1 %vm1560_vm4, %v14380_v53  ;;  %v10119_v53 = vld [vmem:[%s14903_s3 + $0xb0] sm:$0xff] }
 0x38c   :  { %11606 = vmatprep.mubr.msk.f32.mxu1 %vm1560_vm4, %v14384_v62 }
 0x38f   :  { %11607 = vmatmul.mubr.msk.f32.gmra.mrb[10].mxu1 %vm1560_vm4, %v14960_v13  ;;  %v6799_v13 = vld [vmem:[#allocation3 + $0xb0] sm:$0xff] }
 0x390   :  { %11609 = vmatprep.mubr.msk.f32.mxu1 %vm1560_vm4, %v14087_v16 }
 0x393   :  { %11610 = vmatmul.mubr.msk.f32.gmra.mrb[12].mxu1 %vm1560_vm4, %v14392_v22 }
 0x394   :  { %11614 = vmatprep.mubr.msk.f32.mxu1 %vm1560_vm4, %v14092_v31  ;;  %v10136_v31 = vld [vmem:[%s14903_s3 + $0xb8] sm:$0xff] }
 0x397   :  { %11615 = vmatmul.mubr.msk.f32.vlgmr.msra.gmra.mrb[14].mxu1 %vm1560_vm4, %v14099_v29  ;;  %v14991_v29 = vld [vmem:[#allocation30_spill] sm:$0xff] }
 0x398   :  { %11639 = vmatpush3.msra.mxu1 %v10102_v21  ;;  %11617 = vmatprep.mubr.msk.f32.mxu1 %vm1560_vm4, %v14103_v48  ;;  %v14992_v48 = vld [vmem:[#allocation31_spill] sm:$0xff] }
 0x399   :  { %11664 = vmatprep.subr.mxu1 %v10119_v53 }
 0x39b   :  { %11618 = vmatmul.mubr.msk.f32.gmra.mrb[0].mxu1 %vm1560_vm4, %v14107_v8  ;;  %v14993_v8 = vld [vmem:[#allocation9_spill] sm:$0xff] }
 0x39c   :  { %11620 = vmatprep.mubr.msk.f32.mxu1 %vm1560_vm4, %v13821_v11  ;;  %v6807_v11 = vld [vmem:[#allocation3 + $0x170] sm:$0xff] }
 0x39f   :  { %11621 = vmatmul.mubr.msk.f32.gmra.mrb[2].mxu1 %vm1560_vm4, %v14961_v14  ;;  %v7707_v14 = vld [vmem:[#allocation3 + $0xb4] sm:$0xff] }
 0x3a0   :  { %11623 = vmatprep.mubr.msk.f32.mxu1 %vm1560_vm4, %v14115_v60  ;;  %v14994_v60 = vld [vmem:[#allocation32_spill] sm:$0xff] }
 0x3a3   :  { %11624 = vmatmul.mubr.msk.f32.gmra.mrb[4].mxu1 %vm1560_vm4, %v6799_v13 }
 0x3a4   :  { %11626 = vmatprep.mubr.msk.f32.mxu1 %vm1560_vm4, %v14120_v7  ;;  %v7712_v7 = vld [vmem:[#allocation3 + $0x144] sm:$0xff] }
 0x3a7   :  { %11627 = vmatmul.mubr.msk.f32.gmra.mrb[6].mxu1 %vm1560_vm4, %v14124_v20  ;;  %v7715_v20 = vld [vmem:[#allocation3 + $0x174] sm:$0xff] }
 0x3a8   :  { %11629 = vmatprep.mubr.msk.f32.mxu1 %vm1560_vm4, %v14128_v34  ;;  %v10171_v34 = vld [vmem:[%s14905_s5 + $0x10] sm:$0xff] }
 0x3ab   :  { %11630 = vmatmul.mubr.msk.f32.gmra.mrb[8].mxu1 %vm1560_vm4, %v14132_v1 }
 0x3ac   :  { %11632 = vmatprep.mubr.msk.f32.mxu1 %vm1560_vm4, %v13865_v58  ;;  %v7026_v58 = vld [vmem:[#allocation3 + $0xb1] sm:$0xff] }
 0x3af   :  { %11633 = vmatmul.mubr.msk.f32.gmra.mrb[10].mxu1 %vm1560_vm4, %v13876_v54  ;;  %v7034_v54 = vld [vmem:[#allocation3 + $0x171] sm:$0xff] }
 0x3b0   :  { %11635 = vmatprep.mubr.msk.f32.mxu1 %vm1560_vm4, %v14140_v17  ;;  %v12421_v17 = vmov 0.0|0.0  }
 0x3b1   :  { %11918 = vmatprep.subr.bf16.mxu0 %v12421_v17 }
 0x3b3   :  { %11636 = vmatmul.mubr.msk.f32.gmra.mrb[12].mxu1 %vm1560_vm4, %v6807_v11 }
 0x3b4   :  { %11640 = vmatprep.mubr.msk.f32.mxu1 %vm1560_vm4, %v14963_v25 }
 0x3b7   :  { %11641 = vmatmul.mubr.msk.f32.vlgmr.msra.gmra.mrb[14].mxu1 %vm1560_vm4, %v14964_v47  ;;  %v14567_v47 = vld [vmem:[%s14904_s4] ss:$0 sm:$0xff] }
 0x3b8   :  { %11665 = vmatpush3.msra.mxu1 %v10119_v53  ;;  %11643 = vmatprep.mubr.msk.f32.mxu1 %vm1560_vm4, %v13907_v12  ;;  %v10153_v12 = vld [vmem:[%s14903_s3 + $0xc0] sm:$0xff] }
 0x3b9   :  { %11690 = vmatprep.subr.mxu1 %v10136_v31  ;;  %v14990_v53 = vld [vmem:[#allocation29_spill] sm:$0xff] }
 0x3bb   :  { %11644 = vmatmul.mubr.msk.f32.gmra.mrb[0].mxu1 %vm1560_vm4, %v13917_v57  ;;  %v7253_v57 = vld [vmem:[#allocation3 + $0xb2] sm:$0xff] }
 0x3bc   :  { %11646 = vmatprep.mubr.msk.f32.mxu1 %vm1560_vm4, %v13923_v35  ;;  %v7261_v35 = vld [vmem:[#allocation3 + $0x172] sm:$0xff] }
 0x3bf   :  { %11647 = vmatmul.mubr.msk.f32.gmra.mrb[2].mxu1 %vm1560_vm4, %v13929_v23  ;;  %v7480_v23 = vld [vmem:[#allocation3 + $0xb3] sm:$0xff] }
 0x3c0   :  { %11649 = vmatprep.mubr.msk.f32.mxu1 %vm1560_vm4, %v14161_v36  ;;  %v14995_v36 = vld [vmem:[#allocation25_spill] sm:$0xff] }
 0x3c3   :  { %11650 = vmatmul.mubr.msk.f32.gmra.mrb[4].mxu1 %vm1560_vm4, %v7026_v58 }
 0x3c4   :  { %11652 = vmatprep.mubr.msk.f32.mxu1 %vm1560_vm4, %v14167_v41 }
 0x3c7   :  { %11653 = vmatmul.mubr.msk.f32.gmra.mrb[6].mxu1 %vm1560_vm4, %v14173_v42 }
 0x3c8   :  { %11655 = vmatprep.mubr.msk.f32.mxu1 %vm1560_vm4, %v14177_v43  ;;  %v14996_v43 = vld [vmem:[#allocation26_spill] sm:$0xff] }
 0x3cb   :  { %11656 = vmatmul.mubr.msk.f32.gmra.mrb[8].mxu1 %vm1560_vm4, %v14181_v27 }
 0x3cc   :  { %11658 = vmatprep.mubr.msk.f32.mxu1 %vm1560_vm4, %v14185_v46 }
 0x3cf   :  { %11659 = vmatmul.mubr.msk.f32.gmra.mrb[10].mxu1 %vm1560_vm4, %v13958_v32  ;;  %v14987_v32 = vld [vmem:[#allocation22_spill] sm:$0xff] }
 0x3d0   :  { %11661 = vmatprep.mubr.msk.f32.mxu1 %vm1560_vm4, %v14191_v50 }
 0x3d3   :  { %11662 = vmatmul.mubr.msk.f32.gmra.mrb[12].mxu1 %vm1560_vm4, %v7034_v54 }
 0x3d4   :  { %11666 = vmatprep.mubr.msk.f32.mxu1 %vm1560_vm4, %v14196_v55 }
 0x3d7   :  { %11667 = vmatmul.mubr.msk.f32.vlgmr.msra.gmra.mrb[14].mxu1 %vm1560_vm4, %v14203_v59 }
 0x3d8   :  { %11691 = vmatpush3.msra.mxu1 %v10136_v31  ;;  %11669 = vmatprep.mubr.msk.f32.mxu1 %vm1560_vm4, %v14207_v63  ;;  %v14997_v63 = vld [vmem:[#allocation10_spill] sm:$0xff] }
 0x3d9   :  { %11716 = vmatprep.subr.mxu1 %v10153_v12 }
 0x3db   :  { %11670 = vmatmul.mubr.msk.f32.gmra.mrb[0].mxu1 %vm1560_vm4, %v14211_v0 }
 0x3dc   :  { %11672 = vmatprep.mubr.msk.f32.mxu1 %vm1560_vm4, %v14215_v2 }
 0x3df   :  { %11673 = vmatmul.mubr.msk.f32.gmra.mrb[2].mxu1 %vm1560_vm4, %v13979_v40  ;;  %v14988_v40 = vld [vmem:[#allocation27_spill] sm:$0xff] }
 0x3e0   :  { %11675 = vmatprep.mubr.msk.f32.mxu1 %vm1560_vm4, %v14223_v6  ;;  %v14998_v6 = vld [vmem:[#allocation11_spill] sm:$0xff] }
 0x3e3   :  { %11676 = vmatmul.mubr.msk.f32.gmra.mrb[4].mxu1 %vm1560_vm4, %v7253_v57 }
 0x3e4   :  { %11678 = vmatprep.mubr.msk.f32.mxu1 %vm1560_vm4, %v14232_v61 }
 0x3e7   :  { %11679 = vmatmul.mubr.msk.f32.gmra.mrb[6].mxu1 %vm1560_vm4, %v14238_v39 }
 0x3e8   :  { %11681 = vmatprep.mubr.msk.f32.mxu1 %vm1560_vm4, %v14244_v4  ;;  %v14999_v4 = vld [vmem:[#allocation12_spill] sm:$0xff] }
 0x3eb   :  { %11682 = vmatmul.mubr.msk.f32.gmra.mrb[8].mxu1 %vm1560_vm4, %v14250_v3 }
 0x3ec   :  { %11684 = vmatprep.mubr.msk.f32.mxu1 %vm1560_vm4, %v14256_v19  ;;  %v15000_v19 = vld [vmem:[#allocation13_spill] sm:$0xff] }
 0x3ef   :  { %11685 = vmatmul.mubr.msk.f32.gmra.mrb[10].mxu1 %vm1560_vm4, %v13997_v10  ;;  %v7488_v10 = vld [vmem:[#allocation3 + $0x173] sm:$0xff] }
 0x3f0   :  { %11687 = vmatprep.mubr.msk.f32.mxu1 %vm1560_vm4, %v14266_v24 }
 0x3f3   :  { %11688 = vmatmul.mubr.msk.f32.gmra.mrb[12].mxu1 %vm1560_vm4, %v7261_v35 }
 0x3f4   :  { %11692 = vmatprep.mubr.msk.f32.mxu1 %vm1560_vm4, %v14275_v37 }
 0x3f7   :  { %11693 = vmatmul.mubr.msk.f32.vlgmr.msra.gmra.mrb[14].mxu1 %vm1560_vm4, %v14284_v18 }
 0x3f8   :  { %11717 = vmatpush3.msra.mxu1 %v10153_v12  ;;  %11695 = vmatprep.mubr.msk.f32.mxu1 %vm1560_vm4, %v14290_v33 }
 0x3fb   :  { %11696 = vmatmul.mubr.msk.f32.gmra.mrb[0].mxu1 %vm1560_vm4, %v14296_v52  ;;  %v15001_v52 = vld [vmem:[#allocation14_spill] sm:$0xff] }
 0x3fc   :  { %11698 = vmatprep.mubr.msk.f32.mxu1 %vm1560_vm4, %v14302_v51 }
 0x3ff   :  { %11699 = vmatmul.mubr.msk.f32.gmra.mrb[2].mxu1 %vm1560_vm4, %v14026_v49  ;;  %v14989_v49 = vld [vmem:[#allocation28_spill] sm:$0xff] }
 0x400   :  { %11701 = vmatprep.mubr.msk.f32.mxu1 %vm1560_vm4, %v14310_v26 }
 0x403   :  { %11702 = vmatmul.mubr.msk.f32.gmra.mrb[4].mxu1 %vm1560_vm4, %v7480_v23 }
 0x404   :  { %11704 = vmatprep.mubr.msk.f32.mxu1 %vm1560_vm4, %v14315_v15 }
 0x407   :  { %11705 = vmatmul.mubr.msk.f32.gmra.mrb[6].mxu1 %vm1560_vm4, %v14319_v45 }
 0x408   :  { %11707 = vmatprep.mubr.msk.f32.mxu1 %vm1560_vm4, %v14323_v30 }
 0x40b   :  { %11708 = vmatmul.mubr.msk.f32.gmra.mrb[8].mxu1 %vm1560_vm4, %v14327_v44 }
 0x40c   :  { %11710 = vmatprep.mubr.msk.f32.mxu1 %vm1560_vm4, %v14331_v28 }
 0x40f   :  { %11711 = vmatmul.mubr.msk.f32.gmra.mrb[10].mxu1 %vm1560_vm4, %v14987_v32  ;;  %v15003_v32 = vld [vmem:[#allocation16_spill] sm:$0xff] }
 0x410   :  { %11713 = vmatprep.mubr.msk.f32.mxu1 %vm1560_vm4, %v14988_v40 }
 0x413   :  { %11714 = vmatmul.mubr.msk.f32.gmra.mrb[12].mxu1 %vm1560_vm4, %v7488_v10 }
 0x414   :  { %11718 = vmatprep.mubr.msk.f32.mxu1 %vm1560_vm4, %v14342_v5 }
 0x417   :  { %11719 = vmatmul.mubr.msk.f32.vlgmr.msra.gmra.mrb[14].mxu1 %vm1560_vm4, %v14989_v49 }
 0x418   :  { %11721 = vmatprep.mubr.msk.f32.mxu1 %vm1560_vm4, %v14990_v53 }
 0x41b   :  { %11722 = vmatmul.mubr.msk.f32.gmra.mrb[0].mxu1 %vm1560_vm4, %v14991_v29 }
 0x41c   :  { %11724 = vmatprep.mubr.msk.f32.mxu1 %vm1560_vm4, %v14992_v48  ;;  %v15004_v48 = vld [vmem:[#allocation17_spill] sm:$0xff] }
 0x41f   :  { %11725 = vmatmul.mubr.msk.f32.gmra.mrb[2].mxu1 %vm1560_vm4, %v14993_v8 }
 0x420   :  { %11727 = vmatprep.mubr.msk.f32.mxu1 %vm1560_vm4, %v14367_v38  ;;  %v15002_v38 = vld [vmem:[#allocation15_spill] sm:$0xff] }
 0x423   :  { %11728 = vmatmul.mubr.msk.f32.gmra.mrb[4].mxu1 %vm1560_vm4, %v7707_v14 }
 0x424   :  { %11730 = vmatprep.mubr.msk.f32.mxu1 %vm1560_vm4, %v14372_v56 }
 0x427   :  { %11731 = vmatmul.mubr.msk.f32.gmra.mrb[6].mxu1 %vm1560_vm4, %v14376_v9 }
 0x428   :  { %11733 = vmatprep.mubr.msk.f32.mxu1 %vm1560_vm4, %v14994_v60 }
 0x42b   :  { %11734 = vmatmul.mubr.msk.f32.gmra.mrb[8].mxu1 %vm1560_vm4, %v14384_v62  ;;  %v10172_v62 = vld [vmem:[%s14905_s5 + $0x18] sm:$0xff] }
 0x42c   :  { %11736 = vmatprep.mubr.msk.f32.mxu1 %vm1560_vm4, %v7712_v7  ;;  %v11919_v1 = vpack.c.bf16 %v10172_v62, %v10171_v34 }
 0x42e   :  { %11920 = vmatpush3.bf16.msra.mxu0 %v11919_v1 }
 0x42f   :  { %11737 = vmatmul.mubr.msk.f32.gmra.mrb[10].mxu1 %vm1560_vm4, %v14087_v16  ;;  %11921 = vmatprep.subr.bf16.mxu0 %v12421_v17  ;;  %v12423_v16 = vmov 0.0  }
 0x430   :  { %11739 = vmatprep.mubr.msk.f32.mxu1 %vm1560_vm4, %v14392_v22  ;;  %11746 = vmatprep.mubr.msk.f32.mxu0 %vm12422_vm6, %v12423_v16 }
 0x433   :  { %11740 = vmatmul.mubr.msk.f32.gmra.mrb[12].mxu1 %vm1560_vm4, %v7715_v20 }
 0x4ea   :  { %v11720_v25 = vpop.f32.mrb[14].mxu1 }
 0x4eb   :  { %v12004_v41 = vadd.f32 %v11720_v25, %v14995_v36  ;;  %v7832_v42 = vpop.f32.mrb[15].mxu1 }
 0x4ec   :  { %v12005_v27 = vadd.f32 %v7832_v42, %v14996_v43 }
 0x4ed   :  { %v7935_v46 = vadd.f32 %v12004_v41, %v14567_v47  ;;  %v15005_v41 = vld [vmem:[#allocation18_spill] sm:$0xff] }
 0x4ee   :  { %v7934_v50 = vadd.f32 %v12005_v27, %v14567_v47  ;;  %v11723_v55 = vpop.f32.mrb[0].mxu1 }
 0x4ef   :  { %v7951_v59 = vmax.f32 %v7935_v46, 0.0  ;;  %v12006_v0 = vadd.f32 %v11723_v55, %v14997_v63  ;;  %v7842_v2 = vpop.f32.mrb[1].mxu1  ;;  %v15006_v55 = vld [vmem:[#allocation19_spill] sm:$0xff] }
 0x4f0   :  { %v7950_v5 = vmax.f32 %v7934_v50, 0.0  ;;  %v12007_v56 = vadd.f32 %v7842_v2, %v14998_v6 }
 0x4f1   :  { %7968 = vst.msk [vmem:[#allocation4 + $0x8] sm:$0xff] %vm7966_vm7, %v7951_v59  ;;  %v7937_v61 = vadd.f32 %v12006_v0, %v14567_v47 }
 0x4f2   :  { %7967 = vst.msk [vmem:[#allocation4] sm:$0xff] %vm7966_vm7, %v7950_v5  ;;  %v7936_v44 = vadd.f32 %v12007_v56, %v14567_v47  ;;  %v11726_v39 = vpop.f32.mrb[2].mxu1 }
 0x4f3   :  { %v7953_v30 = vmax.f32 %v7937_v61, 0.0  ;;  %v12008_v45 = vadd.f32 %v11726_v39, %v14999_v4  ;;  %v7852_v3 = vpop.f32.mrb[3].mxu1 }
 0x4f4   :  { %v7952_v15 = vmax.f32 %v7936_v44, 0.0  ;;  %v12009_v21 = vadd.f32 %v7852_v3, %v15000_v19  ;;  %v15007_v44 = vld [vmem:[#allocation20_spill] sm:$0xff] }
 0x4f5   :  { %7970 = vst.msk [vmem:[#allocation4 + $0x18] sm:$0xff] %vm7966_vm7, %v7953_v30  ;;  %v7939_v24 = vadd.f32 %v12008_v45, %v14567_v47 }
 0x4f6   :  { %7969 = vst.msk [vmem:[#allocation4 + $0x10] sm:$0xff] %vm7966_vm7, %v7952_v15  ;;  %v7938_v26 = vadd.f32 %v12009_v21, %v14567_v47  ;;  %v11729_v33 = vpop.f32.mrb[4].mxu1 }
 0x4f7   :  { %v7955_v37 = vmax.f32 %v7939_v24, 0.0  ;;  %v12010_v18 = vadd.f32 %v11729_v33, %v15001_v52  ;;  %v7862_v51 = vpop.f32.mrb[5].mxu1  ;;  %v15008_v33 = vld [vmem:[#allocation21_spill] sm:$0xff] }
 0x4f8   :  { %v7985_v28 = vld [vmem:[#allocation4 + $0x8] ss:$2 sm:$0xf]  ;;  %v8017_v9 = vld [vmem:[#allocation4 + $0x9] ss:$2 sm:$0xf]  ;;  %v12011_v22 = vadd.f32 %v7862_v51, %v15002_v38 }
 0x4f9   :  { %v8047_v13 = vmax.f32 %v7985_v28, %v8017_v9  ;;  %v7983_v11 = vld [vmem:[#allocation4] ss:$2 sm:$0xf]  ;;  %v8015_v31 = vld [vmem:[#allocation4 + $0x1] ss:$2 sm:$0xf]  ;;  %v7941_v58 = vadd.f32 %v12010_v18, %v14567_v47 }
 0x4fa   :  { %7972 = vst.msk [vmem:[#allocation4 + $0x28] sm:$0xff] %vm7966_vm7, %v7955_v37  ;;  %v8046_v54 = vmax.f32 %v7983_v11, %v8015_v31  ;;  %v7954_v12 = vmax.f32 %v7938_v26, 0.0  ;;  %v7940_v57 = vadd.f32 %v12011_v22, %v14567_v47  ;;  %v11732_v35 = vpop.f32.mrb[6].mxu1  ;;  %v15009_v28 = vld [vmem:[#allocation23_spill] sm:$0xff] }
 0x4fb   :  { %v7957_v23 = vmax.f32 %v7941_v58, 0.0  ;;  %v12012_v40 = vadd.f32 %v11732_v35, %v15003_v32  ;;  %v7872_v10 = vpop.f32.mrb[7].mxu1  ;;  %v15010_v32 = vld [vmem:[#allocation24_spill] sm:$0xff] }
 0x4fc   :  { %v8062_v49 = vmax.f32 %v8046_v54, %v8047_v13  ;;  %v7989_v53 = vld [vmem:[#allocation4 + $0x18] ss:$2 sm:$0xf]  ;;  %v8021_v29 = vld [vmem:[#allocation4 + $0x19] ss:$2 sm:$0xf]  ;;  %v12013_v8 = vadd.f32 %v7872_v10, %v15004_v48 }
 0x4fd   :  { %7971 = vst.msk [vmem:[#allocation4 + $0x20] sm:$0xff] %vm7966_vm7, %v7954_v12  ;;  %v8049_v14 = vmax.f32 %v7989_v53, %v8021_v29  ;;  %v7987_v60 = vld [vmem:[#allocation4 + $0x10] ss:$2 sm:$0xf]  ;;  %7974 = vst.msk [vmem:[#allocation4 + $0x38] sm:$0xff] %vm7966_vm7, %v7957_v23  ;;  %v7943_v20 = vadd.f32 %v12012_v40, %v14567_v47  ;;  %v7956_v62 = vmax.f32 %v7940_v57, 0.0 }
 0x4fe   :  { %v8019_v7 = vld [vmem:[#allocation4 + $0x11] ss:$2 sm:$0xf]  ;;  %v7942_v1 = vadd.f32 %v12013_v8, %v14567_v47  ;;  %8071 = vst.msk [vmem:[#allocation5] sm:$0xf] %vm8070_vm8, %v8062_v49  ;;  %v11735_v25 = vpop.f32.mrb[8].mxu1 }
 0x4ff   :  { %v8048_v34 = vmax.f32 %v7987_v60, %v8019_v7  ;;  %v7959_v36 = vmax.f32 %v7943_v20, 0.0  ;;  %v12014_v42 = vadd.f32 %v11735_v25, %v15005_v41  ;;  %v7882_v43 = vpop.f32.mrb[9].mxu1  ;;  %7973 = vst.msk [vmem:[#allocation4 + $0x30] sm:$0xff] %vm7966_vm7, %v7956_v62  ;;  %v8081_v41 = vld [vmem:[%s14905_s5] sm:$0xff] }
 0x500   :  { %v12015_v59 = vadd.f32 %v7882_v43, %v15006_v55  ;;  %v7958_v63 = vmax.f32 %v7942_v1, 0.0 }
 0x501   :  { %v8063_v27 = vmax.f32 %v8048_v34, %v8049_v14  ;;  %v7993_v46 = vld [vmem:[#allocation4 + $0x28] ss:$2 sm:$0xf]  ;;  %v8025_v50 = vld [vmem:[#allocation4 + $0x29] ss:$2 sm:$0xf]  ;;  %v7945_v0 = vadd.f32 %v12014_v42, %v14567_v47 }
 0x502   :  { %7976 = vst.msk [vmem:[#allocation4 + $0x48] sm:$0xff] %vm7966_vm7, %v7959_v36  ;;  %v8051_v2 = vmax.f32 %v7993_v46, %v8025_v50  ;;  %v7944_v5 = vadd.f32 %v12015_v59, %v14567_v47  ;;  %v11738_v6 = vpop.f32.mrb[10].mxu1  ;;  %7975 = vst.msk [vmem:[#allocation4 + $0x40] sm:$0xff] %vm7966_vm7, %v7958_v63  ;;  %v8082_v42 = vld [vmem:[%s14905_s5 + $0x8] sm:$0xff] }
 0x503   :  { %8072 = vst.msk [vmem:[#allocation5 + $0x4] sm:$0xf] %vm8070_vm8, %v8063_v27  ;;  %v12016_v39 = vadd.f32 %v11738_v6, %v15007_v44  ;;  %v7961_v3 = vmax.f32 %v7945_v0, 0.0  ;;  %v7892_v21 = vpop.f32.mrb[11].mxu1  ;;  %v10175_v44 = vld [vmem:[%s14905_s5 + $0x20] sm:$0xff] }
 0x504   :  { %v7991_v56 = vld [vmem:[#allocation4 + $0x20] ss:$2 sm:$0xf]  ;;  %v8023_v61 = vld [vmem:[#allocation4 + $0x21] ss:$2 sm:$0xf]  ;;  %v12017_v37 = vadd.f32 %v7892_v21, %v15008_v33 }
 0x505   :  { %v8050_v30 = vmax.f32 %v7991_v56, %v8023_v61  ;;  %v7997_v4 = vld [vmem:[#allocation4 + $0x38] ss:$2 sm:$0xf]  ;;  %v8029_v45 = vld [vmem:[#allocation4 + $0x39] ss:$2 sm:$0xf]  ;;  %v7947_v19 = vadd.f32 %v12016_v39, %v14567_v47 }
 0x506   :  { %v7960_v15 = vmax.f32 %v7944_v5, 0.0  ;;  %v8053_v26 = vmax.f32 %v7997_v4, %v8029_v45  ;;  %v11741_v52 = vpop.f32.mrb[12].mxu1  ;;  %v7995_v18 = vld [vmem:[#allocation4 + $0x30] ss:$2 sm:$0xf]  ;;  %7978 = vst.msk [vmem:[#allocation4 + $0x58] sm:$0xff] %vm7966_vm7, %v7961_v3  ;;  %v7946_v11 = vadd.f32 %v12017_v37, %v14567_v47  ;;  %v11922_v5 = vpack.c.bf16 %v8082_v42, %v8081_v41 }
 0x507   :  { %v8064_v24 = vmax.f32 %v8050_v30, %v8051_v2  ;;  %v8027_v51 = vld [vmem:[#allocation4 + $0x31] ss:$2 sm:$0xf]  ;;  %v12018_v9 = vadd.f32 %v11741_v52, %v15009_v28  ;;  %v7963_v58 = vmax.f32 %v7947_v19, 0.0  ;;  %v7902_v12 = vpop.f32.mrb[13].mxu1  ;;  %v10176_v39 = vld [vmem:[%s14905_s5 + $0x28] sm:$0xff] }
 0x508   :  { %7977 = vst.msk [vmem:[#allocation4 + $0x50] sm:$0xff] %vm7966_vm7, %v7960_v15  ;;  %v8052_v38 = vmax.f32 %v7995_v18, %v8027_v51  ;;  %v12019_v40 = vadd.f32 %v7902_v12, %v15010_v32  ;;  %v7962_v49 = vmax.f32 %v7946_v11, 0.0  ;;  %v8083_v56 = vld [vmem:[#allocation5 + $0x1] sm:$0x1]  ;;  %v11925_v19 = vpack.c.bf16 %v10176_v39, %v10175_v44  ;;  %v10179_v33 = vld [vmem:[%s14905_s5 + $0x38] sm:$0xff] }
 0x509   :  { %v8001_v22 = vld [vmem:[#allocation4 + $0x48] ss:$2 sm:$0xf]  ;;  %v8033_v13 = vld [vmem:[#allocation4 + $0x49] ss:$2 sm:$0xf]  ;;  %v7949_v54 = vadd.f32 %v12018_v9, %v14567_v47 }
 0x50a   :  { %8073 = vst.msk [vmem:[#allocation5 + $0x8] sm:$0xf] %vm8070_vm8, %v8064_v24  ;;  %v8055_v31 = vmax.f32 %v8001_v22, %v8033_v13  ;;  %v8065_v57 = vmax.f32 %v8052_v38, %v8053_v26  ;;  %v7999_v35 = vld [vmem:[#allocation4 + $0x40] ss:$2 sm:$0xf]  ;;  %v7948_v29 = vadd.f32 %v12019_v40, %v14567_v47  ;;  %v10178_v26 = vld [vmem:[%s14905_s5 + $0x30] sm:$0xff] }
 0x50b   :  { %v8031_v23 = vld [vmem:[#allocation4 + $0x41] ss:$2 sm:$0xf]  ;;  %7980 = vst.msk [vmem:[#allocation4 + $0x68] sm:$0xff] %vm7966_vm7, %v7963_v58  ;;  %v7965_v53 = vmax.f32 %v7949_v54, 0.0  ;;  %7979 = vst.msk [vmem:[#allocation4 + $0x60] sm:$0xff] %vm7966_vm7, %v7962_v49  ;;  %v11928_v51 = vpack.c.bf16 %v10179_v33, %v10178_v26 }
 0x50c   :  { %v8054_v10 = vmax.f32 %v7999_v35, %v8031_v23  ;;  %8074 = vst.msk [vmem:[#allocation5 + $0xc] sm:$0xf] %vm8070_vm8, %v8065_v57  ;;  %v7964_v62 = vmax.f32 %v7948_v29, 0.0  ;;  %v8079_v24 = vld [vmem:[#allocation5] sm:$0x1]  ;;  %v10182_v38 = vld [vmem:[%s14905_s5 + $0x48] sm:$0xff] }
 0x50d   :  { %7982 = vst.msk [vmem:[#allocation4 + $0x78] sm:$0xff] %vm7966_vm7, %v7965_v53  ;;  %v8005_v8 = vld [vmem:[#allocation4 + $0x58] ss:$2 sm:$0xf]  ;;  %v8241_v28 = vld [vmem:[#allocation5 + $0x2] sm:$0x1] }
 0x50e   :  { %v8066_v48 = vmax.f32 %v8054_v10, %v8055_v31  ;;  %v8037_v14 = vld [vmem:[#allocation4 + $0x59] ss:$2 sm:$0xf]  ;;  %7981 = vst.msk [vmem:[#allocation4 + $0x70] sm:$0xff] %vm7966_vm7, %v7964_v62  ;;  %v10181_v9 = vld [vmem:[%s14905_s5 + $0x40] sm:$0xff]  ;;  %v10184_v54 = vld [vmem:[%s14905_s5 + $0x50] sm:$0xff] }
 0x50f   :  { %v8057_v60 = vmax.f32 %v8005_v8, %v8037_v14  ;;  %v8003_v7 = vld [vmem:[#allocation4 + $0x50] ss:$2 sm:$0xf]  ;;  %v8035_v20 = vld [vmem:[#allocation4 + $0x51] ss:$2 sm:$0xf]  ;;  %v11931_v31 = vpack.c.bf16 %v10182_v38, %v10181_v9 }
 0x510   :  { %8075 = vst.msk [vmem:[#allocation5 + $0x10] sm:$0xf] %vm8070_vm8, %v8066_v48  ;;  %v8056_v34 = vmax.f32 %v8003_v7, %v8035_v20  ;;  %v8323_v58 = vld [vmem:[#allocation5 + $0x3] sm:$0x1]  ;;  %v10185_v12 = vld [vmem:[%s14905_s5 + $0x58] sm:$0xff]  ;;  %v10188_v49 = vld [vmem:[%s14905_s5 + $0x68] sm:$0xff] }
 0x511   :  { %v11934_v32 = vpack.c.bf16 %v10185_v12, %v10184_v54  ;;  %v8406_v40 = vld [vmem:[#allocation5 + $0x4] sm:$0x1]  ;;  %v8488_v14 = vld [vmem:[#allocation5 + $0x5] sm:$0x1]  ;;  %v10191_v7 = vld [vmem:[%s14905_s5 + $0x78] sm:$0xff] }
 0x512   :  { %v8067_v1 = vmax.f32 %v8056_v34, %v8057_v60  ;;  %v8009_v25 = vld [vmem:[#allocation4 + $0x68] ss:$2 sm:$0xf]  ;;  %v8041_v36 = vld [vmem:[#allocation4 + $0x69] ss:$2 sm:$0xf] }
 0x513   :  { %v8059_v47 = vmax.f32 %v8009_v25, %v8041_v36  ;;  %v8007_v43 = vld [vmem:[#allocation4 + $0x60] ss:$2 sm:$0xf]  ;;  %v8039_v27 = vld [vmem:[#allocation4 + $0x61] ss:$2 sm:$0xf] }
 0x514   :  { %8076 = vst.msk [vmem:[#allocation5 + $0x14] sm:$0xf] %vm8070_vm8, %v8067_v1  ;;  %v8058_v46 = vmax.f32 %v8007_v43, %v8039_v27  ;;  %v8013_v50 = vld [vmem:[#allocation4 + $0x78] ss:$2 sm:$0xf]  ;;  %v10187_v10 = vld [vmem:[%s14905_s5 + $0x60] sm:$0xff] }
 0x515   :  { %v8045_v55 = vld [vmem:[#allocation4 + $0x79] ss:$2 sm:$0xf]  ;;  %v8011_v30 = vld [vmem:[#allocation4 + $0x70] ss:$2 sm:$0xf]  ;;  %v11937_v8 = vpack.c.bf16 %v10188_v49, %v10187_v10 }
 0x516   :  { %v8068_v0 = vmax.f32 %v8058_v46, %v8059_v47  ;;  %v8061_v6 = vmax.f32 %v8013_v50, %v8045_v55  ;;  %v8043_v4 = vld [vmem:[#allocation4 + $0x71] ss:$2 sm:$0xf]  ;;  %v8570_v25 = vld [vmem:[#allocation5 + $0x6] sm:$0x1]  ;;  %v10194_v47 = vld [vmem:[%s14905_s5 + $0x88] sm:$0xff] }
 0x517   :  { %v8084_v59 = vld [vmem:[#allocation5 + $0x11] sm:$0x1]  ;;  %v8080_v63 = vld [vmem:[#allocation5 + $0x10] sm:$0x1]  ;;  %v8060_v3 = vmax.f32 %v8011_v30, %v8043_v4  ;;  %v8242_v15 = vld [vmem:[#allocation5 + $0x12] sm:$0x1] }
 0x518   :  { %v8090_v2 = vrot.slane %v8084_v59, 7  ;;  %v8167_v61 = vrot.slane %v8080_v63, 7  ;;  %8077 = vst.msk [vmem:[#allocation5 + $0x18] sm:$0xf] %vm8070_vm8, %v8068_v0  ;;  %v8248_v52 = vrot.slane %v8242_v15, 7  ;;  %v10190_v60 = vld [vmem:[%s14905_s5 + $0x70] sm:$0xff] }
 0x519   :  { %v8069_v21 = vmax.f32 %v8060_v3, %v8061_v6  ;;  %v8324_v18 = vld [vmem:[#allocation5 + $0x13] sm:$0x1]  ;;  %v11940_v1 = vpack.c.bf16 %v10191_v7, %v10190_v60  ;;  %v10193_v36 = vld [vmem:[%s14905_s5 + $0x80] sm:$0xff]  ;;  %v10197_v55 = vld [vmem:[%s14905_s5 + $0x98] sm:$0xff] }
 0x51a   :  { %v8092_v45 = vsel %vm8091_vm9, %v8090_v2, %v8083_v56  ;;  %v8168_v37 = vsel %vm8091_vm9, %v8167_v61, %v8079_v24  ;;  %v8249_v22 = vsel %vm8091_vm9, %v8248_v52, %v8241_v28  ;;  %v8330_v13 = vrot.slane %v8324_v18, 7  ;;  %v8652_v46 = vld [vmem:[#allocation5 + $0x7] sm:$0x1]  ;;  %v10196_v50 = vld [vmem:[%s14905_s5 + $0x90] sm:$0xff]  ;;  %v10200_v56 = vld [vmem:[%s14905_s5 + $0xa8] sm:$0xff] }
 0x51b   :  { %11747 = vmatmul.mubr.msk.f32.vlgmr.msra.gmra.mrb[160].mxu0 %vm7966_vm7, %v8092_v45  ;;  %8078 = vst.msk [vmem:[#allocation5 + $0x1c] sm:$0xf] %vm8070_vm8, %v8069_v21  ;;  %v8407_v11 = vld [vmem:[#allocation5 + $0x14] sm:$0x1]  ;;  %v8489_v23 = vld [vmem:[#allocation5 + $0x15] sm:$0x1]  ;;  %v11943_v27 = vpack.c.bf16 %v10194_v47, %v10193_v36  ;;  %v11946_v2 = vpack.c.bf16 %v10197_v55, %v10196_v50 }
 0x51c   :  { %11923 = vmatpush3.bf16.msra.mxu0 %v11922_v5  ;;  %11753 = vmatprep.mubr.msk.f32.mxu0 %vm12422_vm6, %v12423_v16  ;;  %v8331_v57 = vsel %vm8091_vm9, %v8330_v13, %v8323_v58  ;;  %v8413_v35 = vrot.slane %v8407_v11, 7  ;;  %v8495_v29 = vrot.slane %v8489_v23, 7  ;;  %v8571_v48 = vld [vmem:[#allocation5 + $0x16] sm:$0x1]  ;;  %v8653_v62 = vld [vmem:[#allocation5 + $0x17] sm:$0x1] }
 0x51d   :  { %11924 = vmatprep.subr.bf16.mxu0 %v12421_v17  ;;  %v8577_v34 = vrot.slane %v8571_v48, 7  ;;  %v8659_v42 = vrot.slane %v8653_v62, 7  ;;  %v8735_v5 = vld [vmem:[#allocation5 + $0x8] sm:$0x1]  ;;  %v10199_v6 = vld [vmem:[%s14905_s5 + $0xa0] sm:$0xff]  ;;  %v10202_v45 = vld [vmem:[%s14905_s5 + $0xb0] sm:$0xff] }
 0x51e   :  { %v8414_v53 = vsel %vm8091_vm9, %v8413_v35, %v8406_v40  ;;  %v8496_v20 = vsel %vm8091_vm9, %v8495_v29, %v8488_v14  ;;  %v11949_v30 = vpack.c.bf16 %v10200_v56, %v10199_v6  ;;  %v8817_v4 = vld [vmem:[#allocation5 + $0x9] sm:$0x1]  ;;  %v10203_v3 = vld [vmem:[%s14905_s5 + $0xb8] sm:$0xff]  ;;  %v8899_v26 = vld [vmem:[#allocation5 + $0xa] sm:$0x1] }
 0x51f   :  { %11754 = vmatmul.mubr.msk.f32.vlgmr.msra.gmra.mrb[162].mxu0 %vm7966_vm7, %v8168_v37  ;;  %v8578_v41 = vsel %vm8091_vm9, %v8577_v34, %v8570_v25  ;;  %v8736_v43 = vld [vmem:[#allocation5 + $0x18] sm:$0x1]  ;;  %v8660_v59 = vsel %vm8091_vm9, %v8659_v42, %v8652_v46  ;;  %v8818_v0 = vld [vmem:[#allocation5 + $0x19] sm:$0x1]  ;;  %v8900_v39 = vld [vmem:[#allocation5 + $0x1a] sm:$0x1]  ;;  %v11952_v24 = vpack.c.bf16 %v10203_v3, %v10202_v45 }
 0x520   :  { %11926 = vmatpush3.bf16.msra.mxu0 %v11925_v19  ;;  %11760 = vmatprep.mubr.msk.f32.mxu0 %vm12422_vm6, %v12423_v16  ;;  %v8742_v63 = vrot.slane %v8736_v43, 7  ;;  %v8824_v44 = vrot.slane %v8818_v0, 7  ;;  %v8906_v19 = vrot.slane %v8900_v39, 7  ;;  %v8982_v21 = vld [vmem:[#allocation5 + $0x1b] sm:$0x1]  ;;  %v10205_v33 = vld [vmem:[%s14905_s5 + $0xc0] sm:$0xff] }
 0x521   :  { %11927 = vmatprep.subr.bf16.mxu0 %v12421_v17  ;;  %v10206_v37 = vld [vmem:[%s14905_s5 + $0xc8] sm:$0xff]  ;;  %v8988_v18 = vrot.slane %v8982_v21, 7  ;;  %v10208_v38 = vld [vmem:[%s14905_s5 + $0xd0] sm:$0xff]  ;;  %v10211_v12 = vld [vmem:[%s14905_s5 + $0xe0] sm:$0xff] }
 0x522   :  { %v8743_v61 = vsel %vm8091_vm9, %v8742_v63, %v8735_v5  ;;  %v8825_v15 = vsel %vm8091_vm9, %v8824_v44, %v8817_v4  ;;  %v8907_v52 = vsel %vm8091_vm9, %v8906_v19, %v8899_v26  ;;  %v11955_v28 = vpack.c.bf16 %v10206_v37, %v10205_v33  ;;  %v8981_v9 = vld [vmem:[#allocation5 + $0xb] sm:$0x1]  ;;  %v9064_v54 = vld [vmem:[#allocation5 + $0xc] sm:$0x1]  ;;  %v9146_v10 = vld [vmem:[#allocation5 + $0xd] sm:$0x1] }
 0x523   :  { %11761 = vmatmul.mubr.msk.f32.vlgmr.msra.gmra.mrb[164].mxu0 %vm7966_vm7, %v8249_v22  ;;  %v10209_v22 = vld [vmem:[%s14905_s5 + $0xd8] sm:$0xff]  ;;  %v8989_v13 = vsel %vm8091_vm9, %v8988_v18, %v8981_v9  ;;  %v10214_v49 = vld [vmem:[%s14905_s5 + $0xf0] sm:$0xff]  ;;  %v9228_v60 = vld [vmem:[#allocation5 + $0xe] sm:$0x1] }
 0x524   :  { %11929 = vmatpush3.bf16.msra.mxu0 %v11928_v51  ;;  %11767 = vmatprep.mubr.msk.f32.mxu0 %vm12422_vm6, %v12423_v16  ;;  %v9065_v51 = vld [vmem:[#allocation5 + $0x1c] sm:$0x1]  ;;  %v11958_v58 = vpack.c.bf16 %v10209_v22, %v10208_v38  ;;  %v9310_v34 = vld [vmem:[#allocation5 + $0xf] sm:$0x1]  ;;  %v9403_v47 = vld [vmem:[%s14907_s7 + $0x10] sm:$0xff] }
 0x525   :  { %11930 = vmatprep.subr.bf16.mxu0 %v12421_v17  ;;  %v9071_v11 = vrot.slane %v9065_v51, 7  ;;  %v9402_v25 = vld [vmem:[%s14907_s7 + $0x8] sm:$0xff]  ;;  %v9405_v43 = vld [vmem:[%s14907_s7 + $0x20] sm:$0xff]  ;;  %v9407_v50 = vld [vmem:[%s14907_s7 + $0x30] sm:$0xff] }
 0x526   :  { %v9408_v55 = vld [vmem:[%s14907_s7 + $0x38] sm:$0xff]  ;;  %v9409_v63 = vld [vmem:[%s14907_s7 + $0x40] sm:$0xff]  ;;  %v9410_v0 = vld [vmem:[%s14907_s7 + $0x48] sm:$0xff] }
 0x527   :  { %11768 = vmatmul.mubr.msk.f32.vlgmr.msra.gmra.mrb[166].mxu0 %vm7966_vm7, %v8331_v57  ;;  %v10212_v57 = vld [vmem:[%s14905_s5 + $0xe8] sm:$0xff]  ;;  %v9072_v35 = vsel %vm8091_vm9, %v9071_v11, %v9064_v54  ;;  %v9411_v5 = vld [vmem:[%s14907_s7 + $0x50] sm:$0xff]  ;;  %v9412_v6 = vld [vmem:[%s14907_s7 + $0x58] sm:$0xff] }
 0x528   :  { %11932 = vmatpush3.bf16.msra.mxu0 %v11931_v31  ;;  %11774 = vmatprep.mubr.msk.f32.mxu0 %vm12422_vm6, %v12423_v16  ;;  %v9147_v31 = vld [vmem:[#allocation5 + $0x1d] sm:$0x1]  ;;  %v11961_v40 = vpack.c.bf16 %v10212_v57, %v10211_v12  ;;  %v11982_v56 = vpack.c.bf16 %v9412_v6, %v9411_v5  ;;  %v9414_v44 = vld [vmem:[%s14907_s7 + $0x68] sm:$0xff]  ;;  %v9497_v5 = vld [vmem:[%s14909_s9 + $0x10] sm:$0xff] }
 0x529   :  { %11933 = vmatprep.subr.bf16.mxu0 %v12421_v17  ;;  %v9153_v23 = vrot.slane %v9147_v31, 7  ;;  %v9416_v4 = vld [vmem:[%s14907_s7 + $0x78] sm:$0xff] }
 0x52a   :  { %v9498_v6 = vld [vmem:[%s14909_s9 + $0x18] sm:$0xff] }
 0x52b   :  { %11775 = vmatmul.mubr.msk.f32.vlgmr.msra.gmra.mrb[168].mxu0 %vm7966_vm7, %v8414_v53  ;;  %v10215_v53 = vld [vmem:[%s14905_s5 + $0xf8] sm:$0xff]  ;;  %v9154_v29 = vsel %vm8091_vm9, %v9153_v23, %v9146_v10 }
 0x52c   :  { %11935 = vmatpush3.bf16.msra.mxu0 %v11934_v32  ;;  %11781 = vmatprep.mubr.msk.f32.mxu0 %vm12422_vm6, %v12423_v16  ;;  %v9229_v32 = vld [vmem:[#allocation5 + $0x1e] sm:$0x1]  ;;  %v11964_v14 = vpack.c.bf16 %v10215_v53, %v10214_v49 }
 0x52d   :  { %11936 = vmatprep.subr.bf16.mxu0 %v12421_v17  ;;  %v9235_v48 = vrot.slane %v9229_v32, 7 }
 0x52f   :  { %11782 = vmatmul.mubr.msk.f32.vlgmr.msra.gmra.mrb[170].mxu0 %vm7966_vm7, %v8496_v20  ;;  %v9236_v7 = vsel %vm8091_vm9, %v9235_v48, %v9228_v60 }
 0x530   :  { %11938 = vmatpush3.bf16.msra.mxu0 %v11937_v8  ;;  %11788 = vmatprep.mubr.msk.f32.mxu0 %vm12422_vm6, %v12423_v16  ;;  %v9311_v8 = vld [vmem:[#allocation5 + $0x1f] sm:$0x1] }
 0x531   :  { %11939 = vmatprep.subr.bf16.mxu0 %v12421_v17  ;;  %v9317_v20 = vrot.slane %v9311_v8, 7 }
 0x533   :  { %11789 = vmatmul.mubr.msk.f32.vlgmr.msra.gmra.mrb[172].mxu0 %vm7966_vm7, %v8578_v41  ;;  %v9318_v62 = vsel %vm8091_vm9, %v9317_v20, %v9310_v34  ;;  %v9404_v41 = vld [vmem:[%s14907_s7 + $0x18] sm:$0xff] }
 0x534   :  { %11941 = vmatpush3.bf16.msra.mxu0 %v11940_v1  ;;  %11795 = vmatprep.mubr.msk.f32.mxu0 %vm12422_vm6, %v12423_v16  ;;  %v9401_v1 = vld [vmem:[%s14907_s7] sm:$0xff]  ;;  %v11970_v42 = vpack.c.bf16 %v9404_v41, %v9403_v47 }
 0x535   :  { %11942 = vmatprep.subr.bf16.mxu0 %v12421_v17  ;;  %v11967_v36 = vpack.c.bf16 %v9402_v25, %v9401_v1 }
 0x537   :  { %11796 = vmatmul.mubr.msk.f32.vlgmr.msra.gmra.mrb[174].mxu0 %vm7966_vm7, %v8660_v59  ;;  %v11976_v59 = vpack.c.bf16 %v9408_v55, %v9407_v50  ;;  %v9495_v55 = vld [vmem:[%s14909_s9] sm:$0xff] }
 0x538   :  { %11944 = vmatpush3.bf16.msra.mxu0 %v11943_v27  ;;  %11802 = vmatprep.mubr.msk.f32.mxu0 %vm12422_vm6, %v12423_v16  ;;  %v9406_v27 = vld [vmem:[%s14907_s7 + $0x28] sm:$0xff] }
 0x539   :  { %11945 = vmatprep.subr.bf16.mxu0 %v12421_v17  ;;  %v11973_v46 = vpack.c.bf16 %v9406_v27, %v9405_v43  ;;  %v10217_v27 = vld [vmem:[%s14906_s6] ss:$0 sm:$0xff] }
 0x53b   :  { %11803 = vmatmul.mubr.msk.f32.vlgmr.msra.gmra.mrb[176].mxu0 %vm7966_vm7, %v8743_v61  ;;  %v9413_v61 = vld [vmem:[%s14907_s7 + $0x60] sm:$0xff] }
 0x53c   :  { %11947 = vmatpush3.bf16.msra.mxu0 %v11946_v2  ;;  %11809 = vmatprep.mubr.msk.f32.mxu0 %vm12422_vm6, %v12423_v16  ;;  %v11979_v2 = vpack.c.bf16 %v9410_v0, %v9409_v63  ;;  %v11985_v39 = vpack.c.bf16 %v9414_v44, %v9413_v61  ;;  %v9499_v61 = vld [vmem:[%s14909_s9 + $0x20] sm:$0xff]  ;;  %v9500_v44 = vld [vmem:[%s14909_s9 + $0x28] sm:$0xff] }
 0x53d   :  { %11948 = vmatprep.subr.bf16.mxu0 %v12421_v17 }
 0x53f   :  { %11810 = vmatmul.mubr.msk.f32.vlgmr.msra.gmra.mrb[178].mxu0 %vm7966_vm7, %v8825_v15 }
 0x540   :  { %11950 = vmatpush3.bf16.msra.mxu0 %v11949_v30  ;;  %11816 = vmatprep.mubr.msk.f32.mxu0 %vm12422_vm6, %v12423_v16  ;;  %v9415_v30 = vld [vmem:[%s14907_s7 + $0x70] sm:$0xff] }
 0x541   :  { %11951 = vmatprep.subr.bf16.mxu0 %v12421_v17  ;;  %v11988_v45 = vpack.c.bf16 %v9416_v4, %v9415_v30  ;;  %v9502_v30 = vld [vmem:[%s14909_s9 + $0x38] sm:$0xff] }
 0x543   :  { %11817 = vmatmul.mubr.msk.f32.vlgmr.msra.gmra.mrb[180].mxu0 %vm7966_vm7, %v8907_v52 }
 0x544   :  { %11953 = vmatpush3.bf16.msra.mxu0 %v11952_v24  ;;  %11823 = vmatprep.mubr.msk.f32.mxu0 %vm12422_vm6, %v12423_v16 }
 0x545   :  { %11954 = vmatprep.subr.bf16.mxu0 %v12421_v17 }
 0x547   :  { %11824 = vmatmul.mubr.msk.f32.vlgmr.msra.gmra.mrb[182].mxu0 %vm7966_vm7, %v8989_v13 }
 0x548   :  { %11956 = vmatpush3.bf16.msra.mxu0 %v11955_v28  ;;  %11830 = vmatprep.mubr.msk.f32.mxu0 %vm12422_vm6, %v12423_v16 }
 0x549   :  { %11957 = vmatprep.subr.bf16.mxu0 %v12421_v17 }
 0x54b   :  { %11831 = vmatmul.mubr.msk.f32.vlgmr.msra.gmra.mrb[184].mxu0 %vm7966_vm7, %v9072_v35 }
 0x54c   :  { %11959 = vmatpush3.bf16.msra.mxu0 %v11958_v58  ;;  %11837 = vmatprep.mubr.msk.f32.mxu0 %vm12422_vm6, %v12423_v16 }
 0x54d   :  { %11960 = vmatprep.subr.bf16.mxu0 %v12421_v17 }
 0x54f   :  { %11838 = vmatmul.mubr.msk.f32.vlgmr.msra.gmra.mrb[186].mxu0 %vm7966_vm7, %v9154_v29 }
 0x550   :  { %11962 = vmatpush3.bf16.msra.mxu0 %v11961_v40  ;;  %11844 = vmatprep.mubr.msk.f32.mxu0 %vm12422_vm6, %v12423_v16 }
 0x551   :  { %11963 = vmatprep.subr.bf16.mxu0 %v12421_v17 }
 0x553   :  { %11845 = vmatmul.mubr.msk.f32.vlgmr.msra.gmra.mrb[188].mxu0 %vm7966_vm7, %v9236_v7 }
 0x554   :  { %11965 = vmatpush3.bf16.msra.mxu0 %v11964_v14  ;;  %11851 = vmatprep.mubr.msk.f32.mxu0 %vm12422_vm6, %v12423_v16 }
 0x555   :  { %11966 = vmatprep.subr.bf16.mxu0 %v12421_v17 }
 0x557   :  { %11852 = vmatmul.mubr.msk.f32.vlgmr.msra.gmra.mrb[190].mxu0 %vm7966_vm7, %v9318_v62 }
 0x558   :  { %11886 = vmatprep.mubr.msk.f32.mxu0 %vm12422_vm6, %v12423_v16  ;;  %11968 = vmatpush3.bf16.msra.mxu0 %v11967_v36 }
 0x559   :  { %11969 = vmatprep.subr.bf16.mxu0 %v12421_v17 }
 0x55c   :  { %11971 = vmatpush3.bf16.msra.mxu0 %v11970_v42 }
 0x55d   :  { %11972 = vmatprep.subr.bf16.mxu0 %v12421_v17 }
 0x560   :  { %11974 = vmatpush3.bf16.msra.mxu0 %v11973_v46 }
 0x561   :  { %11975 = vmatprep.subr.bf16.mxu0 %v12421_v17 }
 0x564   :  { %11977 = vmatpush3.bf16.msra.mxu0 %v11976_v59  ;;  %v9496_v59 = vld [vmem:[%s14909_s9 + $0x8] sm:$0xff] }
 0x565   :  { %11978 = vmatprep.subr.bf16.mxu0 %v12421_v17  ;;  %v11991_v0 = vpack.c.bf16 %v9496_v59, %v9495_v55 }
 0x568   :  { %11980 = vmatpush3.bf16.msra.mxu0 %v11979_v2 }
 0x569   :  { %11981 = vmatprep.subr.bf16.mxu0 %v12421_v17 }
 0x56c   :  { %11983 = vmatpush3.bf16.msra.mxu0 %v11982_v56  ;;  %v11994_v56 = vpack.c.bf16 %v9498_v6, %v9497_v5 }
 0x56d   :  { %11984 = vmatprep.subr.bf16.mxu0 %v12421_v17 }
 0x570   :  { %11986 = vmatpush3.bf16.msra.mxu0 %v11985_v39  ;;  %v11997_v39 = vpack.c.bf16 %v9500_v44, %v9499_v61 }
 0x571   :  { %11987 = vmatprep.subr.bf16.mxu0 %v12421_v17 }
 0x574   :  { %11989 = vmatpush3.bf16.msra.mxu0 %v11988_v45  ;;  %v10218_v45 = vld [vmem:[%s14908_s8] ss:$0 sm:$0xff] }
 0x575   :  { %11990 = vmatprep.subr.bf16.mxu0 %v12421_v17 }
 0x5ee   :  { %v8161_v3 = vpop.f32.mrb[160].mxu0 }
 0x5ef   :  { %v11748_v15 = vpop.f32.mrb[161].mxu0 }
 0x5f2   :  { %v8237_v19 = vpop.f32.mrb[162].mxu0 }
 0x5f3   :  { %v8238_v21 = vadd.f32 %v8237_v19, %v8161_v3  ;;  %v11755_v24 = vpop.f32.mrb[163].mxu0 }
 0x5f6   :  { %v8318_v26 = vpop.f32.mrb[164].mxu0 }
 0x5f7   :  { %v8322_v33 = vadd.f32 %v8318_v26, %v8238_v21  ;;  %v11762_v37 = vpop.f32.mrb[165].mxu0 }
 0x5fa   :  { %v8400_v52 = vpop.f32.mrb[166].mxu0 }
 0x5fb   :  { %v8404_v18 = vadd.f32 %v8400_v52, %v8322_v33  ;;  %v11769_v51 = vpop.f32.mrb[167].mxu0 }
 0x5fe   :  { %v8483_v28 = vpop.f32.mrb[168].mxu0 }
 0x5ff   :  { %v8487_v9 = vadd.f32 %v8483_v28, %v8404_v18  ;;  %v11776_v38 = vpop.f32.mrb[169].mxu0 }
 0x602   :  { %v8565_v22 = vpop.f32.mrb[170].mxu0 }
 0x603   :  { %v8569_v13 = vadd.f32 %v8565_v22, %v8487_v9  ;;  %v11783_v11 = vpop.f32.mrb[171].mxu0 }
 0x606   :  { %v8647_v31 = vpop.f32.mrb[172].mxu0 }
 0x607   :  { %v8651_v58 = vadd.f32 %v8647_v31, %v8569_v13  ;;  %v11790_v54 = vpop.f32.mrb[173].mxu0 }
 0x60a   :  { %v8729_v12 = vpop.f32.mrb[174].mxu0 }
 0x60b   :  { %v8733_v57 = vadd.f32 %v8729_v12, %v8651_v58  ;;  %v11797_v35 = vpop.f32.mrb[175].mxu0 }
 0x60e   :  { %v8812_v23 = vpop.f32.mrb[176].mxu0 }
 0x60f   :  { %v8816_v32 = vadd.f32 %v8812_v23, %v8733_v57  ;;  %v11804_v40 = vpop.f32.mrb[177].mxu0 }
 0x612   :  { %v8894_v10 = vpop.f32.mrb[178].mxu0 }
 0x613   :  { %v8898_v49 = vadd.f32 %v8894_v10, %v8816_v32  ;;  %v11811_v53 = vpop.f32.mrb[179].mxu0 }
 0x616   :  { %v8976_v29 = vpop.f32.mrb[180].mxu0 }
 0x617   :  { %v8980_v48 = vadd.f32 %v8976_v29, %v8898_v49  ;;  %v11818_v8 = vpop.f32.mrb[181].mxu0 }
 0x61a   :  { %v9058_v14 = vpop.f32.mrb[182].mxu0 }
 0x61b   :  { %v9062_v60 = vadd.f32 %v9058_v14, %v8980_v48  ;;  %v11825_v7 = vpop.f32.mrb[183].mxu0 }
 0x61e   :  { %v9141_v20 = vpop.f32.mrb[184].mxu0 }
 0x61f   :  { %v9145_v34 = vadd.f32 %v9141_v20, %v9062_v60  ;;  %v11832_v62 = vpop.f32.mrb[185].mxu0 }
 0x622   :  { %v9223_v1 = vpop.f32.mrb[186].mxu0 }
 0x623   :  { %v9227_v25 = vadd.f32 %v9223_v1, %v9145_v34  ;;  %v11839_v36 = vpop.f32.mrb[187].mxu0 }
 0x626   :  { %v9305_v47 = vpop.f32.mrb[188].mxu0 }
 0x627   :  { %v9309_v41 = vadd.f32 %v9305_v47, %v9227_v25  ;;  %v11846_v42 = vpop.f32.mrb[189].mxu0 }
 0x62a   :  { %v9387_v43 = vpop.f32.mrb[190].mxu0 }
 0x62b   :  { %v9391_v46 = vadd.f32 %v9387_v43, %v9309_v41  ;;  %v11853_v50 = vpop.f32.mrb[191].mxu0 }
 0x62d   :  { %v9399_v63 = vadd.f32 %v10217_v27, %v9391_v46 }
 0x62f   :  { %v9400_v2 = vmax.f32 %v9399_v63, 0.0 }
 0x631   :  { %11887 = vmatmul.mubr.f32.vlgmr.msra.gmra.mrb[192].mxu0 %v9400_v2 }
 0x632   :  { %11992 = vmatpush3.bf16.msra.mxu0 %v11991_v0  ;;  %11905 = vmatprep.mubr.msk.f32.mxu0 %vm12422_vm6, %v12423_v16  ;;  %v9501_v16 = vld [vmem:[%s14909_s9 + $0x30] sm:$0xff]  ;;  %s12396_s9 = scalar_lea.vmem %s9593_s23, 32 }
 0x633   :  { %11993 = vmatprep.subr.bf16.mxu0 %v12421_v17  ;;  %v12000_v4 = vpack.c.bf16 %v9502_v30, %v9501_v16  ;;  %p12397_p0 = scmp.ne.s32.totalorder %s9593_s23, %s12396_s9  ;;  %p12402_p2 = scmp.lt.s32.totalorder %s12396_s9, %s12396_s9 }
 0x635   :  { %p12403_p3 = por %p12402_p2, %p12401_p1 }
 0x636   :  { %11995 = vmatpush3.bf16.msra.mxu0 %v11994_v56 }
 0x637   :  { %11996 = vmatprep.subr.bf16.mxu0 %v12421_v17  ;;  %p12404_p4 = pnand %p12403_p3, %p12397_p0 }
 0x63a   :  { %11998 = vmatpush3.bf16.msra.mxu0 %v11997_v39 }
 0x63b   :  { %11999 = vmatprep.subr.bf16.mxu0 %v12421_v17  ;;  %v10219_v17 = vld [vmem:[%s14910_s10] ss:$0 sm:$0xff] }
 0x63e   :  { %12001 = vmatpush3.bf16.msra.mxu0 %v12000_v4 }
 0x704   :  { %v9490_v3 = vpop.f32.mrb[192].mxu0 }
 0x705   :  { %v9491_v15 = vadd.f32 %v10218_v45, %v9490_v3  ;;  %v11888_v19 = vpop.f32.mrb[193].mxu0 }
 0x707   :  { %v9494_v21 = vmax.f32 %v9491_v15, 0.0 }
 0x709   :  { %11906 = vmatmul.mubr.msk.f32.vlgmr.msra.gmra.mrb[194].mxu0 %vm9510_vm10, %v9494_v21 }
 0x7dc   :  { %v9580_v24 = vpop.f32.mrb[194].mxu0 }
 0x7dd   :  { %v9581_v26 = vadd.f32 %v10219_v17, %v9580_v24  ;;  %v11907_v33 = vpop.f32.mrb[195].mxu0 }
 0x7df   :  { %9585 = vst.msk [vmem:[#allocation6] sm:$0x3] %vm9584_vm11, %v9581_v26 }
 0x7e0   :  { %12407 = shalt.err (!%p12404_p4)
}
 0x7e1   :  { %s12408_s2 = scalar_lea.hbm %s14911_s11, 32 }
 0x7e2   :  { %p12409_p5 = scmp.ne.s32.totalorder %s14911_s11, %s12408_s2  ;;  %p12412_p6 = scmp.lt.u32.totalorder %s12408_s2, %s14911_s11 }
 0x7e4   :  { %p12414_p7 = pnand %p12412_p6, %p12409_p5 }
 0x7e6   :  { %12417 = shalt.err (!%p12414_p7)
}
 0x7e7   :  { %9595 = dma.vmem_to_hbm [thread:$0]  %s9593_s23, 32, %s14911_s11, [#allocation7]  }
 0x7e8   :  { %12418 = dma.done.wait [#allocation7], 32  }
 0x7e9   :  { %12419 = vsyncadd [#allocation7], 4294967264 }
 0x7ea   :  { %9599 = vsyncpa [#allocation7], 1 }

</bundles_post_ra>
